<compile_context>
chip_gen: v5e
topology: v5e:2x2
jax: 0.10.0
libtpu: 0.0.40
codegen_flags: <defaults>
</compile_context>

<pallas_src>
import jax
import jax.numpy as jnp
from jax.experimental import pallas as pl
from jax.experimental.pallas import tpu as pltpu

# Logical (PyTorch) feature sizes.
D_IN = 529
D_MID = 529
D_H = 257

# Lane-padded sizes (multiples of 128) used inside the kernel.
D_IN_P = 640
D_MID_P = 640
D_H_P = 384


def _round_up(x, m):
    return ((x + m - 1) // m) * m


def _encoder_kernel(x_ref,
                    w1_ref, b1_ref, w2_ref, b2_ref,
                    w3_ref, b3_ref, w4_ref, b4_ref,
                    wh_ref, bh_ref,
                    out_ref):
    """Whole MLP for one batch tile: 4 hidden linears + fused mean|log_var head."""
    h = x_ref[...]                                       # bf16 (block_b, 640)

    h = jnp.dot(h, w1_ref[...], preferred_element_type=jnp.float32) + b1_ref[...]
    h = jnp.maximum(h, 0.0).astype(jnp.bfloat16)

    h = jnp.dot(h, w2_ref[...], preferred_element_type=jnp.float32) + b2_ref[...]
    h = jnp.maximum(h, 0.0).astype(jnp.bfloat16)

    h = jnp.dot(h, w3_ref[...], preferred_element_type=jnp.float32) + b3_ref[...]
    h = jnp.maximum(h, 0.0).astype(jnp.bfloat16)

    # No ReLU after the 4th linear (matches the PyTorch module).
    h = (jnp.dot(h, w4_ref[...], preferred_element_type=jnp.float32)
         + b4_ref[...]).astype(jnp.bfloat16)

    # Fused mean|log_var head -> one lane-dense output write.
    out_ref[...] = (jnp.dot(h, wh_ref[...], preferred_element_type=jnp.float32)
                    + bh_ref[...]).astype(out_ref.dtype)


def prepare_params(params):
    """Zero-pad feature dims to 128-multiples, fuse the two heads, cast weights to bf16."""
    latent_dim = params["wm"].shape[1]
    head_p = _round_up(2 * latent_dim, 128)

    def pad_w(w, rows, cols):
        out = jnp.zeros((rows, cols), jnp.float32)
        return out.at[:w.shape[0], :w.shape[1]].set(w).astype(jnp.bfloat16)

    def pad_b(b, cols):
        out = jnp.zeros((1, cols), jnp.float32)
        return out.at[:, :b.shape[1]].set(b)

    wh = jnp.concatenate([params["wm"], params["wv"]], axis=1)   # (257, 2L)
    bh = jnp.concatenate([params["bm"], params["bv"]], axis=1)   # (1, 2L)

    prepped = {
        "w1": pad_w(params["w1"], D_IN_P, D_MID_P),  "b1": pad_b(params["b1"], D_MID_P),
        "w2": pad_w(params["w2"], D_MID_P, D_MID_P), "b2": pad_b(params["b2"], D_MID_P),
        "w3": pad_w(params["w3"], D_MID_P, D_H_P),   "b3": pad_b(params["b3"], D_H_P),
        "w4": pad_w(params["w4"], D_H_P, D_H_P),     "b4": pad_b(params["b4"], D_H_P),
        "wh": pad_w(wh, D_H_P, head_p),              "bh": pad_b(bh, head_p),
    }
    return prepped, latent_dim, head_p


def _choose_block_b(batch):
    # v6e: 256-row tiles; v5e: 128; small batches: split into 2 tiles, rows % 8 == 0.
    if batch >= 512:
        return 256
    if batch >= 256:
        return 128
    return max(8, _round_up(-(-batch // 2), 8))


def visual_encoder_forward(x, params, *, block_b=None):
    """x: [B, 529] float. Returns (mean, log_var), each [B, latent_dim] float32."""
    B = x.shape[0]
    prepped, latent_dim, head_p = prepare_params(params)

    if block_b is None:
        block_b = _choose_block_b(B)
    block_b = _round_up(block_b, 8)
    # >= 2 tiles: both v7x TensorCores get work and x-tile DMA pipelines on all chips.
    num_tiles = max(2, pl.cdiv(B, block_b))
    b_pad = num_tiles * block_b

    x_pad = jnp.zeros((b_pad, D_IN_P), jnp.bfloat16)
    x_pad = x_pad.at[:B, :D_IN].set(x.astype(jnp.bfloat16))

    def tile_spec(cols):
        return pl.BlockSpec((block_b, cols), lambda i: (i, 0))

    def full_spec(arr):
        return pl.BlockSpec(arr.shape, lambda i: (0, 0))

    weight_order = ["w1", "b1", "w2", "b2", "w3", "b3", "w4", "b4", "wh", "bh"]
    weight_args = [prepped[k] for k in weight_order]

    in_specs = [tile_spec(D_IN_P)] + [full_spec(a) for a in weight_args]
    out_specs = tile_spec(head_p)
    out_shape = jax.ShapeDtypeStruct((b_pad, head_p), jnp.float32)

    flops = 2 * b_pad * (D_IN_P * D_MID_P + D_MID_P * D_MID_P
                         + D_MID_P * D_H_P + D_H_P * D_H_P + D_H_P * head_p)
    bytes_accessed = int(x_pad.size * x_pad.dtype.itemsize
                         + sum(a.size * a.dtype.itemsize for a in weight_args)
                         + b_pad * head_p * 4)

    fn = pl.pallas_call(
        _encoder_kernel,
        grid_spec=pltpu.PrefetchScalarGridSpec(
            num_scalar_prefetch=0,
            grid=(num_tiles,),
            in_specs=in_specs,
            out_specs=out_specs,
        ),
        out_shape=out_shape,
        compiler_params=pltpu.CompilerParams(
            dimension_semantics=("parallel",),
            vmem_limit_bytes=32 * 1024 * 1024,
        ),
        cost_estimate=pl.CostEstimate(
            flops=flops, transcendentals=0, bytes_accessed=bytes_accessed),
    )
    fused = fn(x_pad, *weight_args)

    mean = fused[:B, :latent_dim]
    log_var = fused[:B, latent_dim:2 * latent_dim]
    return mean, log_var


def init_params(key, latent_dim):
    """Deterministic synthetic init. Weights stored as (in, out), biases as (1, out)."""
    dims = [
        ("w1", "b1", D_IN, D_MID),
        ("w2", "b2", D_MID, D_MID),
        ("w3", "b3", D_MID, D_H),
        ("w4", "b4", D_H, D_H),
        ("wm", "bm", D_H, latent_dim),
        ("wv", "bv", D_H, latent_dim),
    ]
    params = {}
    for (wname, bname, d_in, d_out) in dims:
        key, kw, kb = jax.random.split(key, 3)
        scale = 1.0 / jnp.sqrt(jnp.float32(d_in))
        params[wname] = jax.random.uniform(
            kw, (d_in, d_out), jnp.float32, -scale, scale)
        params[bname] = jax.random.uniform(
            kb, (1, d_out), jnp.float32, -scale, scale)
    return params


def reference_forward(x, params):
    """Plain-JAX mirror of the kernel math (same bf16 rounding, f32 accumulation)."""
    prepped, latent_dim, _ = prepare_params(params)
    B = x.shape[0]
    h = jnp.zeros((B, D_IN_P), jnp.bfloat16).at[:, :D_IN].set(x.astype(jnp.bfloat16))

    def lin(h, w, b, relu):
        y = jnp.dot(h, w, preferred_element_type=jnp.float32) + b
        if relu:
            y = jnp.maximum(y, 0.0)
        return y.astype(jnp.bfloat16)

    h = lin(h, prepped["w1"], prepped["b1"], True)
    h = lin(h, prepped["w2"], prepped["b2"], True)
    h = lin(h, prepped["w3"], prepped["b3"], True)
    h = lin(h, prepped["w4"], prepped["b4"], False)
    out = jnp.dot(h, prepped["wh"], preferred_element_type=jnp.float32) + prepped["bh"]
    return out[:, :latent_dim], out[:, latent_dim:2 * latent_dim]


if __name__ == "__main__":
    latent_dim = 32
    batch = 8

    key = jax.random.PRNGKey(0)
    key, kx = jax.random.split(key)
    x = jax.random.normal(kx, (batch, D_IN), jnp.float32)
    params = init_params(key, latent_dim)

    mean, log_var = visual_encoder_forward(x, params)
    jax.block_until_ready((mean, log_var))

    # Sanity check against a plain-JAX reference with identical bf16/f32 semantics.
    ref_mean, ref_log_var = reference_forward(x, params)
    assert mean.shape == (batch, latent_dim) and log_var.shape == (batch, latent_dim)
    assert jnp.allclose(mean, ref_mean, atol=1e-2, rtol=1e-2)
    assert jnp.allclose(log_var, ref_log_var, atol=1e-2, rtol=1e-2)

    print("KERNEL_OK")
</pallas_src>

<mosaic_0001>
module attributes {stable_mosaic.version = 11 : i64} {
  func.func @_encoder_kernel(%arg0: i32, %arg1: memref<8x640xbf16, #tpu.memory_space<vmem>>, %arg2: memref<640x640xbf16, #tpu.memory_space<vmem>>, %arg3: memref<1x640xf32, #tpu.memory_space<vmem>>, %arg4: memref<640x640xbf16, #tpu.memory_space<vmem>>, %arg5: memref<1x640xf32, #tpu.memory_space<vmem>>, %arg6: memref<640x384xbf16, #tpu.memory_space<vmem>>, %arg7: memref<1x384xf32, #tpu.memory_space<vmem>>, %arg8: memref<384x384xbf16, #tpu.memory_space<vmem>>, %arg9: memref<1x384xf32, #tpu.memory_space<vmem>>, %arg10: memref<384x128xbf16, #tpu.memory_space<vmem>>, %arg11: memref<1x128xf32, #tpu.memory_space<vmem>>, %arg12: memref<8x128xf32, #tpu.memory_space<vmem>>) attributes {dimension_semantics = [#tpu.dimension_semantics<parallel>], iteration_bounds = array<i64: 2>, scalar_prefetch = 0 : i64, scratch_operands = 0 : i64, tpu.core_type = #tpu.core_type<tc>, window_params = [{transform_indices = @transform_0, window_bounds = array<i64: 8, 640>}, {pipeline_mode = #tpu.pipeline_mode<synchronous>, transform_indices = @transform_1, window_bounds = array<i64: 640, 640>}, {pipeline_mode = #tpu.pipeline_mode<synchronous>, transform_indices = @transform_2, window_bounds = array<i64: 1, 640>}, {pipeline_mode = #tpu.pipeline_mode<synchronous>, transform_indices = @transform_3, window_bounds = array<i64: 640, 640>}, {pipeline_mode = #tpu.pipeline_mode<synchronous>, transform_indices = @transform_4, window_bounds = array<i64: 1, 640>}, {pipeline_mode = #tpu.pipeline_mode<synchronous>, transform_indices = @transform_5, window_bounds = array<i64: 640, 384>}, {pipeline_mode = #tpu.pipeline_mode<synchronous>, transform_indices = @transform_6, window_bounds = array<i64: 1, 384>}, {pipeline_mode = #tpu.pipeline_mode<synchronous>, transform_indices = @transform_7, window_bounds = array<i64: 384, 384>}, {pipeline_mode = #tpu.pipeline_mode<synchronous>, transform_indices = @transform_8, window_bounds = array<i64: 1, 384>}, {pipeline_mode = #tpu.pipeline_mode<synchronous>, transform_indices = @transform_9, window_bounds = array<i64: 384, 128>}, {pipeline_mode = #tpu.pipeline_mode<synchronous>, transform_indices = @transform_10, window_bounds = array<i64: 1, 128>}, {transform_indices = @transform_11, window_bounds = array<i64: 8, 128>}]} {
    %c0 = arith.constant 0 : index
    %c0_0 = arith.constant 0 : index
    %0 = vector.load %arg1[%c0, %c0_0] : memref<8x640xbf16, #tpu.memory_space<vmem>>, vector<8x640xbf16>
    %c0_1 = arith.constant 0 : index
    %c0_2 = arith.constant 0 : index
    %1 = vector.load %arg2[%c0_1, %c0_2] : memref<640x640xbf16, #tpu.memory_space<vmem>>, vector<640x640xbf16>
    %cst = arith.constant dense<0.000000e+00> : vector<8x640xf32>
    %2 = tpu.matmul %0, %1, %cst {dimension_numbers = #tpu.dot_dimension_numbers<[1], [0], [0], [1], [0, 0, 1, 1], [], []>} : vector<8x640xbf16>, vector<640x640xbf16>, vector<8x640xf32> -> vector<8x640xf32>
    %c0_3 = arith.constant 0 : index
    %c0_4 = arith.constant 0 : index
    %3 = vector.load %arg3[%c0_3, %c0_4] : memref<1x640xf32, #tpu.memory_space<vmem>>, vector<1x640xf32>
    %4 = vector.broadcast %3 : vector<1x640xf32> to vector<8x640xf32>
    %5 = arith.addf %2, %4 : vector<8x640xf32>
    %cst_5 = arith.constant 0.000000e+00 : f32
    %6 = vector.broadcast %cst_5 : f32 to vector<8x640xf32>
    %7 = arith.maximumf %5, %6 : vector<8x640xf32>
    %8 = arith.truncf %7 : vector<8x640xf32> to vector<8x640xbf16>
    %c0_6 = arith.constant 0 : index
    %c0_7 = arith.constant 0 : index
    %9 = vector.load %arg4[%c0_6, %c0_7] : memref<640x640xbf16, #tpu.memory_space<vmem>>, vector<640x640xbf16>
    %cst_8 = arith.constant dense<0.000000e+00> : vector<8x640xf32>
    %10 = tpu.matmul %8, %9, %cst_8 {dimension_numbers = #tpu.dot_dimension_numbers<[1], [0], [0], [1], [0, 0, 1, 1], [], []>} : vector<8x640xbf16>, vector<640x640xbf16>, vector<8x640xf32> -> vector<8x640xf32>
    %c0_9 = arith.constant 0 : index
    %c0_10 = arith.constant 0 : index
    %11 = vector.load %arg5[%c0_9, %c0_10] : memref<1x640xf32, #tpu.memory_space<vmem>>, vector<1x640xf32>
    %12 = vector.broadcast %11 : vector<1x640xf32> to vector<8x640xf32>
    %13 = arith.addf %10, %12 : vector<8x640xf32>
    %cst_11 = arith.constant 0.000000e+00 : f32
    %14 = vector.broadcast %cst_11 : f32 to vector<8x640xf32>
    %15 = arith.maximumf %13, %14 : vector<8x640xf32>
    %16 = arith.truncf %15 : vector<8x640xf32> to vector<8x640xbf16>
    %c0_12 = arith.constant 0 : index
    %c0_13 = arith.constant 0 : index
    %17 = vector.load %arg6[%c0_12, %c0_13] : memref<640x384xbf16, #tpu.memory_space<vmem>>, vector<640x384xbf16>
    %cst_14 = arith.constant dense<0.000000e+00> : vector<8x384xf32>
    %18 = tpu.matmul %16, %17, %cst_14 {dimension_numbers = #tpu.dot_dimension_numbers<[1], [0], [0], [1], [0, 0, 1, 1], [], []>} : vector<8x640xbf16>, vector<640x384xbf16>, vector<8x384xf32> -> vector<8x384xf32>
    %c0_15 = arith.constant 0 : index
    %c0_16 = arith.constant 0 : index
    %19 = vector.load %arg7[%c0_15, %c0_16] : memref<1x384xf32, #tpu.memory_space<vmem>>, vector<1x384xf32>
    %20 = vector.broadcast %19 : vector<1x384xf32> to vector<8x384xf32>
    %21 = arith.addf %18, %20 : vector<8x384xf32>
    %cst_17 = arith.constant 0.000000e+00 : f32
    %22 = vector.broadcast %cst_17 : f32 to vector<8x384xf32>
    %23 = arith.maximumf %21, %22 : vector<8x384xf32>
    %24 = arith.truncf %23 : vector<8x384xf32> to vector<8x384xbf16>
    %c0_18 = arith.constant 0 : index
    %c0_19 = arith.constant 0 : index
    %25 = vector.load %arg8[%c0_18, %c0_19] : memref<384x384xbf16, #tpu.memory_space<vmem>>, vector<384x384xbf16>
    %cst_20 = arith.constant dense<0.000000e+00> : vector<8x384xf32>
    %26 = tpu.matmul %24, %25, %cst_20 {dimension_numbers = #tpu.dot_dimension_numbers<[1], [0], [0], [1], [0, 0, 1, 1], [], []>} : vector<8x384xbf16>, vector<384x384xbf16>, vector<8x384xf32> -> vector<8x384xf32>
    %c0_21 = arith.constant 0 : index
    %c0_22 = arith.constant 0 : index
    %27 = vector.load %arg9[%c0_21, %c0_22] : memref<1x384xf32, #tpu.memory_space<vmem>>, vector<1x384xf32>
    %28 = vector.broadcast %27 : vector<1x384xf32> to vector<8x384xf32>
    %29 = arith.addf %26, %28 : vector<8x384xf32>
    %30 = arith.truncf %29 : vector<8x384xf32> to vector<8x384xbf16>
    %c0_23 = arith.constant 0 : index
    %c0_24 = arith.constant 0 : index
    %31 = vector.load %arg10[%c0_23, %c0_24] : memref<384x128xbf16, #tpu.memory_space<vmem>>, vector<384x128xbf16>
    %cst_25 = arith.constant dense<0.000000e+00> : vector<8x128xf32>
    %32 = tpu.matmul %30, %31, %cst_25 {dimension_numbers = #tpu.dot_dimension_numbers<[1], [0], [0], [1], [0, 0, 1, 1], [], []>} : vector<8x384xbf16>, vector<384x128xbf16>, vector<8x128xf32> -> vector<8x128xf32>
    %c0_26 = arith.constant 0 : index
    %c0_27 = arith.constant 0 : index
    %33 = vector.load %arg11[%c0_26, %c0_27] : memref<1x128xf32, #tpu.memory_space<vmem>>, vector<1x128xf32>
    %34 = vector.broadcast %33 : vector<1x128xf32> to vector<8x128xf32>
    %35 = arith.addf %32, %34 : vector<8x128xf32>
    %c0_28 = arith.constant 0 : index
    %c0_29 = arith.constant 0 : index
    %36 = vector.load %arg12[%c0_28, %c0_29] : memref<8x128xf32, #tpu.memory_space<vmem>>, vector<8x128xf32>
    tpu.vector_store %arg12[%c0_28, %c0_29], %35 {strides = array<i32>} : memref<8x128xf32, #tpu.memory_space<vmem>>, vector<8x128xf32>,
    return
  }
  func.func @transform_0(%arg0: i32) -> (i32, i32) {
    %c0_i32 = arith.constant 0 : i32
    %c0_i32_0 = arith.constant 0 : i32
    return %arg0, %c0_i32 : i32, i32
  }
  func.func @transform_1(%arg0: i32) -> (i32, i32) {
    %c0_i32 = arith.constant 0 : i32
    %c0_i32_0 = arith.constant 0 : i32
    %c0_i32_1 = arith.constant 0 : i32
    return %c0_i32, %c0_i32_0 : i32, i32
  }
  func.func @transform_2(%arg0: i32) -> (i32, i32) {
    %c0_i32 = arith.constant 0 : i32
    %c0_i32_0 = arith.constant 0 : i32
    %c0_i32_1 = arith.constant 0 : i32
    return %c0_i32, %c0_i32_0 : i32, i32
  }
  func.func @transform_3(%arg0: i32) -> (i32, i32) {
    %c0_i32 = arith.constant 0 : i32
    %c0_i32_0 = arith.constant 0 : i32
    %c0_i32_1 = arith.constant 0 : i32
    return %c0_i32, %c0_i32_0 : i32, i32
  }
  func.func @transform_4(%arg0: i32) -> (i32, i32) {
    %c0_i32 = arith.constant 0 : i32
    %c0_i32_0 = arith.constant 0 : i32
    %c0_i32_1 = arith.constant 0 : i32
    return %c0_i32, %c0_i32_0 : i32, i32
  }
  func.func @transform_5(%arg0: i32) -> (i32, i32) {
    %c0_i32 = arith.constant 0 : i32
    %c0_i32_0 = arith.constant 0 : i32
    %c0_i32_1 = arith.constant 0 : i32
    return %c0_i32, %c0_i32_0 : i32, i32
  }
  func.func @transform_6(%arg0: i32) -> (i32, i32) {
    %c0_i32 = arith.constant 0 : i32
    %c0_i32_0 = arith.constant 0 : i32
    %c0_i32_1 = arith.constant 0 : i32
    return %c0_i32, %c0_i32_0 : i32, i32
  }
  func.func @transform_7(%arg0: i32) -> (i32, i32) {
    %c0_i32 = arith.constant 0 : i32
    %c0_i32_0 = arith.constant 0 : i32
    %c0_i32_1 = arith.constant 0 : i32
    return %c0_i32, %c0_i32_0 : i32, i32
  }
  func.func @transform_8(%arg0: i32) -> (i32, i32) {
    %c0_i32 = arith.constant 0 : i32
    %c0_i32_0 = arith.constant 0 : i32
    %c0_i32_1 = arith.constant 0 : i32
    return %c0_i32, %c0_i32_0 : i32, i32
  }
  func.func @transform_9(%arg0: i32) -> (i32, i32) {
    %c0_i32 = arith.constant 0 : i32
    %c0_i32_0 = arith.constant 0 : i32
    %c0_i32_1 = arith.constant 0 : i32
    return %c0_i32, %c0_i32_0 : i32, i32
  }
  func.func @transform_10(%arg0: i32) -> (i32, i32) {
    %c0_i32 = arith.constant 0 : i32
    %c0_i32_0 = arith.constant 0 : i32
    %c0_i32_1 = arith.constant 0 : i32
    return %c0_i32, %c0_i32_0 : i32, i32
  }
  func.func @transform_11(%arg0: i32) -> (i32, i32) {
    %c0_i32 = arith.constant 0 : i32
    %c0_i32_0 = arith.constant 0 : i32
    return %arg0, %c0_i32 : i32, i32
  }
}

</mosaic_0001>

<bundles_post_ra>
// kernel: tpu_custom_call.1
= control target key start
LH: loop header
LB: loop body
LE: loop exit
PB: predicated region body
PF: predicated region fallthrough
CT: control target
= control target key end

     0   :  { %s9835_s0 = inlined_call_operand.hbm [shape: bf16[16,640], index: 0, kind: input, shape index: {}]   ;;  %s9836_s1 = inlined_call_operand.hbm [shape: bf16[640,640], index: 1, kind: input, shape index: {}]   ;;  %s9837_s2 = inlined_call_operand.hbm [shape: f32[1,640], index: 2, kind: input, shape index: {}]   ;;  %s9838_s3 = inlined_call_operand.hbm [shape: bf16[640,640], index: 3, kind: input, shape index: {}]   ;;  %s9839_s4 = inlined_call_operand.hbm [shape: f32[1,640], index: 4, kind: input, shape index: {}]   ;;  %s9840_s5 = inlined_call_operand.hbm [shape: bf16[640,384], index: 5, kind: input, shape index: {}]   ;;  %s9841_s6 = inlined_call_operand.vmem [shape: f32[1,384], index: 6, kind: input, shape index: {}]   ;;  %s9842_s7 = inlined_call_operand.hbm [shape: bf16[384,384], index: 7, kind: input, shape index: {}]   ;;  %s9843_s8 = inlined_call_operand.vmem [shape: f32[1,384], index: 8, kind: input, shape index: {}]   ;;  %s9844_s9 = inlined_call_operand.hbm [shape: bf16[384,128], index: 9, kind: input, shape index: {}]   ;;  %s9845_s10 = inlined_call_operand.vmem [shape: f32[1,128], index: 10, kind: input, shape index: {}]   ;;  %s9846_s11 = inlined_call_operand.hbm [shape: f32[16,128], index: 11, kind: output, shape index: {}]  }
   0x1   :  { %9848 = sst [smem:[#allocation23_spill]] %s9836_s1 }
   0x2   :  { %9849 = sst [smem:[#allocation24_spill]] %s9837_s2 }
   0x3   :  { %9850 = sst [smem:[#allocation25_spill]] %s9838_s3 }
   0x4   :  { %9851 = sst [smem:[#allocation26_spill]] %s9839_s4 }
   0x5   :  { %9852 = sst [smem:[#allocation27_spill]] %s9840_s5 }
   0x6   :  { %9853 = sst [smem:[#allocation28_spill]] %s9842_s7 }
   0x7   :  { %9854 = sst [smem:[#allocation29_spill]] %s9844_s9 }
   0x8   :  { %9855 = sst [smem:[#allocation30_spill]] %s9846_s11 }
   0x9   :  { %16 = vsyncpa [#allocation3], 0 }
   0xa   :  { %18 = vsyncpa [#allocation3 + $0x1], 0 }
   0xb   :  { %19 = vsyncpa [#allocation6], 0 }
   0xc   :  { %20 = vsyncpa [#allocation9], 0 }
   0xd   :  { %21 = vsyncpa [#allocation12], 0 }
   0xe   :  { %22 = vsyncpa [#allocation15], 0 }
   0xf   :  { %23 = vsyncpa [#allocation4], 0 }
  0x10   :  { %25 = vsyncpa [#allocation4 + $0x1], 0  ;;  %s9428_s17 = smov 0   ;;  %s9430_s18 = smov 0  }
  0x11   :  { %s9432_s19 = smov 0   ;;  %s9434_s20 = smov 0  }
  0x12 LB: > { %s9856_s1 = sld [smem:[#allocation23_spill]]  ;;  %s9452_s24 = sadd.s32 4294967295, %s9353_s20   ;;  %s9353_s20 = sphi %s9434_s20, %s9874_s20   ;;  %s9349_s19 = sphi %s9432_s19, %s9873_s19   ;;  %s9345_s18 = sphi %s9430_s18, %s9872_s18   ;;  %s9341_s17 = sphi %s9428_s17, %s9871_s17  }
  0x13   : > { %p5799_p0 = scmp.ge.s32.totalorder %s9353_s20, 1  ;;  %p52_p1 = scmp.eq.s32.totalorder %s9452_s24, 0 }
  0x14   : > { %p298_p2 = scmp.lt.s32.totalorder %s9353_s20, 3  ;;  %s9355_s26 = smov [#allocation5]  }
  0x15   : > { %s311_s27 = sshll.u32 %s9355_s26, 4  ;;  %s9858_s3 = sld [smem:[#allocation25_spill]]  ;;  %s312_s27 = int_to_ptr.vmem [resolvable:$true] %s311_s27 }
  0x16   : > { %p9457_p3 = pnand %p5799_p0, %p298_p2  ;;  %s9860_s5 = sld [smem:[#allocation27_spill]] }
  0x17   : > { %s9356_s16 = smov [#allocation8]   ;;  %s9357_s22 = smov 320  }
  0x18   : > { %s309_s23 = sshll.u32 %s9856_s1, 4  ;;  %p8937_p4 = pneg %p9457_p3  ;;  %s310_s23 = int_to_ptr.hbm [resolvable:$true] %s309_s23 }
  0x19   : > { %s337_s21 = sshll.u32 %s9356_s16, 4  ;;  %s9358_s26 = smov 20   ;;  %s338_s21 = int_to_ptr.vmem [resolvable:$true] %s337_s21 }
  0x1a   : > { %p9469_p6 = pnand %p8937_p4, %p52_p1  ;;  %s9359_s28 = smov [#allocation11]  }
  0x1b   : > { %s335_s30 = sshll.u32 %s9858_s3, 4  ;;  %s363_s29 = sshll.u32 %s9359_s28, 4  ;;  %s336_s30 = int_to_ptr.hbm [resolvable:$true] %s335_s30  ;;  %s364_s29 = int_to_ptr.vmem [resolvable:$true] %s363_s29 }
  0x1c   : > { %s361_s15 = sshll.u32 %s9860_s5, 4  ;;  %s9861_s2 = sld [smem:[#allocation24_spill]]  ;;  %s362_s15 = int_to_ptr.hbm [resolvable:$true] %s361_s15 }
  0x1d   : > { %8940 = dma.hbm_to_vmem [thread:$0]  (!%p9469_p6), %s310_s23, 25600, %s312_s27, [#allocation6], %s9357_s22, %s9357_s22, %s9358_s26  }
  0x1e   : > { %8946 = dma.hbm_to_vmem [thread:$0]  (!%p9469_p6), %s336_s30, 25600, %s338_s21, [#allocation9], %s9357_s22, %s9357_s22, %s9358_s26  }
  0x1f   : > { %s9360_s14 = smov 192   ;;  %s9361_s5 = smov 12  }
  0x20   : > { %8952 = dma.hbm_to_vmem [thread:$0]  (!%p9469_p6), %s362_s15, 15360, %s364_s29, [#allocation12], %s9360_s14, %s9360_s14, %s9361_s5  }
  0x21   : > { %s9362_s16 = smov [#allocation7]   ;;  %s9862_s4 = sld [smem:[#allocation26_spill]] }
  0x22   : > { %s324_s13 = sshll.u32 %s9861_s2, 4  ;;  %s326_s23 = sshll.u32 %s9362_s16, 4  ;;  %s325_s13 = int_to_ptr.hbm [resolvable:$true] %s324_s13  ;;  %s327_s23 = int_to_ptr.vmem [resolvable:$true] %s326_s23 }
  0x23   : > { %8943 = dma.hbm_to_vmem [thread:$0]  (!%p9469_p6), %s325_s13, 80, %s327_s23, [#allocation6]  }
  0x24   : > { %s9863_s7 = sld [smem:[#allocation28_spill]]  ;;  %s9363_s22 = smov [#allocation10]  }
  0x25   : > { %s352_s26 = sshll.u32 %s9363_s22, 4  ;;  %s9364_s11 = smov [#allocation13]   ;;  %s353_s26 = int_to_ptr.vmem [resolvable:$true] %s352_s26 }
  0x26   : > { %s380_s15 = sshll.u32 %s9364_s11, 4  ;;  %s9864_s9 = sld [smem:[#allocation29_spill]]  ;;  %s381_s15 = int_to_ptr.vmem [resolvable:$true] %s380_s15 }
  0x27   : > { %s350_s30 = sshll.u32 %s9862_s4, 4  ;;  %s9365_s16 = smov [#allocation14]   ;;  %s351_s30 = int_to_ptr.hbm [resolvable:$true] %s350_s30 }
  0x28   : > { %8949 = dma.hbm_to_vmem [thread:$0]  (!%p9469_p6), %s351_s30, 80, %s353_s26, [#allocation9]  }
  0x29   : > { %s397_s23 = sshll.u32 %s9365_s16, 4  ;;  %s9366_s27 = smov 64   ;;  %s398_s23 = int_to_ptr.vmem [resolvable:$true] %s397_s23 }
  0x2a   : > { %s378_s3 = sshll.u32 %s9863_s7, 4  ;;  %s9367_s30 = smov 4   ;;  %s379_s3 = int_to_ptr.hbm [resolvable:$true] %s378_s3 }
  0x2b   : > { %8955 = dma.hbm_to_vmem [thread:$0]  (!%p9469_p6), %s379_s3, 9216, %s381_s15, [#allocation12], %s9360_s14, %s9360_s14, %s9361_s5  }
  0x2c   : > { %s395_s13 = sshll.u32 %s9864_s9, 4  ;;  %s5798_s21 = sadd.s32 4294967294, %s9353_s20   ;;  %s396_s13 = int_to_ptr.hbm [resolvable:$true] %s395_s13 }
  0x2d   : > { %8958 = dma.hbm_to_vmem [thread:$0]  (!%p9469_p6), %s396_s13, 3072, %s398_s23, [#allocation15], %s9366_s27, %s9366_s27, %s9367_s30  }
  0x2e   : > { %s9504_s1 = sadd.s32 1, %s9353_s20   ;;  %s38_s22 = sadd.s32 1, %s9349_s19 }
  0x2f   : > { %s35_s26 = ssub.s32 %s9353_s20, %s9504_s1  ;;  %p45_p7 = scmp.ne.s32.totalorder %s9349_s19, %s9345_s18 }
  0x30   : > { %p36_p8 = scmp.eq.s32.totalorder %s35_s26, 0  ;;  %p46_p9 = scmp.eq.s32.totalorder %s9353_s20, 0 }
  0x31   : > { %p51_p10 = scmp.ne.s32.totalorder %s9345_s18, %s9341_s17  ;;  %p285_p11 = scmp.eq.s32.totalorder %s9452_s24, 1 }
  0x32   : > { %s9516_s5 = scalar_select %p36_p8, %s9349_s19, %s38_s22  }
  0x33   : > { %p47_p12 = por %p46_p9, %p45_p7  ;;  %p9520_p13 = por %p52_p1, %p51_p10 }
  0x34   : > { %p9524_p0 = por %p285_p11, %p45_p7  ;;  %p291_p2 = scmp.eq.s32.totalorder %s5798_s21, 1 }
  0x35   : > { %p8974_p4 = scmp.lt.s32.totalorder %s9353_s20, 2  ;;  %s414_s3 = sand.u32 1, %s9349_s19  }
  0x36   : > { %p9530_p6 = por %p291_p2, %p51_p10  ;;  %s8902_s15 = smul.u32 20, %s414_s3 }
  0x37   : > { %p9534_p8 = pnand %p8974_p4, %p47_p12  ;;  %s8903_s29 = smul.u32 20, %s9353_s20 }
  0x38   : > { %s418_s27 = scalar_lea.vmem [#allocation2], %s8902_s15  ;;  %s415_s22 = scalar_lea.sflag [#allocation3], %s414_s3 }
  0x39   : > { %s423_s23 = scalar_lea.hbm %s9835_s0, %s8903_s29  ;;  %s427_s30 = sshll.u32 %s418_s27, 4  ;;  %s428_s30 = int_to_ptr.vmem [resolvable:$true] %s427_s30 }
  0x3a   : > { %s425_s21 = sshll.u32 %s423_s23, 4  ;;  %p9245_p9 = pneg %p9534_p8  ;;  %s426_s21 = int_to_ptr.hbm [resolvable:$true] %s425_s21 }
  0x3b   : > { %s9241_s26 = sshra.s32 %s426_s21, 4  ;;  %s9248_s9 = scalar_lea.hbm %s9835_s0, 40  ;;  %s9242_s26 = int_to_ptr.hbm [resolvable:$true] %s9241_s26 }
  0x3c   : > { %s9243_s2 = scalar_lea.hbm %s9242_s26, 20  ;;  %p9249_p12 = scmp.lt.s32.totalorder %s9242_s26, %s9835_s0 }
  0x3d   : > { %p9244_p7 = scmp.ne.s32.totalorder %s9242_s26, %s9243_s2  ;;  %p9250_p2 = scmp.lt.s32.totalorder %s9248_s9, %s9243_s2 }
  0x3f   : > { %p9246_p10 = pnand %p9245_p9, %p9244_p7  ;;  %p9251_p4 = por %p9250_p2, %p9249_p12 }
  0x41   : > { %p9247_p11 = pneg %p9246_p10 }
  0x43   : > { %p9252_p5 = pnand %p9251_p4, %p9247_p11 }
  0x45   : > { %9255 = shalt.err (!%p9252_p5)
}
  0x46   : > { %8962 = dma.hbm_to_vmem [thread:$0]  (!%p9534_p8), %s426_s21, 320, %s428_s30, %s415_s22  }
  0x47   : > { %436 = sbr.rel (%p9457_p3) target bundleno = 1167 (0x48f), region = 64  ;;  %s9555_s3 = sand.u32 (!%p9457_p3), 1, %s9345_s18  }
  0x48   : > { %s8904_s4 = smul.u32 (!%p9457_p3), 20, %s9555_s3  ;;  %s439_s7 = scalar_lea.sflag (!%p9457_p3), [#allocation3], %s9555_s3 }
  0x4a   : > { %s9559_s15 = scalar_lea.vmem (!%p9457_p3), [#allocation2], %s8904_s4 }
  0x4c   : > { %9316 = dma.done.wait (%p9520_p13), %s439_s7, 320  }
  0x4d   : > { %9318 = vsyncadd (%p9520_p13), %s439_s7, 4294966976 }
  0x4e   : > { %9320 = dma.done.wait (%p52_p1), [#allocation6], 25680  }
  0x4f   : > { %9322 = vsyncadd (%p52_p1), [#allocation6], 4294941616 }
  0x50   : > { %9324 = dma.done.wait (%p52_p1), [#allocation9], 25680  }
  0x51   : > { %9326 = vsyncadd (%p52_p1), [#allocation9], 4294941616 }
  0x52   : > { %9328 = dma.done.wait (%p52_p1), [#allocation12], 24576  }
  0x53   : > { %9330 = vsyncadd (%p52_p1), [#allocation12], 4294942720 }
  0x54   : > { %9332 = dma.done.wait (%p52_p1), [#allocation15], 3072  }
  0x55   : > { %9334 = vsyncadd (%p52_p1), [#allocation15], 4294964224  ;;  %v5960_v0 = vld [vmem:[#allocation5 + $0x118] sm:$0xf]  ;;  %v8323_v1 = vld [vmem:[#allocation5 + $0x128] sm:$0xf0] }
  0x56   : > { %v6120_v2 = vld [vmem:[#allocation5 + $0x258] sm:$0xf]  ;;  %v5961_v3 = vor.u32 %v8323_v1, %v5960_v0  ;;  %v8363_v4 = vld [vmem:[#allocation5 + $0x268] sm:$0xf0]  ;;  %v5940_v11 = vld [vmem:[#allocation5 + $0xf0] sm:$0xf] }
  0x57   : > { %v6280_v5 = vld [vmem:[#allocation5 + $0x398] sm:$0xf]  ;;  %v8403_v6 = vld [vmem:[#allocation5 + $0x3a8] sm:$0xf0]  ;;  %v6121_v7 = vor.u32 %v8363_v4, %v6120_v2  ;;  %v8318_v13 = vld [vmem:[#allocation5 + $0x100] sm:$0xf0] }
  0x58   : > { %v6281_v8 = vor.u32 %v8403_v6, %v6280_v5  ;;  %v6440_v9 = vld [vmem:[#allocation5 + $0x4d8] sm:$0xf]  ;;  %v8443_v10 = vld [vmem:[#allocation5 + $0x4e8] sm:$0xf0]  ;;  %1830 = vmatpush.bf16.msra.mxu0 %v5961_v3  ;;  %v6100_v14 = vld [vmem:[#allocation5 + $0x230] sm:$0xf]  ;;  %v5941_v16 = vor.u32 %v8318_v13, %v5940_v11 }
  0x59   : > { %v6441_v12 = vor.u32 %v8443_v10, %v6440_v9  ;;  %v8358_v15 = vld [vmem:[#allocation5 + $0x240] sm:$0xf0]  ;;  %1843 = vmatpush.bf16.msra.mxu1 %v6121_v7  ;;  %v6260_v18 = vld [vmem:[#allocation5 + $0x370] sm:$0xf]  ;;  %v5920_v23 = vld [vmem:[#allocation5 + $0xc8] sm:$0xf] }
  0x5a   : > { %1856 = vmatpush.bf16.msra.mxu2 %v6281_v8  ;;  %v6101_v17 = vor.u32 %v8358_v15, %v6100_v14  ;;  %v8398_v19 = vld [vmem:[#allocation5 + $0x380] sm:$0xf0]  ;;  %v6420_v20 = vld [vmem:[#allocation5 + $0x4b0] sm:$0xf]  ;;  %v8313_v24 = vld [vmem:[#allocation5 + $0xd8] sm:$0xf0] }
  0x5b   : > { %1869 = vmatpush.bf16.msra.mxu3 %v6441_v12  ;;  %v6261_v21 = vor.u32 %v8398_v19, %v6260_v18  ;;  %v8438_v22 = vld [vmem:[#allocation5 + $0x4c0] sm:$0xf0]  ;;  %v6080_v26 = vld [vmem:[#allocation5 + $0x208] sm:$0xf]  ;;  %v8353_v27 = vld [vmem:[#allocation5 + $0x218] sm:$0xf0]  ;;  %v5921_v29 = vor.u32 %v8313_v24, %v5920_v23 }
  0x5c   : > { %v6421_v25 = vor.u32 %v8438_v22, %v6420_v20  ;;  %v6240_v28 = vld [vmem:[#allocation5 + $0x348] sm:$0xf]  ;;  %1831 = vmatpush.bf16.msra.mxu0 %v5941_v16  ;;  %v8393_v30 = vld [vmem:[#allocation5 + $0x358] sm:$0xf0]  ;;  %v6081_v33 = vor.u32 %v8353_v27, %v6080_v26  ;;  %v5900_v35 = vld [vmem:[#allocation5 + $0xa0] sm:$0xf] }
  0x5d   : > { %v6400_v31 = vld [vmem:[#allocation5 + $0x488] sm:$0xf]  ;;  %v8433_v32 = vld [vmem:[#allocation5 + $0x498] sm:$0xf0]  ;;  %1844 = vmatpush.bf16.msra.mxu1 %v6101_v17  ;;  %v6241_v34 = vor.u32 %v8393_v30, %v6240_v28  ;;  %v8308_v36 = vld [vmem:[#allocation5 + $0xb0] sm:$0xf0] }
  0x5e   : > { %1857 = vmatpush.bf16.msra.mxu2 %v6261_v21  ;;  %v6060_v37 = vld [vmem:[#allocation5 + $0x1e0] sm:$0xf]  ;;  %v6401_v38 = vor.u32 %v8433_v32, %v6400_v31  ;;  %v8348_v39 = vld [vmem:[#allocation5 + $0x1f0] sm:$0xf0]  ;;  %v5901_v44 = vor.u32 %v8308_v36, %v5900_v35  ;;  %v5880_v47 = vld [vmem:[#allocation5 + $0x78] sm:$0xf] }
  0x5f   : > { %1870 = vmatpush.bf16.msra.mxu3 %v6421_v25  ;;  %v6220_v40 = vld [vmem:[#allocation5 + $0x320] sm:$0xf]  ;;  %v8388_v41 = vld [vmem:[#allocation5 + $0x330] sm:$0xf0]  ;;  %v6061_v45 = vor.u32 %v8348_v39, %v6060_v37  ;;  %v8303_v48 = vld [vmem:[#allocation5 + $0x88] sm:$0xf0] }
  0x60   : > { %v6380_v42 = vld [vmem:[#allocation5 + $0x460] sm:$0xf]  ;;  %v8428_v43 = vld [vmem:[#allocation5 + $0x470] sm:$0xf0]  ;;  %1832 = vmatpush.bf16.msra.mxu0 %v5921_v29  ;;  %v6221_v46 = vor.u32 %v8388_v41, %v6220_v40  ;;  %v6040_v49 = vld [vmem:[#allocation5 + $0x1b8] sm:$0xf]  ;;  %v5881_v56 = vor.u32 %v8303_v48, %v5880_v47 }
  0x61   : > { %1845 = vmatpush.bf16.msra.mxu1 %v6081_v33  ;;  %v6381_v50 = vor.u32 %v8428_v43, %v6380_v42  ;;  %v8343_v51 = vld [vmem:[#allocation5 + $0x1c8] sm:$0xf0]  ;;  %v6200_v52 = vld [vmem:[#allocation5 + $0x2f8] sm:$0xf]  ;;  %v5860_v59 = vld [vmem:[#allocation5 + $0x50] sm:$0xf] }
  0x62   : > { %1858 = vmatpush.bf16.msra.mxu2 %v6241_v34  ;;  %v8383_v53 = vld [vmem:[#allocation5 + $0x308] sm:$0xf0]  ;;  %v6360_v54 = vld [vmem:[#allocation5 + $0x438] sm:$0xf]  ;;  %v6041_v57 = vor.u32 %v8343_v51, %v6040_v49  ;;  %v8298_v60 = vld [vmem:[#allocation5 + $0x60] sm:$0xf0] }
  0x63   : > { %1871 = vmatpush.bf16.msra.mxu3 %v6401_v38  ;;  %v8423_v55 = vld [vmem:[#allocation5 + $0x448] sm:$0xf0]  ;;  %v6201_v58 = vor.u32 %v8383_v53, %v6200_v52  ;;  %v6020_v61 = vld [vmem:[#allocation5 + $0x190] sm:$0xf]  ;;  %v8338_v63 = vld [vmem:[#allocation5 + $0x1a0] sm:$0xf0]  ;;  %v5861_v4 = vor.u32 %v8298_v60, %v5860_v59 }
  0x64   : > { %1833 = vmatpush.bf16.msra.mxu0 %v5901_v44  ;;  %v6361_v62 = vor.u32 %v8423_v55, %v6360_v54  ;;  %v6180_v0 = vld [vmem:[#allocation5 + $0x2d0] sm:$0xf]  ;;  %v8378_v1 = vld [vmem:[#allocation5 + $0x2e0] sm:$0xf0]  ;;  %v6021_v5 = vor.u32 %v8338_v63, %v6020_v61  ;;  %v5840_v7 = vld [vmem:[#allocation5 + $0x28] sm:$0xf] }
  0x65   : > { %1846 = vmatpush.bf16.msra.mxu1 %v6061_v45  ;;  %v6340_v2 = vld [vmem:[#allocation5 + $0x410] sm:$0xf]  ;;  %v8418_v3 = vld [vmem:[#allocation5 + $0x420] sm:$0xf0]  ;;  %v6181_v6 = vor.u32 %v8378_v1, %v6180_v0  ;;  %v8293_v8 = vld [vmem:[#allocation5 + $0x38] sm:$0xf0] }
  0x66   : > { %1859 = vmatpush.bf16.msra.mxu2 %v6221_v46  ;;  %v6000_v9 = vld [vmem:[#allocation5 + $0x168] sm:$0xf]  ;;  %v6341_v10 = vor.u32 %v8418_v3, %v6340_v2  ;;  %v8333_v11 = vld [vmem:[#allocation5 + $0x178] sm:$0xf0]  ;;  %v5841_v16 = vor.u32 %v8293_v8, %v5840_v7  ;;  %v5820_v17 = vld [vmem:[#allocation5] sm:$0xf] }
  0x67   : > { %1872 = vmatpush.bf16.msra.mxu3 %v6381_v50  ;;  %v6160_v12 = vld [vmem:[#allocation5 + $0x2a8] sm:$0xf]  ;;  %v8373_v13 = vld [vmem:[#allocation5 + $0x2b8] sm:$0xf0]  ;;  %v8288_v18 = vld [vmem:[#allocation5 + $0x10] sm:$0xf0]  ;;  %v6001_v19 = vor.u32 %v8333_v11, %v6000_v9 }
  0x68   : > { %1834 = vmatpush.bf16.msra.mxu0 %v5881_v56  ;;  %v6320_v14 = vld [vmem:[#allocation5 + $0x3e8] sm:$0xf]  ;;  %v8413_v15 = vld [vmem:[#allocation5 + $0x3f8] sm:$0xf0]  ;;  %v6161_v20 = vor.u32 %v8373_v13, %v6160_v12  ;;  %v5980_v21 = vld [vmem:[#allocation5 + $0x140] sm:$0xf]  ;;  %v5821_v31 = vor.u32 %v8288_v18, %v5820_v17 }
  0x69   : > { %1847 = vmatpush.bf16.msra.mxu1 %v6041_v57  ;;  %v8328_v22 = vld [vmem:[#allocation5 + $0x150] sm:$0xf0]  ;;  %v6140_v23 = vld [vmem:[#allocation5 + $0x280] sm:$0xf]  ;;  %v6321_v24 = vor.u32 %v8413_v15, %v6320_v14  ;;  %v6600_v26 = vld [vmem:[#allocation5 + $0x618] sm:$0xf] }
  0x6a   : > { %1860 = vmatpush.bf16.msra.mxu2 %v6201_v58  ;;  %v8368_v25 = vld [vmem:[#allocation5 + $0x290] sm:$0xf0]  ;;  %v8483_v27 = vld [vmem:[#allocation5 + $0x628] sm:$0xf0]  ;;  %v8321_v28 = vld [vmem:[#allocation5 + $0x11c] sm:$0xf]  ;;  %v5981_v35 = vor.u32 %v8328_v22, %v5980_v21 }
  0x6b   : > { %1873 = vmatpush.bf16.msra.mxu3 %v6361_v62  ;;  %v5962_v29 = vld [vmem:[#allocation5 + $0x12c] sm:$0xf0]  ;;  %v8361_v30 = vld [vmem:[#allocation5 + $0x25c] sm:$0xf]  ;;  %v6300_v33 = vld [vmem:[#allocation5 + $0x3c0] sm:$0xf]  ;;  %v6141_v36 = vor.u32 %v8368_v25, %v6140_v23  ;;  %v6601_v39 = vor.u32 %v8483_v27, %v6600_v26 }
  0x6c   : > { %1835 = vmatpush.bf16.msra.mxu0 %v5861_v4  ;;  %v6122_v32 = vld [vmem:[#allocation5 + $0x26c] sm:$0xf0]  ;;  %v8408_v34 = vld [vmem:[#allocation5 + $0x3d0] sm:$0xf0]  ;;  %v8401_v37 = vld [vmem:[#allocation5 + $0x39c] sm:$0xf]  ;;  %v5965_v40 = vor.u32 %v8321_v28, %v5962_v29 }
  0x6d   : > { %1848 = vmatpush.bf16.msra.mxu1 %v6021_v5  ;;  %v6282_v38 = vld [vmem:[#allocation5 + $0x3ac] sm:$0xf0]  ;;  %v6125_v42 = vor.u32 %v8361_v30, %v6122_v32  ;;  %v6301_v43 = vor.u32 %v8408_v34, %v6300_v33  ;;  %v8478_v44 = vld [vmem:[#allocation5 + $0x600] sm:$0xf0]  ;;  %v8316_v45 = vld [vmem:[#allocation5 + $0xf4] sm:$0xf] }
  0x6e   : > { %1861 = vmatpush.bf16.msra.mxu2 %v6181_v6  ;;  %v6580_v41 = vld [vmem:[#allocation5 + $0x5f0] sm:$0xf]  ;;  %v5942_v46 = vld [vmem:[#allocation5 + $0x104] sm:$0xf0]  ;;  %v6285_v47 = vor.u32 %v8401_v37, %v6282_v38  ;;  %v8356_v48 = vld [vmem:[#allocation5 + $0x234] sm:$0xf] }
  0x6f   : > { %1874 = vmatpush.bf16.msra.mxu3 %v6341_v10  ;;  %v6102_v49 = vld [vmem:[#allocation5 + $0x244] sm:$0xf0]  ;;  %v8396_v50 = vld [vmem:[#allocation5 + $0x374] sm:$0xf]  ;;  %v6581_v52 = vor.u32 %v8478_v44, %v6580_v41  ;;  %v5945_v53 = vor.u32 %v8316_v45, %v5942_v46  ;;  %v8473_v56 = vld [vmem:[#allocation5 + $0x5d8] sm:$0xf0] }
  0x70   : > { %1836 = vmatpush.bf16.msra.mxu0 %v5841_v16  ;;  %v6262_v51 = vld [vmem:[#allocation5 + $0x384] sm:$0xf0]  ;;  %v6105_v55 = vor.u32 %v8356_v48, %v6102_v49  ;;  %v8311_v57 = vld [vmem:[#allocation5 + $0xcc] sm:$0xf]  ;;  %v5922_v58 = vld [vmem:[#allocation5 + $0xdc] sm:$0xf0] }
  0x71   : > { %1849 = vmatpush.bf16.msra.mxu1 %v6001_v19  ;;  %v6560_v54 = vld [vmem:[#allocation5 + $0x5c8] sm:$0xf]  ;;  %v6265_v59 = vor.u32 %v8396_v50, %v6262_v51  ;;  %v8351_v60 = vld [vmem:[#allocation5 + $0x20c] sm:$0xf]  ;;  %v6082_v61 = vld [vmem:[#allocation5 + $0x21c] sm:$0xf0]  ;;  %v5925_v2 = vor.u32 %v8311_v57, %v5922_v58 }
  0x72   : > { %1862 = vmatpush.bf16.msra.mxu2 %v6161_v20  ;;  %v8391_v62 = vld [vmem:[#allocation5 + $0x34c] sm:$0xf]  ;;  %v6242_v63 = vld [vmem:[#allocation5 + $0x35c] sm:$0xf0]  ;;  %v6561_v1 = vor.u32 %v8473_v56, %v6560_v54  ;;  %v6085_v6 = vor.u32 %v8351_v60, %v6082_v61  ;;  %v8468_v7 = vld [vmem:[#allocation5 + $0x5b0] sm:$0xf0] }
  0x73   : > { %1875 = vmatpush.bf16.msra.mxu3 %v6321_v24  ;;  %v517_v0 = vld [vmem:[%s9559_s15] sm:$0xff]  ;;  %v6540_v3 = vld [vmem:[#allocation5 + $0x5a0] sm:$0xf]  ;;  %v8306_v8 = vld [vmem:[#allocation5 + $0xa4] sm:$0xf]  ;;  %v6245_v10 = vor.u32 %v8391_v62, %v6242_v63  ;;  %s8283_s23 = sshll.u32 %s9452_s24, 3 }
  0x74   : > { %1837 = vmatpush.bf16.msra.mxu0 %v5821_v31  ;;  %v775_v4 = vunpack.c.l.b16 %v517_v0  ;;  %v776_v5 = vunpack.c.h.b16 %v517_v0  ;;  %v5902_v9 = vld [vmem:[#allocation5 + $0xb4] sm:$0xf0]  ;;  %v8346_v11 = vld [vmem:[#allocation5 + $0x1e4] sm:$0xf]  ;;  %v6541_v18 = vor.u32 %v8468_v7, %v6540_v3  ;;  %v8463_v24 = vld [vmem:[#allocation5 + $0x588] sm:$0xf0] }
  0x75   : > { %1850 = vmatpush.bf16.msra.mxu1 %v5981_v35  ;;  %v6062_v12 = vld [vmem:[#allocation5 + $0x1f4] sm:$0xf0]  ;;  %v8386_v15 = vld [vmem:[#allocation5 + $0x324] sm:$0xf]  ;;  %v5905_v19 = vor.u32 %v8306_v8, %v5902_v9  ;;  %v8301_v25 = vld [vmem:[#allocation5 + $0x7c] sm:$0xf] }
  0x76   : > { %1863 = vmatpush.bf16.msra.mxu2 %v6141_v36  ;;  %v9582_v13 = vpack.c.b16 %v775_v4, %v775_v4  ;;  %v9584_v14 = vpack.c.b16 %v776_v5, %v776_v5  ;;  %v6222_v16 = vld [vmem:[#allocation5 + $0x334] sm:$0xf0]  ;;  %v6065_v23 = vor.u32 %v8346_v11, %v6062_v12  ;;  %v5882_v26 = vld [vmem:[#allocation5 + $0x8c] sm:$0xf0]  ;;  %v8341_v28 = vld [vmem:[#allocation5 + $0x1bc] sm:$0xf] }
  0x77   : > { %1876 = vmatpush.bf16.msra.mxu3 %v6301_v43  ;;  %v518_v17 = vld [vmem:[%s9559_s15 + $0x8] sm:$0xff]  ;;  %v6225_v27 = vor.u32 %v8386_v15, %v6222_v16  ;;  %v6042_v29 = vld [vmem:[#allocation5 + $0x1cc] sm:$0xf0]  ;;  %v8381_v32 = vld [vmem:[#allocation5 + $0x2fc] sm:$0xf]  ;;  %v5885_v35 = vor.u32 %v8301_v25, %v5882_v26  ;;  %s5817_s27 = sshll.u32 %s9555_s3, 3 }
  0x78   : > { %1882 = vmatpush.bf16.msrb.mxu0 %v6601_v39  ;;  %v6520_v20 = vld [vmem:[#allocation5 + $0x578] sm:$0xf]  ;;  %v777_v21 = vunpack.c.l.b16 %v518_v17  ;;  %v778_v22 = vunpack.c.h.b16 %v518_v17  ;;  %1851 = vmatmul.bf16.vlgmr.msra.gmra.mxu1 %v9584_v14  ;;  %v6202_v33 = vld [vmem:[#allocation5 + $0x30c] sm:$0xf0]  ;;  %v6045_v37 = vor.u32 %v8341_v28, %v6042_v29  ;;  %v8458_v38 = vld [vmem:[#allocation5 + $0x560] sm:$0xf0] }
  0x79   : > { %1895 = vmatpush.bf16.msrb.mxu1 %v5965_v40  ;;  %1838 = vmatmul.bf16.vlgmr.msra.gmra.mxu0 %v9582_v13  ;;  %v6521_v34 = vor.u32 %v8463_v24, %v6520_v20  ;;  %v6500_v36 = vld [vmem:[#allocation5 + $0x550] sm:$0xf]  ;;  %v8296_v39 = vld [vmem:[#allocation5 + $0x54] sm:$0xf]  ;;  %v5862_v40 = vld [vmem:[#allocation5 + $0x64] sm:$0xf0]  ;;  %v6205_v41 = vor.u32 %v8381_v32, %v6202_v33 }
  0x7a   : > { %1908 = vmatpush.bf16.msrb.mxu2 %v6125_v42  ;;  %v9588_v30 = vpack.c.b16 %v777_v21, %v777_v21  ;;  %v9591_v31 = vpack.c.b16 %v778_v22, %v778_v22  ;;  %v8336_v42 = vld [vmem:[#allocation5 + $0x194] sm:$0xf]  ;;  %v6022_v43 = vld [vmem:[#allocation5 + $0x1a4] sm:$0xf0]  ;;  %v6501_v46 = vor.u32 %v8458_v38, %v6500_v36  ;;  %v8453_v50 = vld [vmem:[#allocation5 + $0x538] sm:$0xf0] }
  0x7b   : > { %1921 = vmatpush.bf16.msrb.mxu3 %v6285_v47  ;;  %v8376_v44 = vld [vmem:[#allocation5 + $0x2d4] sm:$0xf]  ;;  %v6182_v45 = vld [vmem:[#allocation5 + $0x2e4] sm:$0xf0]  ;;  %v5865_v47 = vor.u32 %v8296_v39, %v5862_v40  ;;  %v6025_v49 = vor.u32 %v8336_v42, %v6022_v43  ;;  %v8291_v51 = vld [vmem:[#allocation5 + $0x2c] sm:$0xf] }
  0x7c   : > { %1883 = vmatpush.bf16.msrb.mxu0 %v6581_v52  ;;  %1877 = vmatmul.bf16.vlgmr.msra.gmra.mxu3 %v9591_v31  ;;  %v6480_v48 = vld [vmem:[#allocation5 + $0x528] sm:$0xf]  ;;  %v5842_v52 = vld [vmem:[#allocation5 + $0x3c] sm:$0xf0]  ;;  %v8331_v54 = vld [vmem:[#allocation5 + $0x16c] sm:$0xf] }
  0x7d   : > { %1896 = vmatpush.bf16.msrb.mxu1 %v5945_v53  ;;  %1864 = vmatmul.bf16.vlgmr.msra.gmra.mxu2 %v9588_v30  ;;  %v6185_v53 = vor.u32 %v8376_v44, %v6182_v45  ;;  %v8371_v56 = vld [vmem:[#allocation5 + $0x2ac] sm:$0xf]  ;;  %v6162_v57 = vld [vmem:[#allocation5 + $0x2bc] sm:$0xf0]  ;;  %v5845_v60 = vor.u32 %v8291_v51, %v5842_v52  ;;  %v8448_v61 = vld [vmem:[#allocation5 + $0x510] sm:$0xf0] }
  0x7e   : > { %1909 = vmatpush.bf16.msrb.mxu2 %v6105_v55  ;;  %v6002_v55 = vld [vmem:[#allocation5 + $0x17c] sm:$0xf0]  ;;  %v8286_v62 = vld [vmem:[#allocation5 + $0x4] sm:$0xf]  ;;  %v519_v63 = vld [vmem:[%s9559_s15 + $0x10] sm:$0xf]  ;;  %v6165_v4 = vor.u32 %v8371_v56, %v6162_v57 }
  0x7f   : > { %1922 = vmatpush.bf16.msrb.mxu3 %v6265_v59  ;;  %v6460_v58 = vld [vmem:[#allocation5 + $0x500] sm:$0xf]  ;;  %v6481_v59 = vor.u32 %v8453_v50, %v6480_v48  ;;  %v6005_v0 = vor.u32 %v8331_v54, %v6002_v55  ;;  %v5982_v3 = vld [vmem:[#allocation5 + $0x154] sm:$0xf0]  ;;  %v8441_v5 = vld [vmem:[#allocation5 + $0x4dc] sm:$0xf]  ;;  %v779_v11 = vunpack.c.l.b16 %v519_v63 }
  0x80   : > { %1884 = vmatpush.bf16.msrb.mxu0 %v6561_v1  ;;  %v5822_v1 = vld [vmem:[#allocation5 + $0x14] sm:$0xf0]  ;;  %v8481_v7 = vld [vmem:[#allocation5 + $0x61c] sm:$0xf]  ;;  %v6602_v8 = vld [vmem:[#allocation5 + $0x62c] sm:$0xf0]  ;;  %v6461_v12 = vor.u32 %v8448_v61, %v6460_v58 }
  0x81   : > { %1897 = vmatpush.bf16.msrb.mxu1 %v5925_v2  ;;  %v8326_v2 = vld [vmem:[#allocation5 + $0x144] sm:$0xf]  ;;  %v5968_v9 = vld [vmem:[#allocation5 + $0x120] sm:$0xf]  ;;  %v5825_v15 = vor.u32 %v8286_v62, %v5822_v1  ;;  %v6142_v17 = vld [vmem:[#allocation5 + $0x294] sm:$0xf0]  ;;  %v6605_v22 = vor.u32 %v8481_v7, %v6602_v8  ;;  %v9596_v33 = vpack.c.b16 %v779_v11, %v779_v11 }
  0x82   : > { %1910 = vmatpush.bf16.msrb.mxu2 %v6085_v6  ;;  %v6442_v6 = vld [vmem:[#allocation5 + $0x4ec] sm:$0xf0]  ;;  %v8366_v16 = vld [vmem:[#allocation5 + $0x284] sm:$0xf]  ;;  %v6128_v20 = vld [vmem:[#allocation5 + $0x260] sm:$0xf] }
  0x83   : > { %1923 = vmatpush.bf16.msrb.mxu3 %v6245_v10  ;;  %v8324_v10 = vld [vmem:[#allocation5 + $0x130] sm:$0xf0]  ;;  %v6422_v25 = vld [vmem:[#allocation5 + $0x4c4] sm:$0xf0]  ;;  %v5948_v29 = vld [vmem:[#allocation5 + $0xf8] sm:$0xf] }
  0x84   : > { %1885 = vmatpush.bf16.msrb.mxu0 %v6541_v18  ;;  %v5985_v18 = vor.u32 %v8326_v2, %v5982_v3  ;;  %v8364_v21 = vld [vmem:[#allocation5 + $0x270] sm:$0xf0]  ;;  %v6582_v28 = vld [vmem:[#allocation5 + $0x604] sm:$0xf0]  ;;  %v8319_v32 = vld [vmem:[#allocation5 + $0x108] sm:$0xf0] }
  0x85   : > { %1898 = vmatpush.bf16.msrb.mxu1 %v5905_v19  ;;  %v6445_v19 = vor.u32 %v8441_v5, %v6442_v6  ;;  %v8436_v24 = vld [vmem:[#allocation5 + $0x4b4] sm:$0xf]  ;;  %v6108_v36 = vld [vmem:[#allocation5 + $0x238] sm:$0xf]  ;;  %v5949_v39 = vor.u32 %v8319_v32, %v5948_v29  ;;  %v8431_v40 = vld [vmem:[#allocation5 + $0x48c] sm:$0xf] }
  0x86   : > { %1911 = vmatpush.bf16.msrb.mxu2 %v6065_v23  ;;  %v5969_v23 = vor.u32 %v8324_v10, %v5968_v9  ;;  %v8476_v26 = vld [vmem:[#allocation5 + $0x5f4] sm:$0xf]  ;;  %v8471_v42 = vld [vmem:[#allocation5 + $0x5cc] sm:$0xf]  ;;  %v6562_v43 = vld [vmem:[#allocation5 + $0x5dc] sm:$0xf0] }
  0x87   : > { %1924 = vmatpush.bf16.msrb.mxu3 %v6225_v27  ;;  %v6145_v27 = vor.u32 %v8366_v16, %v6142_v17  ;;  %v6585_v38 = vor.u32 %v8476_v26, %v6582_v28  ;;  %v5928_v44 = vld [vmem:[#allocation5 + $0xd0] sm:$0xf]  ;;  %v8314_v45 = vld [vmem:[#allocation5 + $0xe0] sm:$0xf0]  ;;  %v6565_v50 = vor.u32 %v8471_v42, %v6562_v43  ;;  %v6542_v55 = vld [vmem:[#allocation5 + $0x5b4] sm:$0xf0] }
  0x88   : > { %1886 = vmatpush.bf16.msrb.mxu0 %v6521_v34  ;;  %v6129_v34 = vor.u32 %v8364_v21, %v6128_v20  ;;  %v6088_v48 = vld [vmem:[#allocation5 + $0x210] sm:$0xf]  ;;  %v5929_v51 = vor.u32 %v8314_v45, %v5928_v44  ;;  %v8426_v52 = vld [vmem:[#allocation5 + $0x464] sm:$0xf]  ;;  %v5908_v56 = vld [vmem:[#allocation5 + $0xa8] sm:$0xf] }
  0x89   : > { %1899 = vmatpush.bf16.msrb.mxu1 %v5885_v35  ;;  %v6425_v35 = vor.u32 %v8436_v24, %v6422_v25  ;;  %v8466_v54 = vld [vmem:[#allocation5 + $0x5a4] sm:$0xf]  ;;  %v8309_v57 = vld [vmem:[#allocation5 + $0xb8] sm:$0xf0]  ;;  %v6362_v1 = vld [vmem:[#allocation5 + $0x44c] sm:$0xf0] }
  0x8a   : > { %1912 = vmatpush.bf16.msrb.mxu2 %v6045_v37  ;;  %v8359_v37 = vld [vmem:[#allocation5 + $0x248] sm:$0xf0]  ;;  %v8349_v61 = vld [vmem:[#allocation5 + $0x1f8] sm:$0xf0]  ;;  %v6545_v62 = vor.u32 %v8466_v54, %v6542_v55  ;;  %v5909_v63 = vor.u32 %v8309_v57, %v5908_v56  ;;  %v6522_v3 = vld [vmem:[#allocation5 + $0x58c] sm:$0xf0] }
  0x8b   : > { %1925 = vmatpush.bf16.msrb.mxu3 %v6205_v41  ;;  %v6402_v41 = vld [vmem:[#allocation5 + $0x49c] sm:$0xf0]  ;;  %v8461_v2 = vld [vmem:[#allocation5 + $0x57c] sm:$0xf]  ;;  %v8304_v5 = vld [vmem:[#allocation5 + $0x90] sm:$0xf0] }
  0x8c   : > { %1887 = vmatpush.bf16.msrb.mxu0 %v6501_v46  ;;  %v6109_v46 = vor.u32 %v8359_v37, %v6108_v36  ;;  %v6048_v8 = vld [vmem:[#allocation5 + $0x1c0] sm:$0xf]  ;;  %v8344_v9 = vld [vmem:[#allocation5 + $0x1d0] sm:$0xf0]  ;;  %v6525_v10 = vor.u32 %v8461_v2, %v6522_v3  ;;  %v6502_v17 = vld [vmem:[#allocation5 + $0x564] sm:$0xf0] }
  0x8d   : > { %1900 = vmatpush.bf16.msrb.mxu1 %v5865_v47  ;;  %v6405_v47 = vor.u32 %v8431_v40, %v6402_v41  ;;  %v8456_v16 = vld [vmem:[#allocation5 + $0x554] sm:$0xf]  ;;  %v6049_v20 = vor.u32 %v8344_v9, %v6048_v8  ;;  %v8411_v26 = vld [vmem:[#allocation5 + $0x3ec] sm:$0xf]  ;;  %v6482_v29 = vld [vmem:[#allocation5 + $0x53c] sm:$0xf0] }
  0x8e   : > { %1913 = vmatpush.bf16.msrb.mxu2 %v6025_v49  ;;  %v8354_v49 = vld [vmem:[#allocation5 + $0x220] sm:$0xf0]  ;;  %v6505_v24 = vor.u32 %v8456_v16, %v6502_v17  ;;  %v8451_v28 = vld [vmem:[#allocation5 + $0x52c] sm:$0xf]  ;;  %v5848_v32 = vld [vmem:[#allocation5 + $0x30] sm:$0xf] }
  0x8f   : > { %1926 = vmatpush.bf16.msrb.mxu3 %v6185_v53  ;;  %v6382_v53 = vld [vmem:[#allocation5 + $0x474] sm:$0xf0]  ;;  %v6089_v58 = vor.u32 %v8354_v49, %v6088_v48  ;;  %v6008_v36 = vld [vmem:[#allocation5 + $0x170] sm:$0xf]  ;;  %v6485_v41 = vor.u32 %v8451_v28, %v6482_v29  ;;  %v8446_v43 = vld [vmem:[#allocation5 + $0x504] sm:$0xf] }
  0x90   : > { %1888 = vmatpush.bf16.msrb.mxu0 %v6481_v59  ;;  %v6385_v59 = vor.u32 %v8426_v52, %v6382_v53  ;;  %v6302_v40 = vld [vmem:[#allocation5 + $0x3d4] sm:$0xf0]  ;;  %v5828_v45 = vld [vmem:[#allocation5 + $0x8] sm:$0xf]  ;;  %v8404_v48 = vld [vmem:[#allocation5 + $0x3b0] sm:$0xf0] }
  0x91   : > { %1901 = vmatpush.bf16.msrb.mxu1 %v5845_v60  ;;  %v6068_v60 = vld [vmem:[#allocation5 + $0x1e8] sm:$0xf]  ;;  %v6462_v44 = vld [vmem:[#allocation5 + $0x514] sm:$0xf0]  ;;  %v6608_v52 = vld [vmem:[#allocation5 + $0x620] sm:$0xf] }
  0x92   : > { %1914 = vmatpush.bf16.msrb.mxu2 %v6005_v0  ;;  %v8421_v0 = vld [vmem:[#allocation5 + $0x43c] sm:$0xf]  ;;  %v6069_v6 = vor.u32 %v8349_v61, %v6068_v60  ;;  %v8484_v54 = vld [vmem:[#allocation5 + $0x630] sm:$0xf0]  ;;  %v5988_v55 = vld [vmem:[#allocation5 + $0x148] sm:$0xf]  ;;  %v6465_v57 = vor.u32 %v8446_v43, %v6462_v44 }
  0x93   : > { %1927 = vmatpush.bf16.msrb.mxu3 %v6165_v4  ;;  %v5888_v4 = vld [vmem:[#allocation5 + $0x80] sm:$0xf]  ;;  %v6365_v7 = vor.u32 %v8421_v0, %v6362_v1  ;;  %v8329_v56 = vld [vmem:[#allocation5 + $0x158] sm:$0xf0]  ;;  %v5970_v60 = vld [vmem:[#allocation5 + $0x134] sm:$0xf0]  ;;  %v6609_v0 = vor.u32 %v8484_v54, %v6608_v52 }
  0x94   : > { %1889 = vmatpush.bf16.msrb.mxu0 %v6461_v12  ;;  %v5889_v11 = vor.u32 %v8304_v5, %v5888_v4  ;;  %v8416_v12 = vld [vmem:[#allocation5 + $0x414] sm:$0xf]  ;;  %v5989_v1 = vor.u32 %v8329_v56, %v5988_v55  ;;  %v8399_v2 = vld [vmem:[#allocation5 + $0x388] sm:$0xf0]  ;;  %v6428_v3 = vld [vmem:[#allocation5 + $0x4b8] sm:$0xf] }
  0x95   : > { %1902 = vmatpush.bf16.msrb.mxu1 %v5825_v15  ;;  %v6342_v15 = vld [vmem:[#allocation5 + $0x424] sm:$0xf0]  ;;  %v8439_v4 = vld [vmem:[#allocation5 + $0x4c8] sm:$0xf0]  ;;  %v8317_v8 = vld [vmem:[#allocation5 + $0xfc] sm:$0xf] }
  0x96   : > { %1915 = vmatpush.bf16.msrb.mxu2 %v5985_v18  ;;  %v5868_v18 = vld [vmem:[#allocation5 + $0x58] sm:$0xf]  ;;  %v6345_v21 = vor.u32 %v8416_v12, %v6342_v15  ;;  %v5950_v9 = vld [vmem:[#allocation5 + $0x10c] sm:$0xf0]  ;;  %v8394_v16 = vld [vmem:[#allocation5 + $0x360] sm:$0xf0] }
  0x97   : > { %1928 = vmatpush.bf16.msrb.mxu3 %v6145_v27  ;;  %1890 = vmatmul.bf16.vlgmr.msrb.gmra.mxu0 %v9596_v33  ;;  %v6322_v27 = vld [vmem:[#allocation5 + $0x3fc] sm:$0xf0]  ;;  %v6248_v12 = vld [vmem:[#allocation5 + $0x350] sm:$0xf]  ;;  %v8389_v28 = vld [vmem:[#allocation5 + $0x338] sm:$0xf0] }
  0x98   : > { %1934 = vmatpush.bf16.msra.mxu0 %v6445_v19  ;;  %1903 = vmatmul.bf16.vlgmr.msrb.gmra.mxu1 %v9582_v13  ;;  %v8299_v19 = vld [vmem:[#allocation5 + $0x68] sm:$0xf0]  ;;  %v6325_v37 = vor.u32 %v8411_v26, %v6322_v27  ;;  %v6408_v17 = vld [vmem:[#allocation5 + $0x490] sm:$0xf]  ;;  %v6228_v26 = vld [vmem:[#allocation5 + $0x328] sm:$0xf] }
  0x99   : > { %1947 = vmatpush.bf16.msra.mxu1 %v6605_v22  ;;  %1916 = vmatmul.bf16.vlgmr.msrb.gmra.mxu2 %v9584_v14  ;;  %v6028_v22 = vld [vmem:[#allocation5 + $0x198] sm:$0xf]  ;;  %v5869_v25 = vor.u32 %v8299_v19, %v5868_v18  ;;  %v8434_v18 = vld [vmem:[#allocation5 + $0x4a0] sm:$0xf0]  ;;  %v5953_v19 = vor.u32 %v8317_v8, %v5950_v9  ;;  %v6388_v29 = vld [vmem:[#allocation5 + $0x468] sm:$0xf] }
  0x9a   : > { %1960 = vmatpush.bf16.msra.mxu2 %v5969_v23  ;;  %1929 = vmatmul.bf16.vlgmr.msrb.gmra.mxu3 %v9588_v30  ;;  %v8339_v23 = vld [vmem:[#allocation5 + $0x1a8] sm:$0xf0]  ;;  %v8384_v43 = vld [vmem:[#allocation5 + $0x310] sm:$0xf0]  ;;  %v6368_v44 = vld [vmem:[#allocation5 + $0x440] sm:$0xf] }
  0x9b   : > { %1973 = vmatpush.bf16.msra.mxu3 %v6129_v34  ;;  %v8294_v34 = vld [vmem:[#allocation5 + $0x40] sm:$0xf0]  ;;  %v8379_v55 = vld [vmem:[#allocation5 + $0x2e8] sm:$0xf0]  ;;  %v6348_v56 = vld [vmem:[#allocation5 + $0x418] sm:$0xf] }
  0x9c   : > { %1935 = vmatpush.bf16.msra.mxu0 %v6425_v35  ;;  %v6029_v35 = vor.u32 %v8339_v23, %v6028_v22  ;;  %v5849_v42 = vor.u32 %v8294_v34, %v5848_v32  ;;  %v8312_v22 = vld [vmem:[#allocation5 + $0xd4] sm:$0xf]  ;;  %v5930_v23 = vld [vmem:[#allocation5 + $0xe4] sm:$0xf0]  ;;  %v8429_v32 = vld [vmem:[#allocation5 + $0x478] sm:$0xf0] }
  0x9d   : > { %1948 = vmatpush.bf16.msra.mxu1 %v6585_v38  ;;  %v8334_v38 = vld [vmem:[#allocation5 + $0x180] sm:$0xf0]  ;;  %v5933_v34 = vor.u32 %v8312_v22, %v5930_v23  ;;  %v8292_v9 = vld [vmem:[#allocation5 + $0x34] sm:$0xf]  ;;  %s9869_s22 = sld [smem:[#allocation30_spill]]  ;;  %s516_s13 = scalar_lea.vmem [#allocation16], %s5817_s27 }
  0x9e   : > { %1961 = vmatpush.bf16.msra.mxu2 %v5949_v39  ;;  %v8406_v39 = vld [vmem:[#allocation5 + $0x3c4] sm:$0xf]  ;;  %v6009_v49 = vor.u32 %v8334_v38, %v6008_v36  ;;  %v8469_v36 = vld [vmem:[#allocation5 + $0x5b8] sm:$0xf0]  ;;  %v5910_v38 = vld [vmem:[#allocation5 + $0xbc] sm:$0xf0] }
  0x9f   : > { %1974 = vmatpush.bf16.msra.mxu3 %v6109_v46  ;;  %v8289_v46 = vld [vmem:[#allocation5 + $0x18] sm:$0xf0]  ;;  %v6305_v53 = vor.u32 %v8406_v39, %v6302_v40  ;;  %v6229_v39 = vor.u32 %v8389_v28, %v6228_v26  ;;  %v6389_v40 = vor.u32 %v8429_v32, %v6388_v29  ;;  %v8454_v8 = vld [vmem:[#allocation5 + $0x540] sm:$0xf0]  ;;  %v6290_v26 = vld [vmem:[#allocation5 + $0x3b4] sm:$0xf0] }
  0xa0   : > { %1936 = vmatpush.bf16.msra.mxu0 %v6405_v47  ;;  %v6288_v47 = vld [vmem:[#allocation5 + $0x3a0] sm:$0xf]  ;;  %v8362_v23 = vld [vmem:[#allocation5 + $0x264] sm:$0xf]  ;;  %v6450_v28 = vld [vmem:[#allocation5 + $0x4f4] sm:$0xf0] }
  0xa1   : > { %1949 = vmatpush.bf16.msra.mxu1 %v6565_v50  ;;  %v6448_v50 = vld [vmem:[#allocation5 + $0x4e0] sm:$0xf]  ;;  %v6289_v61 = vor.u32 %v8404_v48, %v6288_v47  ;;  %v8464_v48 = vld [vmem:[#allocation5 + $0x590] sm:$0xf0]  ;;  %s5658_s29 = sshll.u32 %s516_s13, 4  ;;  %s5646_s7 = scalar_lea.sflag [#allocation4], %s9555_s3  ;;  %s5659_s29 = int_to_ptr.vmem [resolvable:$true] %s5658_s29 }
  0xa2   : > { %1962 = vmatpush.bf16.msra.mxu2 %v5929_v51  ;;  %v8444_v51 = vld [vmem:[#allocation5 + $0x4f0] sm:$0xf0]  ;;  %v6528_v47 = vld [vmem:[#allocation5 + $0x580] sm:$0xf] }
  0xa3   : > { %1975 = vmatpush.bf16.msra.mxu3 %v6089_v58  ;;  %v5829_v58 = vor.u32 %v8289_v46, %v5828_v45  ;;  %v8424_v45 = vld [vmem:[#allocation5 + $0x450] sm:$0xf0]  ;;  %v6529_v54 = vor.u32 %v8464_v48, %v6528_v47  ;;  %v8437_v47 = vld [vmem:[#allocation5 + $0x4bc] sm:$0xf]  ;;  %v6430_v48 = vld [vmem:[#allocation5 + $0x4cc] sm:$0xf0]  ;;  %s5656_s26 = scalar_lea.hbm %s9869_s22, %s8283_s23 }
  0xa4   : > { %1937 = vmatpush.bf16.msra.mxu0 %v6385_v59  ;;  %v8322_v59 = vld [vmem:[#allocation5 + $0x124] sm:$0xf]  ;;  %v6369_v52 = vor.u32 %v8424_v45, %v6368_v44  ;;  %v8397_v44 = vld [vmem:[#allocation5 + $0x37c] sm:$0xf]  ;;  %s5660_s4 = sshll.u32 %s5656_s26, 4  ;;  %s9291_s25 = scalar_lea.hbm %s9869_s22, 16  ;;  %s5661_s4 = int_to_ptr.hbm [resolvable:$true] %s5660_s4 }
  0xa5   : > { %1950 = vmatpush.bf16.msra.mxu1 %v6545_v62  ;;  %v6449_v62 = vor.u32 %v8444_v51, %v6448_v50  ;;  %v5973_v5 = vor.u32 %v8322_v59, %v5970_v60  ;;  %v5890_v50 = vld [vmem:[#allocation5 + $0x94] sm:$0xf0]  ;;  %v8459_v60 = vld [vmem:[#allocation5 + $0x568] sm:$0xf0]  ;;  %s9285_s24 = sshra.s32 %s5661_s4, 4  ;;  %s9286_s24 = int_to_ptr.hbm [resolvable:$true] %s9285_s24 }
  0xa6   : > { %1963 = vmatpush.bf16.msra.mxu2 %v5909_v63  ;;  %v6268_v63 = vld [vmem:[#allocation5 + $0x378] sm:$0xf]  ;;  %s9287_s15 = scalar_lea.hbm %s9286_s24, 8  ;;  %p9292_p13 = scmp.lt.s32.totalorder %s9286_s24, %s9869_s22 }
  0xa7   : > { %1976 = vmatpush.bf16.msra.mxu3 %v6069_v6  ;;  %v6588_v6 = vld [vmem:[#allocation5 + $0x5f8] sm:$0xf]  ;;  %p9288_p1 = scmp.ne.s32.totalorder %s9286_s24, %s9287_s15  ;;  %p9293_p8 = scmp.lt.s32.totalorder %s9291_s25, %s9287_s15 }
  0xa8   : > { %1938 = vmatpush.bf16.msra.mxu0 %v6365_v7  ;;  %v8479_v7 = vld [vmem:[#allocation5 + $0x608] sm:$0xf0]  ;;  %v6508_v59 = vld [vmem:[#allocation5 + $0x558] sm:$0xf] }
  0xa9   : > { %1951 = vmatpush.bf16.msra.mxu1 %v6525_v10  ;;  %v6269_v10 = vor.u32 %v8399_v2, %v6268_v63  ;;  %v6589_v15 = vor.u32 %v8479_v7, %v6588_v6  ;;  %v6509_v2 = vor.u32 %v8459_v60, %v6508_v59  ;;  %v6488_v7 = vld [vmem:[#allocation5 + $0x530] sm:$0xf]  ;;  %v8432_v59 = vld [vmem:[#allocation5 + $0x494] sm:$0xf]  ;;  %v6410_v60 = vld [vmem:[#allocation5 + $0x4a4] sm:$0xf0]  ;;  %p9289_p3 = pnand %p9288_p1, %p9524_p0  ;;  %p9294_p7 = por %p9293_p8, %p9292_p13 }
  0xaa   : > { %1964 = vmatpush.bf16.msra.mxu2 %v5889_v11  ;;  %v6429_v11 = vor.u32 %v8439_v4, %v6428_v3  ;;  %v8374_v3 = vld [vmem:[#allocation5 + $0x2c0] sm:$0xf0]  ;;  %v6328_v4 = vld [vmem:[#allocation5 + $0x3f0] sm:$0xf] }
  0xab   : > { %1977 = vmatpush.bf16.msra.mxu3 %v6049_v20  ;;  %v6568_v20 = vld [vmem:[#allocation5 + $0x5d0] sm:$0xf]  ;;  %p9290_p5 = pneg %p9289_p3 }
  0xac   : > { %1939 = vmatpush.bf16.msra.mxu0 %v6345_v21  ;;  %v8474_v21 = vld [vmem:[#allocation5 + $0x5e0] sm:$0xf0] }
  0xad   : > { %1952 = vmatpush.bf16.msra.mxu1 %v6505_v24  ;;  %v6249_v24 = vor.u32 %v8394_v16, %v6248_v12  ;;  %v6569_v27 = vor.u32 %v8474_v21, %v6568_v20  ;;  %v8369_v16 = vld [vmem:[#allocation5 + $0x298] sm:$0xf0]  ;;  %v6468_v20 = vld [vmem:[#allocation5 + $0x508] sm:$0xf]  ;;  %p9295_p9 = pnand %p9294_p7, %p9290_p5 }
  0xae   : > { %1965 = vmatpush.bf16.msra.mxu2 %v5869_v25  ;;  %v6409_v25 = vor.u32 %v8434_v18, %v6408_v17  ;;  %v6308_v17 = vld [vmem:[#allocation5 + $0x3c8] sm:$0xf]  ;;  %v6489_v18 = vor.u32 %v8454_v8, %v6488_v7  ;;  %v8449_v21 = vld [vmem:[#allocation5 + $0x518] sm:$0xf0]  ;;  %v8427_v7 = vld [vmem:[#allocation5 + $0x46c] sm:$0xf] }
  0xaf   : > { %1978 = vmatpush.bf16.msra.mxu3 %v6029_v35  ;;  %v6548_v35 = vld [vmem:[#allocation5 + $0x5a8] sm:$0xf]  ;;  %v6390_v8 = vld [vmem:[#allocation5 + $0x47c] sm:$0xf0] }
  0xb0   : > { %1940 = vmatpush.bf16.msra.mxu0 %v6325_v37  ;;  %v8307_v37 = vld [vmem:[#allocation5 + $0xac] sm:$0xf] }
  0xb1   : > { %1953 = vmatpush.bf16.msra.mxu1 %v6485_v41  ;;  %v6208_v41 = vld [vmem:[#allocation5 + $0x300] sm:$0xf]  ;;  %v5913_v46 = vor.u32 %v8307_v37, %v5910_v38  ;;  %v8482_v38 = vld [vmem:[#allocation5 + $0x624] sm:$0xf] }
  0xb2   : > { %1966 = vmatpush.bf16.msra.mxu2 %v5849_v42  ;;  %v6549_v42 = vor.u32 %v8469_v36, %v6548_v35  ;;  %v6209_v51 = vor.u32 %v8384_v43, %v6208_v41  ;;  %v5830_v35 = vld [vmem:[#allocation5 + $0x1c] sm:$0xf0]  ;;  %v6469_v36 = vor.u32 %v8449_v21, %v6468_v20  ;;  %v6110_v43 = vld [vmem:[#allocation5 + $0x24c] sm:$0xf0]  ;;  %v6210_v20 = vld [vmem:[#allocation5 + $0x314] sm:$0xf0] }
  0xb3   : > { %1979 = vmatpush.bf16.msra.mxu3 %v6009_v49  ;;  %v8302_v49 = vld [vmem:[#allocation5 + $0x84] sm:$0xf] }
  0xb4   : > { %1941 = vmatpush.bf16.msra.mxu0 %v6305_v53  ;;  %v6188_v53 = vld [vmem:[#allocation5 + $0x2d8] sm:$0xf]  ;;  %v8422_v21 = vld [vmem:[#allocation5 + $0x444] sm:$0xf] }
  0xb5   : > { %1954 = vmatpush.bf16.msra.mxu1 %v6465_v57  ;;  %v8419_v57 = vld [vmem:[#allocation5 + $0x428] sm:$0xf0]  ;;  %v6189_v63 = vor.u32 %v8379_v55, %v6188_v53  ;;  %v8352_v55 = vld [vmem:[#allocation5 + $0x214] sm:$0xf] }
  0xb6   : > { %1967 = vmatpush.bf16.msra.mxu2 %v5829_v58  ;;  %v5893_v58 = vor.u32 %v8302_v49, %v5890_v50 }
  0xb7   : > { %1980 = vmatpush.bf16.msra.mxu3 %v5989_v1  ;;  %1942 = vmatmul.bf16.vlgmr.msra.gmra.mxu0 %v9591_v31  ;;  %v6168_v1 = vld [vmem:[#allocation5 + $0x2b0] sm:$0xf] }
  0xb8   : > { %1986 = vmatpush.bf16.msrb.mxu0 %v6289_v61  ;;  %1955 = vmatmul.bf16.vlgmr.msra.gmra.mxu1 %v9596_v33  ;;  %v8297_v61 = vld [vmem:[#allocation5 + $0x5c] sm:$0xf] }
  0xb9   : > { %1999 = vmatpush.bf16.msrb.mxu1 %v6449_v62  ;;  %1968 = vmatmul.bf16.vlgmr.msra.gmra.mxu2 %v9582_v13  ;;  %v5870_v62 = vld [vmem:[#allocation5 + $0x6c] sm:$0xf0] }
  0xba   : > { %2012 = vmatpush.bf16.msrb.mxu2 %v6609_v0  ;;  %1981 = vmatmul.bf16.vlgmr.msra.gmra.mxu3 %v9584_v14  ;;  %v6349_v0 = vor.u32 %v8419_v57, %v6348_v56  ;;  %v5873_v6 = vor.u32 %v8297_v61, %v5870_v62  ;;  %v6090_v56 = vld [vmem:[#allocation5 + $0x224] sm:$0xf0]  ;;  %v8392_v57 = vld [vmem:[#allocation5 + $0x354] sm:$0xf] }
  0xbb   : > { %2025 = vmatpush.bf16.msrb.mxu3 %v5973_v5  ;;  %v8414_v5 = vld [vmem:[#allocation5 + $0x400] sm:$0xf0]  ;;  %v6093_v62 = vor.u32 %v8352_v55, %v6090_v56 }
  0xbc   : > { %1987 = vmatpush.bf16.msrb.mxu0 %v6269_v10  ;;  %v5850_v10 = vld [vmem:[#allocation5 + $0x44] sm:$0xf0]  ;;  %v6329_v12 = vor.u32 %v8414_v5, %v6328_v4  ;;  %v6070_v4 = vld [vmem:[#allocation5 + $0x1fc] sm:$0xf0]  ;;  %v8387_v5 = vld [vmem:[#allocation5 + $0x32c] sm:$0xf] }
  0xbd   : > { %2000 = vmatpush.bf16.msrb.mxu1 %v6429_v11  ;;  %v6169_v11 = vor.u32 %v8374_v3, %v6168_v1  ;;  %v5853_v22 = vor.u32 %v8292_v9, %v5850_v10  ;;  %v8347_v3 = vld [vmem:[#allocation5 + $0x1ec] sm:$0xf] }
  0xbe   : > { %2013 = vmatpush.bf16.msrb.mxu2 %v6589_v15  ;;  %v6148_v15 = vld [vmem:[#allocation5 + $0x288] sm:$0xf]  ;;  %v6073_v10 = vor.u32 %v8347_v3, %v6070_v4  ;;  %v8447_v4 = vld [vmem:[#allocation5 + $0x50c] sm:$0xf] }
  0xbf   : > { %2026 = vmatpush.bf16.msrb.mxu3 %v5953_v19  ;;  %v8409_v19 = vld [vmem:[#allocation5 + $0x3d8] sm:$0xf0]  ;;  %v6149_v29 = vor.u32 %v8369_v16, %v6148_v15  ;;  %v6393_v16 = vor.u32 %v8427_v7, %v6390_v8  ;;  %v6296_v8 = vld [vmem:[#allocation5 + $0x3a8] sm:$0xf] }
  0xc0   : > { %1988 = vmatpush.bf16.msrb.mxu0 %v6249_v24  ;;  %v6130_v24 = vld [vmem:[#allocation5 + $0x274] sm:$0xf0]  ;;  %v6309_v32 = vor.u32 %v8409_v19, %v6308_v17  ;;  %v8342_v17 = vld [vmem:[#allocation5 + $0x1c4] sm:$0xf] }
  0xc1   : > { %2001 = vmatpush.bf16.msrb.mxu1 %v6409_v25  ;;  %v8402_v25 = vld [vmem:[#allocation5 + $0x3a4] sm:$0xf]  ;;  %v6133_v37 = vor.u32 %v8362_v23, %v6130_v24 }
  0xc2   : > { %2014 = vmatpush.bf16.msrb.mxu2 %v6569_v27  ;;  %v8442_v27 = vld [vmem:[#allocation5 + $0x4e4] sm:$0xf] }
  0xc3   : > { %2027 = vmatpush.bf16.msrb.mxu3 %v5933_v34  ;;  %v8287_v34 = vld [vmem:[#allocation5 + $0xc] sm:$0xf]  ;;  %v6453_v41 = vor.u32 %v8442_v27, %v6450_v28  ;;  %v8382_v19 = vld [vmem:[#allocation5 + $0x304] sm:$0xf] }
  0xc4   : > { %1989 = vmatpush.bf16.msrb.mxu0 %v6229_v39  ;;  %v6610_v39 = vld [vmem:[#allocation5 + $0x634] sm:$0xf0]  ;;  %v5833_v45 = vor.u32 %v8287_v34, %v5830_v35  ;;  %v6213_v27 = vor.u32 %v8382_v19, %v6210_v20  ;;  %v8377_v34 = vld [vmem:[#allocation5 + $0x2dc] sm:$0xf]  ;;  %v6190_v35 = vld [vmem:[#allocation5 + $0x2ec] sm:$0xf0] }
  0xc5   : > { %2002 = vmatpush.bf16.msrb.mxu1 %v6389_v40  ;;  %v6293_v40 = vor.u32 %v8402_v25, %v6290_v26  ;;  %v6613_v49 = vor.u32 %v8482_v38, %v6610_v39  ;;  %v8462_v25 = vld [vmem:[#allocation5 + $0x584] sm:$0xf]  ;;  %v6530_v26 = vld [vmem:[#allocation5 + $0x594] sm:$0xf0]  ;;  %v6116_v19 = vld [vmem:[#allocation5 + $0x240] sm:$0xf] }
  0xc6   : > { %2015 = vmatpush.bf16.msrb.mxu2 %v6549_v42  ;;  %v8357_v42 = vld [vmem:[#allocation5 + $0x23c] sm:$0xf]  ;;  %v6533_v38 = vor.u32 %v8462_v25, %v6530_v26  ;;  %v8360_v20 = vld [vmem:[#allocation5 + $0x250] sm:$0xf0]  ;;  %v6436_v26 = vld [vmem:[#allocation5 + $0x4c0] sm:$0xf] }
  0xc7   : > { %2028 = vmatpush.bf16.msrb.mxu3 %v5913_v46  ;;  %v6270_v46 = vld [vmem:[#allocation5 + $0x38c] sm:$0xf0]  ;;  %v6113_v50 = vor.u32 %v8357_v42, %v6110_v43  ;;  %v6193_v42 = vor.u32 %v8377_v34, %v6190_v35  ;;  %v8400_v25 = vld [vmem:[#allocation5 + $0x390] sm:$0xf0]  ;;  %v6096_v34 = vld [vmem:[#allocation5 + $0x218] sm:$0xf] }
  0xc8   : > { %1990 = vmatpush.bf16.msrb.mxu0 %v6209_v51  ;;  %v8477_v51 = vld [vmem:[#allocation5 + $0x5fc] sm:$0xf]  ;;  %v6273_v53 = vor.u32 %v8397_v44, %v6270_v46  ;;  %v8332_v44 = vld [vmem:[#allocation5 + $0x174] sm:$0xf]  ;;  %v8355_v35 = vld [vmem:[#allocation5 + $0x228] sm:$0xf0] }
  0xc9   : > { %2003 = vmatpush.bf16.msrb.mxu1 %v6369_v52  ;;  %v6590_v52 = vld [vmem:[#allocation5 + $0x60c] sm:$0xf0]  ;;  %v8372_v46 = vld [vmem:[#allocation5 + $0x2b4] sm:$0xf] }
  0xca   : > { %2016 = vmatpush.bf16.msrb.mxu2 %v6529_v54  ;;  %v6433_v54 = vor.u32 %v8437_v47, %v6430_v48  ;;  %v6593_v61 = vor.u32 %v8477_v51, %v6590_v52  ;;  %v6170_v47 = vld [vmem:[#allocation5 + $0x2c4] sm:$0xf0]  ;;  %v8412_v48 = vld [vmem:[#allocation5 + $0x3f4] sm:$0xf] }
  0xcb   : > { %2029 = vmatpush.bf16.msrb.mxu3 %v5893_v58  ;;  %v6250_v58 = vld [vmem:[#allocation5 + $0x364] sm:$0xf0]  ;;  %v8452_v52 = vld [vmem:[#allocation5 + $0x534] sm:$0xf]  ;;  %v6173_v55 = vor.u32 %v8372_v46, %v6170_v47  ;;  %v6076_v46 = vld [vmem:[#allocation5 + $0x1f0] sm:$0xf] }
  0xcc   : > { %1991 = vmatpush.bf16.msrb.mxu0 %v6189_v63  ;;  %v8472_v63 = vld [vmem:[#allocation5 + $0x5d4] sm:$0xf]  ;;  %v6253_v1 = vor.u32 %v8392_v57, %v6250_v58  ;;  %v5990_v57 = vld [vmem:[#allocation5 + $0x15c] sm:$0xf0]  ;;  %v8367_v58 = vld [vmem:[#allocation5 + $0x28c] sm:$0xf] }
  0xcd   : > { %2004 = vmatpush.bf16.msrb.mxu1 %v6349_v0  ;;  %v6570_v0 = vld [vmem:[#allocation5 + $0x5e4] sm:$0xf0]  ;;  %v8350_v47 = vld [vmem:[#allocation5 + $0x200] sm:$0xf0] }
  0xce   : > { %2017 = vmatpush.bf16.msrb.mxu2 %v6509_v2  ;;  %v6413_v2 = vor.u32 %v8432_v59, %v6410_v60  ;;  %v6573_v9 = vor.u32 %v8472_v63, %v6570_v0  ;;  %v6150_v59 = vld [vmem:[#allocation5 + $0x29c] sm:$0xf0]  ;;  %v8407_v60 = vld [vmem:[#allocation5 + $0x3cc] sm:$0xf]  ;;  %v8325_v0 = vld [vmem:[#allocation5 + $0x138] sm:$0xf0] }
  0xcf   : > { %2030 = vmatpush.bf16.msrb.mxu3 %v5873_v6  ;;  %v6230_v6 = vld [vmem:[#allocation5 + $0x33c] sm:$0xf0] }
  0xd0   : > { %1992 = vmatpush.bf16.msrb.mxu0 %v6169_v11  ;;  %v8467_v11 = vld [vmem:[#allocation5 + $0x5ac] sm:$0xf]  ;;  %v6233_v15 = vor.u32 %v8387_v5, %v6230_v6  ;;  %v6470_v5 = vld [vmem:[#allocation5 + $0x51c] sm:$0xf0]  ;;  %v6153_v6 = vor.u32 %v8367_v58, %v6150_v59  ;;  %v6056_v58 = vld [vmem:[#allocation5 + $0x1c8] sm:$0xf] }
  0xd1   : > { %2005 = vmatpush.bf16.msrb.mxu1 %v6329_v12  ;;  %v6550_v12 = vld [vmem:[#allocation5 + $0x5bc] sm:$0xf0]  ;;  %v8345_v59 = vld [vmem:[#allocation5 + $0x1d8] sm:$0xf0] }
  0xd2   : > { %2018 = vmatpush.bf16.msrb.mxu2 %v6489_v18  ;;  %v6050_v18 = vld [vmem:[#allocation5 + $0x1d4] sm:$0xf0]  ;;  %v6553_v23 = vor.u32 %v8467_v11, %v6550_v12  ;;  %v8405_v11 = vld [vmem:[#allocation5 + $0x3b8] sm:$0xf0]  ;;  %v6456_v12 = vld [vmem:[#allocation5 + $0x4e8] sm:$0xf] }
  0xd3   : > { %2031 = vmatpush.bf16.msrb.mxu3 %v5853_v22  ;;  %v6370_v22 = vld [vmem:[#allocation5 + $0x454] sm:$0xf0]  ;;  %v6053_v24 = vor.u32 %v8342_v17, %v6050_v18  ;;  %v5956_v17 = vld [vmem:[#allocation5 + $0x100] sm:$0xf]  ;;  %v8320_v18 = vld [vmem:[#allocation5 + $0x110] sm:$0xf0] }
  0xd4   : > { %1993 = vmatpush.bf16.msrb.mxu0 %v6149_v29  ;;  %v6373_v28 = vor.u32 %v8422_v21, %v6370_v22  ;;  %v8337_v29 = vld [vmem:[#allocation5 + $0x19c] sm:$0xf]  ;;  %v6297_v21 = vor.u32 %v8405_v11, %v6296_v8  ;;  %v6276_v22 = vld [vmem:[#allocation5 + $0x380] sm:$0xf] }
  0xd5   : > { %2006 = vmatpush.bf16.msrb.mxu1 %v6309_v32  ;;  %v6030_v32 = vld [vmem:[#allocation5 + $0x1ac] sm:$0xf0] }
  0xd6   : > { %2019 = vmatpush.bf16.msrb.mxu2 %v6469_v36  ;;  %v8417_v36 = vld [vmem:[#allocation5 + $0x41c] sm:$0xf]  ;;  %v6033_v39 = vor.u32 %v8337_v29, %v6030_v32  ;;  %v5936_v29 = vld [vmem:[#allocation5 + $0xd8] sm:$0xf]  ;;  %v8315_v32 = vld [vmem:[#allocation5 + $0xe8] sm:$0xf0] }
  0xd7   : > { %2032 = vmatpush.bf16.msrb.mxu3 %v5833_v45  ;;  %1994 = vmatmul.bf16.vlgmr.msrb.gmra.mxu0 %v9588_v30  ;;  %v6010_v45 = vld [vmem:[#allocation5 + $0x184] sm:$0xf0] }
  0xd8   : > { %2038 = vmatpush.bf16.msra.mxu0 %v6133_v37  ;;  %2007 = vmatmul.bf16.vlgmr.msrb.gmra.mxu1 %v9591_v31  ;;  %v6350_v37 = vld [vmem:[#allocation5 + $0x42c] sm:$0xf0]  ;;  %v6013_v51 = vor.u32 %v8332_v44, %v6010_v45  ;;  %v8310_v45 = vld [vmem:[#allocation5 + $0xc0] sm:$0xf0] }
  0xd9   : > { %2051 = vmatpush.bf16.msra.mxu1 %v6293_v40  ;;  %2020 = vmatmul.bf16.vlgmr.msrb.gmra.mxu2 %v9596_v33  ;;  %v8457_v40 = vld [vmem:[#allocation5 + $0x55c] sm:$0xf]  ;;  %v6353_v43 = vor.u32 %v8417_v36, %v6350_v37  ;;  %v6277_v36 = vor.u32 %v8400_v25, %v6276_v22  ;;  %v6256_v37 = vld [vmem:[#allocation5 + $0x358] sm:$0xf]  ;;  %v5916_v44 = vld [vmem:[#allocation5 + $0xb0] sm:$0xf] }
  0xda   : > { %2064 = vmatpush.bf16.msra.mxu2 %v6453_v41  ;;  %2033 = vmatmul.bf16.vlgmr.msrb.gmra.mxu3 %v9582_v13  ;;  %v6510_v41 = vld [vmem:[#allocation5 + $0x56c] sm:$0xf0]  ;;  %v6016_v22 = vld [vmem:[#allocation5 + $0x178] sm:$0xf] }
  0xdb   : > { %2077 = vmatpush.bf16.msra.mxu3 %v6613_v49  ;;  %v6330_v49 = vld [vmem:[#allocation5 + $0x404] sm:$0xf0]  ;;  %v6176_v25 = vld [vmem:[#allocation5 + $0x2b8] sm:$0xf] }
  0xdc   : > { %2039 = vmatpush.bf16.msra.mxu0 %v6113_v50  ;;  %v6513_v50 = vor.u32 %v8457_v40, %v6510_v41  ;;  %v6333_v56 = vor.u32 %v8412_v48, %v6330_v49  ;;  %v8395_v40 = vld [vmem:[#allocation5 + $0x368] sm:$0xf0]  ;;  %v6416_v41 = vld [vmem:[#allocation5 + $0x498] sm:$0xf]  ;;  %v6236_v49 = vld [vmem:[#allocation5 + $0x330] sm:$0xf] }
  0xdd   : > { %2052 = vmatpush.bf16.msra.mxu1 %v6273_v53  ;;  %v6490_v53 = vld [vmem:[#allocation5 + $0x544] sm:$0xf0]  ;;  %v6257_v48 = vor.u32 %v8395_v40, %v6256_v37  ;;  %v5996_v37 = vld [vmem:[#allocation5 + $0x150] sm:$0xf]  ;;  %v8485_v40 = vld [vmem:[#allocation5 + $0x638] sm:$0xf0] }
  0xde   : > { %2065 = vmatpush.bf16.msra.mxu2 %v6433_v54  ;;  %v8327_v54 = vld [vmem:[#allocation5 + $0x14c] sm:$0xf]  ;;  %v6493_v63 = vor.u32 %v8452_v52, %v6490_v53  ;;  %v8390_v52 = vld [vmem:[#allocation5 + $0x340] sm:$0xf0]  ;;  %v6396_v53 = vld [vmem:[#allocation5 + $0x470] sm:$0xf] }
  0xdf   : > { %2078 = vmatpush.bf16.msra.mxu3 %v6593_v61  ;;  %v6310_v61 = vld [vmem:[#allocation5 + $0x3dc] sm:$0xf0]  ;;  %v5993_v3 = vor.u32 %v8327_v54, %v5990_v57  ;;  %v8430_v54 = vld [vmem:[#allocation5 + $0x480] sm:$0xf0]  ;;  %v8305_v57 = vld [vmem:[#allocation5 + $0x98] sm:$0xf0] }
  0xe0   : > { %2040 = vmatpush.bf16.msra.mxu0 %v6093_v62  ;;  %v5976_v62 = vld [vmem:[#allocation5 + $0x128] sm:$0xf]  ;;  %v6313_v7 = vor.u32 %v8407_v60, %v6310_v61  ;;  %v6237_v60 = vor.u32 %v8390_v52, %v6236_v49  ;;  %v8563_v52 = vld [vmem:[#allocation8 + $0x268] sm:$0xf0] }
  0xe1   : > { %2053 = vmatpush.bf16.msra.mxu1 %v6253_v1  ;;  %v6136_v1 = vld [vmem:[#allocation5 + $0x268] sm:$0xf] }
  0xe2   : > { %2066 = vmatpush.bf16.msra.mxu2 %v6413_v2  ;;  %v8365_v2 = vld [vmem:[#allocation5 + $0x278] sm:$0xf0]  ;;  %v6216_v61 = vld [vmem:[#allocation5 + $0x308] sm:$0xf] }
  0xe3   : > { %2079 = vmatpush.bf16.msra.mxu3 %v6573_v9  ;;  %v5977_v9 = vor.u32 %v8325_v0, %v5976_v62  ;;  %v6397_v62 = vor.u32 %v8430_v54, %v6396_v53  ;;  %v8385_v0 = vld [vmem:[#allocation5 + $0x318] sm:$0xf0]  ;;  %v6316_v53 = vld [vmem:[#allocation5 + $0x3d0] sm:$0xf]  ;;  %v8410_v54 = vld [vmem:[#allocation5 + $0x3e0] sm:$0xf0] }
  0xe4   : > { %2041 = vmatpush.bf16.msra.mxu0 %v6073_v10  ;;  %v6137_v10 = vor.u32 %v8365_v2, %v6136_v1  ;;  %v6376_v1 = vld [vmem:[#allocation5 + $0x448] sm:$0xf]  ;;  %v8425_v2 = vld [vmem:[#allocation5 + $0x458] sm:$0xf0]  ;;  %v6217_v8 = vor.u32 %v8385_v0, %v6216_v61 }
  0xe5   : > { %2054 = vmatpush.bf16.msra.mxu1 %v6233_v15  ;;  %v8445_v15 = vld [vmem:[#allocation5 + $0x4f8] sm:$0xf0] }
  0xe6   : > { %2067 = vmatpush.bf16.msra.mxu2 %v6393_v16  ;;  %v6473_v16 = vor.u32 %v8447_v4, %v6470_v5  ;;  %v5876_v4 = vld [vmem:[#allocation5 + $0x60] sm:$0xf]  ;;  %v8300_v5 = vld [vmem:[#allocation5 + $0x70] sm:$0xf0] }
  0xe7   : > { %2080 = vmatpush.bf16.msra.mxu3 %v6553_v23  ;;  %v6457_v23 = vor.u32 %v8445_v15, %v6456_v12  ;;  %v5877_v11 = vor.u32 %v8300_v5, %v5876_v4  ;;  %v8380_v12 = vld [vmem:[#allocation5 + $0x2f0] sm:$0xf0]  ;;  %v8558_v5 = vld [vmem:[#allocation8 + $0x240] sm:$0xf0] }
  0xe8   : > { %2042 = vmatpush.bf16.msra.mxu0 %v6053_v24  ;;  %v5957_v24 = vor.u32 %v8320_v18, %v5956_v17  ;;  %v8420_v17 = vld [vmem:[#allocation5 + $0x430] sm:$0xf0] }
  0xe9   : > { %2055 = vmatpush.bf16.msra.mxu1 %v6213_v27  ;;  %v8440_v27 = vld [vmem:[#allocation5 + $0x4d0] sm:$0xf0] }
  0xea   : > { %2068 = vmatpush.bf16.msra.mxu2 %v6373_v28  ;;  %v6117_v28 = vor.u32 %v8360_v20, %v6116_v19  ;;  %v5856_v19 = vld [vmem:[#allocation5 + $0x38] sm:$0xf]  ;;  %v8295_v20 = vld [vmem:[#allocation5 + $0x48] sm:$0xf0] }
  0xeb   : > { %2081 = vmatpush.bf16.msra.mxu3 %v6533_v38  ;;  %v6437_v38 = vor.u32 %v8440_v27, %v6436_v26  ;;  %v5857_v27 = vor.u32 %v8295_v20, %v5856_v19 }
  0xec   : > { %2043 = vmatpush.bf16.msra.mxu0 %v6033_v39  ;;  %v5937_v39 = vor.u32 %v8315_v32, %v5936_v29  ;;  %v6336_v29 = vld [vmem:[#allocation5 + $0x3f8] sm:$0xf]  ;;  %v8415_v32 = vld [vmem:[#allocation5 + $0x408] sm:$0xf0] }
  0xed   : > { %2056 = vmatpush.bf16.msra.mxu1 %v6193_v42  ;;  %v8435_v42 = vld [vmem:[#allocation5 + $0x4a8] sm:$0xf0] }
  0xee   : > { %2069 = vmatpush.bf16.msra.mxu2 %v6353_v43  ;;  %v6097_v43 = vor.u32 %v8355_v35, %v6096_v34  ;;  %v5836_v35 = vld [vmem:[#allocation5 + $0x10] sm:$0xf] }
  0xef   : > { %2082 = vmatpush.bf16.msra.mxu3 %v6513_v50  ;;  %v6417_v50 = vor.u32 %v8435_v42, %v6416_v41  ;;  %v6760_v42 = vld [vmem:[#allocation8 + $0x118] sm:$0xf] }
  0xf0   : > { %2044 = vmatpush.bf16.msra.mxu0 %v6013_v51  ;;  %v5917_v51 = vor.u32 %v8310_v45, %v5916_v44  ;;  %v6337_v44 = vor.u32 %v8415_v32, %v6336_v29  ;;  %v6700_v29 = vld [vmem:[#allocation8 + $0xa0] sm:$0xf]  ;;  %v8508_v32 = vld [vmem:[#allocation8 + $0xb0] sm:$0xf0] }
  0xf1   : > { %2057 = vmatpush.bf16.msra.mxu1 %v6173_v55  ;;  %v6077_v55 = vor.u32 %v8350_v47, %v6076_v46  ;;  %v6156_v46 = vld [vmem:[#allocation5 + $0x290] sm:$0xf]  ;;  %v8370_v47 = vld [vmem:[#allocation5 + $0x2a0] sm:$0xf0] }
  0xf2   : > { %2070 = vmatpush.bf16.msra.mxu2 %v6333_v56  ;;  %v5896_v56 = vld [vmem:[#allocation5 + $0x88] sm:$0xf]  ;;  %v6157_v61 = vor.u32 %v8370_v47, %v6156_v46  ;;  %v6840_v47 = vld [vmem:[#allocation8 + $0x1b8] sm:$0xf] }
  0xf3   : > { %2083 = vmatpush.bf16.msra.mxu3 %v6493_v63  ;;  %v5897_v63 = vor.u32 %v8305_v57, %v5896_v56  ;;  %v6596_v57 = vld [vmem:[#allocation5 + $0x600] sm:$0xf] }
  0xf4   : > { %2045 = vmatpush.bf16.msra.mxu0 %v5993_v3  ;;  %v6057_v3 = vor.u32 %v8345_v59, %v6056_v58  ;;  %v8480_v58 = vld [vmem:[#allocation5 + $0x610] sm:$0xf0] }
  0xf5   : > { %2058 = vmatpush.bf16.msra.mxu1 %v6153_v6  ;;  %v6036_v6 = vld [vmem:[#allocation5 + $0x1a0] sm:$0xf]  ;;  %v6597_v4 = vor.u32 %v8480_v58, %v6596_v57  ;;  %v8498_v57 = vld [vmem:[#allocation8 + $0x60] sm:$0xf0] }
  0xf6   : > { %2071 = vmatpush.bf16.msra.mxu2 %v6313_v7  ;;  %v8340_v7 = vld [vmem:[#allocation5 + $0x1b0] sm:$0xf0]  ;;  %v9614_v15 = vpop.f32.mrf.mxu0 }
  0xf7   : > { %2084 = vmatpush.bf16.msra.mxu3 %v6473_v16  ;;  %2046 = vmatmul.bf16.vlgmr.msra.gmra.mxu0 %v9584_v14  ;;  %v6356_v16 = vld [vmem:[#allocation5 + $0x420] sm:$0xf]  ;;  %v6037_v18 = vor.u32 %v8340_v7, %v6036_v6  ;;  %v8603_v7 = vld [vmem:[#allocation8 + $0x3a8] sm:$0xf0] }
  0xf8   : > { %2090 = vmatpush.bf16.msrb.mxu0 %v5977_v9  ;;  %2059 = vmatmul.bf16.vlgmr.msra.gmra.mxu1 %v9588_v30  ;;  %v6196_v9 = vld [vmem:[#allocation5 + $0x2e0] sm:$0xf]  ;;  %v6357_v26 = vor.u32 %v8420_v17, %v6356_v16 }
  0xf9   : > { %2103 = vmatpush.bf16.msrb.mxu1 %v6137_v10  ;;  %2072 = vmatmul.bf16.vlgmr.msra.gmra.mxu2 %v9591_v31  ;;  %v6377_v10 = vor.u32 %v8425_v2, %v6376_v1  ;;  %v6900_v2 = vld [vmem:[#allocation8 + $0x230] sm:$0xf]  ;;  %v7080_v6 = vld [vmem:[#allocation8 + $0x398] sm:$0xf]  ;;  %v8513_v16 = vld [vmem:[#allocation8 + $0xd8] sm:$0xf0] }
  0xfa   : > { %2116 = vmatpush.bf16.msrb.mxu2 %v6297_v21  ;;  %2085 = vmatmul.bf16.vlgmr.msra.gmra.mxu3 %v9596_v33  ;;  %v9616_v21 = vpop.f32.mrf.mxu1  ;;  %v6901_v17 = vor.u32 %v8558_v5, %v6900_v2  ;;  %v7081_v19 = vor.u32 %v8603_v7, %v7080_v6  ;;  %v7000_v2 = vld [vmem:[#allocation8 + $0x2f8] sm:$0xf]  ;;  %v8455_v6 = vld [vmem:[#allocation5 + $0x548] sm:$0xf0] }
  0xfb   : > { %2129 = vmatpush.bf16.msrb.mxu3 %v6457_v23  ;;  %v8335_v23 = vld [vmem:[#allocation5 + $0x188] sm:$0xf0] }
  0xfc   : > { %2091 = vmatpush.bf16.msrb.mxu0 %v5957_v24  ;;  %v6197_v24 = vor.u32 %v8380_v12, %v6196_v9  ;;  %v6017_v34 = vor.u32 %v8335_v23, %v6016_v22  ;;  %v6720_v12 = vld [vmem:[#allocation8 + $0xc8] sm:$0xf]  ;;  %v8553_v22 = vld [vmem:[#allocation8 + $0x218] sm:$0xf0]  ;;  %v7060_v23 = vld [vmem:[#allocation8 + $0x370] sm:$0xf] }
  0xfd   : > { %2104 = vmatpush.bf16.msrb.mxu1 %v6117_v28  ;;  %v8375_v28 = vld [vmem:[#allocation5 + $0x2c8] sm:$0xf0] }
  0xfe   : > { %2117 = vmatpush.bf16.msrb.mxu2 %v6277_v36  ;;  %v8290_v36 = vld [vmem:[#allocation5 + $0x20] sm:$0xf0]  ;;  %v6177_v41 = vor.u32 %v8375_v28, %v6176_v25  ;;  %v1841_v49 = vpop.f32.mrf.mxu0 }
  0xff   : > { %2130 = vmatpush.bf16.msrb.mxu3 %v6437_v38  ;;  %v8330_v38 = vld [vmem:[#allocation5 + $0x160] sm:$0xf0]  ;;  %v5837_v45 = vor.u32 %v8290_v36, %v5836_v35  ;;  %v9618_v59 = vpop.f32.mrf.mxu3 }
 0x100   : > { %2092 = vmatpush.bf16.msrb.mxu0 %v5937_v39  ;;  %v6616_v39 = vld [vmem:[#allocation5 + $0x628] sm:$0xf]  ;;  %v9622_v0 = vpop.f32.mrf.mxu2 }
 0x101   : > { %2105 = vmatpush.bf16.msrb.mxu1 %v6097_v43  ;;  %v8523_v43 = vld [vmem:[#allocation8 + $0x128] sm:$0xf0]  ;;  %v6860_v36 = vld [vmem:[#allocation8 + $0x1e0] sm:$0xf] }
 0x102   : > { %2118 = vmatpush.bf16.msrb.mxu2 %v6257_v48  ;;  %v6920_v48 = vld [vmem:[#allocation8 + $0x258] sm:$0xf]  ;;  %v6761_v56 = vor.u32 %v8523_v43, %v6760_v42 }
 0x103   : > { %2131 = vmatpush.bf16.msrb.mxu3 %v6417_v50  ;;  %v5997_v50 = vor.u32 %v8330_v38, %v5996_v37  ;;  %v6921_v1 = vor.u32 %v8563_v52, %v6920_v48  ;;  %v7040_v38 = vld [vmem:[#allocation8 + $0x348] sm:$0xf]  ;;  %v8465_v42 = vld [vmem:[#allocation5 + $0x598] sm:$0xf0] }
 0x104   : > { %2093 = vmatpush.bf16.msrb.mxu0 %v5917_v51  ;;  %v6617_v51 = vor.u32 %v8485_v40, %v6616_v39  ;;  %v8593_v39 = vld [vmem:[#allocation8 + $0x358] sm:$0xf0]  ;;  %v8588_v52 = vld [vmem:[#allocation8 + $0x330] sm:$0xf0] }
 0x105   : > { %2106 = vmatpush.bf16.msrb.mxu1 %v6077_v55  ;;  %v1854_v55 = vpop.f32.mrf.mxu1  ;;  %v7041_v48 = vor.u32 %v8593_v39, %v7040_v38 }
 0x106   : > { %2119 = vmatpush.bf16.msrb.mxu2 %v6237_v60  ;;  %v9620_v60 = vld [vmem:[#allocation7] sm:$0x1f]  ;;  %v8460_v55 = vld [vmem:[#allocation5 + $0x570] sm:$0xf0] }
 0x107   : > { %2132 = vmatpush.bf16.msrb.mxu3 %v6397_v62  ;;  %v6740_v62 = vld [vmem:[#allocation8 + $0xf0] sm:$0xf]  ;;  %v1880_v28 = vpop.f32.mrf.mxu3 }
 0x108   : > { %2094 = vmatpush.bf16.msrb.mxu0 %v5897_v63  ;;  %v8518_v63 = vld [vmem:[#allocation8 + $0x100] sm:$0xf0]  ;;  %v7240_v28 = vld [vmem:[#allocation8 + $0x4d8] sm:$0xf] }
 0x109   : > { %2107 = vmatpush.bf16.msrb.mxu1 %v6057_v3  ;;  %v6317_v3 = vor.u32 %v8410_v54, %v6316_v53  ;;  %v6741_v9 = vor.u32 %v8518_v63, %v6740_v62  ;;  %v6516_v54 = vld [vmem:[#allocation5 + $0x560] sm:$0xf] }
 0x10a   : > { %2120 = vmatpush.bf16.msrb.mxu2 %v6217_v8  ;;  %v762_v8 = vperm.slane %v9620_v60, 0  ;;  %v6517_v63 = vor.u32 %v8460_v55, %v6516_v54  ;;  %v8568_v55 = vld [vmem:[#allocation8 + $0x290] sm:$0xf0] }
 0x10b   : > { %2133 = vmatpush.bf16.msrb.mxu3 %v6377_v10  ;;  %v6576_v10 = vld [vmem:[#allocation5 + $0x5d8] sm:$0xf] }
 0x10c   : > { %2095 = vmatpush.bf16.msrb.mxu0 %v5877_v11  ;;  %v8475_v11 = vld [vmem:[#allocation5 + $0x5e8] sm:$0xf0]  ;;  %v1840_v25 = vadd.f32 %v9614_v15, %v762_v8  ;;  %v8548_v15 = vld [vmem:[#allocation8 + $0x1f0] sm:$0xf0] }
 0x10d   : > { %2108 = vmatpush.bf16.msrb.mxu1 %v6037_v18  ;;  %v6880_v18 = vld [vmem:[#allocation8 + $0x208] sm:$0xf]  ;;  %v6577_v20 = vor.u32 %v8475_v11, %v6576_v10  ;;  %v6861_v46 = vor.u32 %v8548_v15, %v6860_v36  ;;  %v8493_v10 = vld [vmem:[#allocation8 + $0x38] sm:$0xf0] }
 0x10e   : > { %2121 = vmatpush.bf16.msrb.mxu2 %v6197_v24  ;;  %v8598_v24 = vld [vmem:[#allocation8 + $0x380] sm:$0xf0]  ;;  %v6881_v35 = vor.u32 %v8553_v22, %v6880_v18  ;;  %v1853_v40 = vadd.f32 %v9616_v21, %v1840_v25  ;;  %v6476_v25 = vld [vmem:[#allocation5 + $0x510] sm:$0xf]  ;;  %v8521_v15 = vld [vmem:[#allocation8 + $0x11c] sm:$0xf] }
 0x10f   : > { %2134 = vmatpush.bf16.msrb.mxu3 %v6357_v26  ;;  %v6721_v26 = vor.u32 %v8513_v16, %v6720_v12  ;;  %v6800_v16 = vld [vmem:[#allocation8 + $0x168] sm:$0xf]  ;;  %v8578_v22 = vld [vmem:[#allocation8 + $0x2e0] sm:$0xf0] }
 0x110   : > { %2096 = vmatpush.bf16.msrb.mxu0 %v5857_v27  ;;  %v6556_v27 = vld [vmem:[#allocation5 + $0x5b0] sm:$0xf]  ;;  %v1866_v21 = vadd.f32 %v9622_v0, %v1853_v40  ;;  %v6496_v0 = vld [vmem:[#allocation5 + $0x538] sm:$0xf] }
 0x111   : > { %2109 = vmatpush.bf16.msrb.mxu1 %v6017_v34  ;;  %v1867_v34 = vpop.f32.mrf.mxu2  ;;  %v6762_v40 = vld [vmem:[#allocation8 + $0x12c] sm:$0xf0] }
 0x112   : > { %2122 = vmatpush.bf16.msrb.mxu2 %v6177_v41  ;;  %v6536_v41 = vld [vmem:[#allocation5 + $0x588] sm:$0xf] }
 0x113   : > { %2135 = vmatpush.bf16.msrb.mxu3 %v6337_v44  ;;  %v6680_v44 = vld [vmem:[#allocation8 + $0x78] sm:$0xf]  ;;  %v6537_v49 = vor.u32 %v8465_v42, %v6536_v41 }
 0x114   : > { %2097 = vmatpush.bf16.msrb.mxu0 %v5837_v45  ;;  %v1891_v43 = vpop.f32.mrf.mxu0 }
 0x115   : > { %2110 = vmatpush.bf16.msrb.mxu1 %v5997_v50  ;;  %v9631_v45 = vpop.f32.mrf.mxu1  ;;  %v8543_v50 = vld [vmem:[#allocation8 + $0x1c8] sm:$0xf0] }
 0x116   : > { %2123 = vmatpush.bf16.msrb.mxu2 %v6157_v61  ;;  %v6841_v58 = vor.u32 %v8543_v50, %v6840_v47  ;;  %v6820_v61 = vld [vmem:[#allocation8 + $0x190] sm:$0xf]  ;;  %v8516_v50 = vld [vmem:[#allocation8 + $0xf4] sm:$0xf] }
 0x117   : > { %2098 = vmatmul.bf16.vlgmr.msrb.gmra.mxu0 %v9582_v13  ;;  %2136 = vmatpush.bf16.msrb.mxu3 %v6317_v3  ;;  %v8470_v13 = vld [vmem:[#allocation5 + $0x5c0] sm:$0xf0]  ;;  %v8583_v3 = vld [vmem:[#allocation8 + $0x308] sm:$0xf0] }
 0x118   : > { %2142 = vmatpush.bf16.msra.mxu0 %v6617_v51  ;;  %2111 = vmatmul.bf16.vlgmr.msrb.gmra.mxu1 %v9584_v14  ;;  %v7061_v14 = vor.u32 %v8598_v24, %v7060_v23  ;;  %v6557_v37 = vor.u32 %v8470_v13, %v6556_v27  ;;  %v7020_v51 = vld [vmem:[#allocation8 + $0x320] sm:$0xf]  ;;  %v7001_v18 = vor.u32 %v8583_v3, %v7000_v2  ;;  %v8488_v13 = vld [vmem:[#allocation8 + $0x10] sm:$0xf0] }
 0x119   : > { %3457 = vmatpush.bf16.msra.mxu1 %v6761_v56  ;;  %2124 = vmatmul.bf16.vlgmr.msrb.gmra.mxu2 %v9588_v30  ;;  %v6701_v30 = vor.u32 %v8508_v32, %v6700_v29  ;;  %v6660_v56 = vld [vmem:[#allocation8 + $0x50] sm:$0xf]  ;;  %v7021_v62 = vor.u32 %v8588_v52, %v7020_v51  ;;  %v6620_v27 = vld [vmem:[#allocation8] sm:$0xf]  ;;  %v8643_v29 = vld [vmem:[#allocation8 + $0x4e8] sm:$0xf0] }
 0x11a   : > { %3470 = vmatpush.bf16.msra.mxu2 %v6921_v1  ;;  %2137 = vmatmul.bf16.vlgmr.msrb.gmra.mxu3 %v9591_v31  ;;  %v8503_v31 = vld [vmem:[#allocation8 + $0x88] sm:$0xf0]  ;;  %v8538_v1 = vld [vmem:[#allocation8 + $0x1a0] sm:$0xf0]  ;;  %v6661_v5 = vor.u32 %v8498_v57, %v6660_v56  ;;  %v763_v32 = vperm.slane %v9620_v60, 1  ;;  %v6621_v39 = vor.u32 %v8488_v13, %v6620_v27  ;;  %v7241_v42 = vor.u32 %v8643_v29, %v7240_v28 }
 0x11b   : > { %3483 = vmatpush.bf16.msra.mxu3 %v7081_v19  ;;  %v6681_v53 = vor.u32 %v8503_v31, %v6680_v44  ;;  %v6821_v12 = vor.u32 %v8538_v1, %v6820_v61  ;;  %v6497_v19 = vor.u32 %v8455_v6, %v6496_v0  ;;  %v7220_v44 = vld [vmem:[#allocation8 + $0x4b0] sm:$0xf]  ;;  %v8638_v31 = vld [vmem:[#allocation8 + $0x4c0] sm:$0xf0]  ;;  %v6742_v51 = vld [vmem:[#allocation8 + $0x104] sm:$0xf0] }
 0x11c   : > { %2143 = vmatpush.bf16.msra.mxu0 %v6597_v4  ;;  %v1879_v4 = vadd.f32 %v9618_v59, %v1866_v21  ;;  %v1893_v7 = vpop.f32.mrf.mxu0  ;;  %v9635_v8 = vpop.f32.mrf.mxu2  ;;  %v8533_v59 = vld [vmem:[#allocation8 + $0x178] sm:$0xf0]  ;;  %v6940_v21 = vld [vmem:[#allocation8 + $0x280] sm:$0xf]  ;;  %v7200_v56 = vld [vmem:[#allocation8 + $0x488] sm:$0xf] }
 0x11d   : > { %3458 = vmatpush.bf16.msra.mxu1 %v6741_v9  ;;  %v6640_v9 = vld [vmem:[#allocation8 + $0x28] sm:$0xf]  ;;  %v1906_v11 = vpop.f32.mrf.mxu1  ;;  %v6801_v34 = vor.u32 %v8533_v59, %v6800_v16  ;;  %v8633_v57 = vld [vmem:[#allocation8 + $0x498] sm:$0xf0]  ;;  %v6922_v61 = vld [vmem:[#allocation8 + $0x26c] sm:$0xf0]  ;;  %v6941_v2 = vor.u32 %v8568_v55, %v6940_v21 }
 0x11e   : > { %3471 = vmatpush.bf16.msra.mxu2 %v6901_v17  ;;  %v9637_v17 = vpop.f32.mrf.mxu3  ;;  %v1892_v23 = vadd.f32 %v1891_v43, %v1879_v4  ;;  %v6641_v24 = vor.u32 %v8493_v10, %v6640_v9  ;;  %v8573_v43 = vld [vmem:[#allocation8 + $0x2b8] sm:$0xf0]  ;;  %v6722_v1 = vld [vmem:[#allocation8 + $0xdc] sm:$0xf0]  ;;  %v7201_v3 = vor.u32 %v8633_v57, %v7200_v56  ;;  %v8628_v0 = vld [vmem:[#allocation8 + $0x470] sm:$0xf0] }
 0x11f   : > { %3484 = vmatpush.bf16.msra.mxu3 %v7061_v14  ;;  %v6780_v14 = vld [vmem:[#allocation8 + $0x140] sm:$0xf]  ;;  %v8556_v6 = vld [vmem:[#allocation8 + $0x234] sm:$0xf]  ;;  %v8506_v10 = vld [vmem:[#allocation8 + $0xa4] sm:$0xf] }
 0x120   : > { %2144 = vmatpush.bf16.msra.mxu0 %v6577_v20  ;;  %v6980_v20 = vld [vmem:[#allocation8 + $0x2d0] sm:$0xf]  ;;  %v2155_v38 = vmax.f32 %v1892_v23, 0.0  ;;  %v6702_v11 = vld [vmem:[#allocation8 + $0xb4] sm:$0xf0] }
 0x121   : > { %3459 = vmatpush.bf16.msra.mxu1 %v6721_v26  ;;  %v8450_v26 = vld [vmem:[#allocation5 + $0x520] sm:$0xf0]  ;;  %v7160_v16 = vld [vmem:[#allocation8 + $0x438] sm:$0xf]  ;;  %v8551_v59 = vld [vmem:[#allocation8 + $0x20c] sm:$0xf] }
 0x122   : > { %3472 = vmatpush.bf16.msra.mxu2 %v6881_v35  ;;  %v6981_v35 = vor.u32 %v8578_v22, %v6980_v20  ;;  %v6477_v36 = vor.u32 %v8450_v26, %v6476_v25  ;;  %v9641_v54 = vpack.c.bf16 %v2155_v38, %v2155_v38  ;;  %v6882_v20 = vld [vmem:[#allocation8 + $0x21c] sm:$0xf0]  ;;  %v8501_v25 = vld [vmem:[#allocation8 + $0x7c] sm:$0xf]  ;;  %v6682_v27 = vld [vmem:[#allocation8 + $0x8c] sm:$0xf0] }
 0x123   : > { %3485 = vmatpush.bf16.msra.mxu3 %v7041_v48  ;;  %v1905_v48 = vadd.f32 %v9631_v45, %v763_v32  ;;  %v6885_v13 = vor.u32 %v8551_v59, %v6882_v20  ;;  %v7140_v28 = vld [vmem:[#allocation8 + $0x410] sm:$0xf]  ;;  %v8618_v29 = vld [vmem:[#allocation8 + $0x420] sm:$0xf0]  ;;  %v6662_v38 = vld [vmem:[#allocation8 + $0x64] sm:$0xf0] }
 0x124   : > { %2145 = vmatpush.bf16.msra.mxu0 %v6557_v37  ;;  %v8528_v37 = vld [vmem:[#allocation8 + $0x150] sm:$0xf0]  ;;  %v1919_v41 = vpop.f32.mrf.mxu2  ;;  %v8546_v32 = vld [vmem:[#allocation8 + $0x1e4] sm:$0xf]  ;;  %v7100_v21 = vld [vmem:[#allocation8 + $0x3c0] sm:$0xf] }
 0x125   : > { %3460 = vmatpush.bf16.msra.mxu1 %v6701_v30  ;;  %v6960_v30 = vld [vmem:[#allocation8 + $0x2a8] sm:$0xf]  ;;  %v1918_v45 = vadd.f32 %v9635_v8, %v1905_v48  ;;  %v8613_v41 = vld [vmem:[#allocation8 + $0x3f8] sm:$0xf0]  ;;  %v8491_v48 = vld [vmem:[#allocation8 + $0x2c] sm:$0xf] }
 0x126   : > { %3473 = vmatpush.bf16.msra.mxu2 %v6861_v46  ;;  %v6781_v46 = vor.u32 %v8528_v37, %v6780_v14  ;;  %v1932_v47 = vpop.f32.mrf.mxu3  ;;  %v6961_v52 = vor.u32 %v8573_v43, %v6960_v30  ;;  %v8496_v14 = vld [vmem:[#allocation8 + $0x54] sm:$0xf]  ;;  %v7141_v37 = vor.u32 %v8618_v29, %v7140_v28  ;;  %v7120_v30 = vld [vmem:[#allocation8 + $0x3e8] sm:$0xf]  ;;  %v8541_v43 = vld [vmem:[#allocation8 + $0x1bc] sm:$0xf] }
 0x127   : > { %3486 = vmatpush.bf16.msra.mxu3 %v7021_v62  ;;  %v6745_v62 = vor.u32 %v8516_v50, %v6742_v51  ;;  %v1931_v7 = vadd.f32 %v9637_v17, %v1918_v45  ;;  %v6665_v47 = vor.u32 %v8496_v14, %v6662_v38  ;;  %v7121_v50 = vor.u32 %v8613_v41, %v7120_v30  ;;  %v6822_v55 = vld [vmem:[#allocation8 + $0x1a4] sm:$0xf0]  ;;  %v8601_v56 = vld [vmem:[#allocation8 + $0x39c] sm:$0xf]  ;;  %v7082_v57 = vld [vmem:[#allocation8 + $0x3ac] sm:$0xf0] }
 0x128   : > { %2146 = vmatpush.bf16.msra.mxu0 %v6537_v49  ;;  %v6765_v49 = vor.u32 %v8521_v15, %v6762_v40  ;;  %v8486_v45 = vld [vmem:[#allocation8 + $0x4] sm:$0xf]  ;;  %v8576_v29 = vld [vmem:[#allocation8 + $0x2d4] sm:$0xf]  ;;  %v7402_v38 = vld [vmem:[#allocation8 + $0x62c] sm:$0xf0] }
 0x129   : > { %3461 = vmatpush.bf16.msra.mxu1 %v6681_v53  ;;  %v7221_v53 = vor.u32 %v8638_v31, %v7220_v44  ;;  %v6842_v44 = vld [vmem:[#allocation8 + $0x1cc] sm:$0xf0]  ;;  %v8586_v20 = vld [vmem:[#allocation8 + $0x324] sm:$0xf]  ;;  %v8571_v30 = vld [vmem:[#allocation8 + $0x2ac] sm:$0xf] }
 0x12a   : > { %3474 = vmatpush.bf16.msra.mxu2 %v6841_v58  ;;  %v8561_v58 = vld [vmem:[#allocation8 + $0x25c] sm:$0xf]  ;;  %v6845_v51 = vor.u32 %v8541_v43, %v6842_v44  ;;  %v6962_v41 = vld [vmem:[#allocation8 + $0x2bc] sm:$0xf0]  ;;  %v7380_v43 = vld [vmem:[#allocation8 + $0x5f0] sm:$0xf] }
 0x12b   : > { %3487 = vmatpush.bf16.msra.mxu3 %v7001_v18  ;;  %v6925_v4 = vor.u32 %v8561_v58, %v6922_v61  ;;  %v8623_v18 = vld [vmem:[#allocation8 + $0x448] sm:$0xf0]  ;;  %v8678_v44 = vld [vmem:[#allocation8 + $0x600] sm:$0xf0] }
 0x12c   : > { %2147 = vmatpush.bf16.msra.mxu0 %v6517_v63  ;;  %v8511_v63 = vld [vmem:[#allocation8 + $0xcc] sm:$0xf]  ;;  %v7161_v17 = vor.u32 %v8623_v18, %v7160_v16  ;;  %v7042_v16 = vld [vmem:[#allocation8 + $0x35c] sm:$0xf0] }
 0x12d   : > { %3462 = vmatpush.bf16.msra.mxu1 %v6661_v5  ;;  %v7180_v5 = vld [vmem:[#allocation8 + $0x460] sm:$0xf]  ;;  %v6725_v9 = vor.u32 %v8511_v63, %v6722_v1 }
 0x12e   : > { %3475 = vmatpush.bf16.msra.mxu2 %v6821_v12  ;;  %v7181_v8 = vor.u32 %v8628_v0, %v7180_v5  ;;  %v8596_v5 = vld [vmem:[#allocation8 + $0x374] sm:$0xf]  ;;  %v7062_v0 = vld [vmem:[#allocation8 + $0x384] sm:$0xf0] }
 0x12f   : > { %3488 = vmatpush.bf16.msra.mxu3 %v6981_v35 }
 0x130   : > { %2148 = vmatpush.bf16.msra.mxu0 %v6497_v19 }
 0x131   : > { %3463 = vmatpush.bf16.msra.mxu1 %v6641_v24  ;;  %v6705_v24 = vor.u32 %v8506_v10, %v6702_v11  ;;  %v8526_v10 = vld [vmem:[#allocation8 + $0x144] sm:$0xf]  ;;  %v7065_v11 = vor.u32 %v8596_v5, %v7062_v0  ;;  %v7362_v5 = vld [vmem:[#allocation8 + $0x5dc] sm:$0xf0] }
 0x132   : > { %3476 = vmatpush.bf16.msra.mxu2 %v6801_v34  ;;  %v6862_v34 = vld [vmem:[#allocation8 + $0x1f4] sm:$0xf0] }
 0x133   : > { %3489 = vmatpush.bf16.msra.mxu3 %v6961_v52  ;;  %v6865_v40 = vor.u32 %v8546_v32, %v6862_v34  ;;  %v8536_v52 = vld [vmem:[#allocation8 + $0x194] sm:$0xf]  ;;  %v6982_v32 = vld [vmem:[#allocation8 + $0x2e4] sm:$0xf0]  ;;  %v7400_v34 = vld [vmem:[#allocation8 + $0x618] sm:$0xf] }
 0x134   : > { %2149 = vmatpush.bf16.msra.mxu0 %v6477_v36  ;;  %v1943_v19 = vpop.f32.mrf.mxu0  ;;  %v6685_v36 = vor.u32 %v8501_v25, %v6682_v27  ;;  %v6825_v1 = vor.u32 %v8536_v52, %v6822_v55  ;;  %v8581_v25 = vld [vmem:[#allocation8 + $0x2fc] sm:$0xf] }
 0x135   : > { %3464 = vmatpush.bf16.msra.mxu1 %v6621_v39  ;;  %v1944_v22 = vadd.f32 %v1943_v19, %v1931_v7  ;;  %v1956_v23 = vpop.f32.mrf.mxu1 }
 0x136   : > { %3477 = vmatpush.bf16.msra.mxu2 %v6781_v46 }
 0x137   : > { %2150 = vmatmul.bf16.vlgmr.msra.gmra.mxu0 %v9596_v33  ;;  %v6902_v33 = vld [vmem:[#allocation8 + $0x244] sm:$0xf0]  ;;  %3490 = vmatpush.bf16.msra.mxu3 %v6941_v2  ;;  %v1957_v26 = vadd.f32 %v1956_v23, %v1944_v22  ;;  %v8531_v2 = vld [vmem:[#allocation8 + $0x16c] sm:$0xf]  ;;  %v7022_v22 = vld [vmem:[#allocation8 + $0x334] sm:$0xf0] }
 0x138   : > { %3496 = vmatpush.bf16.msrb.mxu0 %v7241_v42  ;;  %3465 = vmatmul.bf16.vlgmr.msra.gmra.mxu1 %v9641_v54  ;;  %v6905_v12 = vor.u32 %v8556_v6, %v6902_v33  ;;  %v764_v33 = vperm.slane %v9620_v60, 2 }
 0x139   : > { %v2156_v35 = vmax.f32 %v1957_v26, 0.0 }
 0x13a   : > { %3522 = vmatpush.bf16.msrb.mxu2 %v6765_v49  ;;  %v6642_v49 = vld [vmem:[#allocation8 + $0x3c] sm:$0xf0] }
 0x13b   : > { %3535 = vmatpush.bf16.msrb.mxu3 %v6925_v4  ;;  %v9647_v15 = vpack.c.bf16 %v2156_v35, %v2156_v35  ;;  %v6645_v58 = vor.u32 %v8491_v48, %v6642_v49  ;;  %v6802_v4 = vld [vmem:[#allocation8 + $0x17c] sm:$0xf0]  ;;  %v8683_v35 = vld [vmem:[#allocation8 + $0x628] sm:$0xf0]  ;;  %v8524_v48 = vld [vmem:[#allocation8 + $0x130] sm:$0xf0] }
 0x13c   : > { %3497 = vmatpush.bf16.msrb.mxu0 %v7221_v53  ;;  %v1969_v39 = vpop.f32.mrf.mxu2  ;;  %v1945_v42 = vpop.f32.mrf.mxu0  ;;  %v8608_v53 = vld [vmem:[#allocation8 + $0x3d0] sm:$0xf0] }
 0x13d   : > { %3478 = vmatmul.bf16.vlgmr.msra.gmra.mxu2 %v9647_v15  ;;  %v1958_v31 = vpop.f32.mrf.mxu1  ;;  %v1982_v46 = vpop.f32.mrf.mxu3  ;;  %v7101_v61 = vor.u32 %v8608_v53, %v7100_v21  ;;  %v1970_v18 = vadd.f32 %v1969_v39, %v764_v33 }
 0x13e   : > { %3523 = vmatpush.bf16.msrb.mxu2 %v6745_v62  ;;  %v6622_v62 = vld [vmem:[#allocation8 + $0x14] sm:$0xf0]  ;;  %v8676_v31 = vld [vmem:[#allocation8 + $0x5f4] sm:$0xf] }
 0x13f   : > { %3536 = vmatpush.bf16.msrb.mxu3 %v6905_v12  ;;  %v6625_v7 = vor.u32 %v8486_v45, %v6622_v62  ;;  %v8591_v12 = vld [vmem:[#allocation8 + $0x34c] sm:$0xf]  ;;  %v1983_v23 = vadd.f32 %v1982_v46, %v1970_v18  ;;  %v7360_v45 = vld [vmem:[#allocation8 + $0x5c8] sm:$0xf]  ;;  %v8673_v62 = vld [vmem:[#allocation8 + $0x5d8] sm:$0xf0] }
 0x140   : > { %3498 = vmatpush.bf16.msrb.mxu0 %v7201_v3  ;;  %v7085_v3 = vor.u32 %v8601_v56, %v7082_v57  ;;  %v7045_v59 = vor.u32 %v8591_v12, %v7042_v16  ;;  %v6965_v56 = vor.u32 %v8571_v30, %v6962_v41  ;;  %v8566_v57 = vld [vmem:[#allocation8 + $0x284] sm:$0xf]  ;;  %v7342_v18 = vld [vmem:[#allocation8 + $0x5b4] sm:$0xf0]  ;;  %v7280_v41 = vld [vmem:[#allocation8 + $0x528] sm:$0xf] }
 0x141   : > { %v8514_v12 = vld [vmem:[#allocation8 + $0xe0] sm:$0xf0] }
 0x142   : > { %3524 = vmatpush.bf16.msrb.mxu2 %v6725_v9  ;;  %v6805_v9 = vor.u32 %v8531_v2, %v6802_v4  ;;  %v6748_v2 = vld [vmem:[#allocation8 + $0xf8] sm:$0xf]  ;;  %v7361_v4 = vor.u32 %v8673_v62, %v7360_v45  ;;  %v8641_v62 = vld [vmem:[#allocation8 + $0x4dc] sm:$0xf] }
 0x143   : > { %3537 = vmatpush.bf16.msrb.mxu3 %v6885_v13 }
 0x144   : > { %3499 = vmatpush.bf16.msrb.mxu0 %v7181_v8  ;;  %v1971_v63 = vpop.f32.mrf.mxu2  ;;  %v6782_v8 = vld [vmem:[#allocation8 + $0x154] sm:$0xf0] }
 0x145   : > { %v1984_v6 = vpop.f32.mrf.mxu3  ;;  %v6785_v19 = vor.u32 %v8526_v10, %v6782_v8  ;;  %v8671_v63 = vld [vmem:[#allocation8 + $0x5cc] sm:$0xf]  ;;  %v8668_v10 = vld [vmem:[#allocation8 + $0x5b0] sm:$0xf0]  ;;  %v6728_v8 = vld [vmem:[#allocation8 + $0xd0] sm:$0xf] }
 0x146   : > { %3525 = vmatpush.bf16.msrb.mxu2 %v6705_v24  ;;  %v7025_v24 = vor.u32 %v8586_v20, %v7022_v22  ;;  %v7365_v0 = vor.u32 %v8671_v63, %v7362_v5  ;;  %v6729_v20 = vor.u32 %v8514_v12, %v6728_v8  ;;  %v7320_v22 = vld [vmem:[#allocation8 + $0x578] sm:$0xf]  ;;  %v7242_v63 = vld [vmem:[#allocation8 + $0x4ec] sm:$0xf0]  ;;  %v7408_v12 = vld [vmem:[#allocation8 + $0x620] sm:$0xf] }
 0x147   : > { %3538 = vmatpush.bf16.msrb.mxu3 %v6865_v40  ;;  %v6985_v40 = vor.u32 %v8576_v29, %v6982_v32  ;;  %v7300_v32 = vld [vmem:[#allocation8 + $0x550] sm:$0xf] }
 0x148   : > { %3500 = vmatpush.bf16.msrb.mxu0 %v7161_v17  ;;  %v7002_v17 = vld [vmem:[#allocation8 + $0x30c] sm:$0xf0] }
 0x149   : > { %v7005_v28 = vor.u32 %v8581_v25, %v7002_v17  ;;  %v6708_v25 = vld [vmem:[#allocation8 + $0xa8] sm:$0xf]  ;;  %v8509_v17 = vld [vmem:[#allocation8 + $0xb8] sm:$0xf0] }
 0x14a   : > { %3526 = vmatpush.bf16.msrb.mxu2 %v6685_v36  ;;  %v8681_v36 = vld [vmem:[#allocation8 + $0x61c] sm:$0xf]  ;;  %v6709_v29 = vor.u32 %v8509_v17, %v6708_v25  ;;  %v6928_v17 = vld [vmem:[#allocation8 + $0x260] sm:$0xf] }
 0x14b   : > { %3539 = vmatpush.bf16.msrb.mxu3 %v6845_v51  ;;  %v7405_v39 = vor.u32 %v8681_v36, %v7402_v38  ;;  %v7382_v51 = vld [vmem:[#allocation8 + $0x604] sm:$0xf0]  ;;  %v6688_v36 = vld [vmem:[#allocation8 + $0x80] sm:$0xf] }
 0x14c   : > { %3501 = vmatpush.bf16.msrb.mxu0 %v7141_v37  ;;  %v7401_v37 = vor.u32 %v8683_v35, %v7400_v34  ;;  %v7385_v52 = vor.u32 %v8676_v31, %v7382_v51  ;;  %v8658_v34 = vld [vmem:[#allocation8 + $0x560] sm:$0xf0]  ;;  %v8656_v35 = vld [vmem:[#allocation8 + $0x554] sm:$0xf]  ;;  %v7302_v38 = vld [vmem:[#allocation8 + $0x564] sm:$0xf0] }
 0x14e   : > { %3527 = vmatpush.bf16.msrb.mxu2 %v6665_v47  ;;  %3509 = vmatpush.bf16.msrb.mxu1 %v7401_v37  ;;  %v6768_v47 = vld [vmem:[#allocation8 + $0x120] sm:$0xf]  ;;  %v7301_v37 = vor.u32 %v8658_v34, %v7300_v32  ;;  %v7208_v32 = vld [vmem:[#allocation8 + $0x490] sm:$0xf] }
 0x14f   : > { %3540 = vmatpush.bf16.msrb.mxu3 %v6825_v1 }
 0x150   : > { %3502 = vmatpush.bf16.msrb.mxu0 %v7121_v50  ;;  %v7381_v50 = vor.u32 %v8678_v44, %v7380_v43  ;;  %v8651_v43 = vld [vmem:[#allocation8 + $0x52c] sm:$0xf] }
 0x151   : > { %v8499_v44 = vld [vmem:[#allocation8 + $0x68] sm:$0xf0] }
 0x152   : > { %3528 = vmatpush.bf16.msrb.mxu2 %v6645_v58  ;;  %3510 = vmatpush.bf16.msrb.mxu1 %v7381_v50  ;;  %v6942_v58 = vld [vmem:[#allocation8 + $0x294] sm:$0xf0] }
 0x153   : > { %3541 = vmatpush.bf16.msrb.mxu3 %v6805_v9  ;;  %v6945_v6 = vor.u32 %v8566_v57, %v6942_v58  ;;  %v7340_v9 = vld [vmem:[#allocation8 + $0x5a0] sm:$0xf]  ;;  %v7262_v58 = vld [vmem:[#allocation8 + $0x514] sm:$0xf0] }
 0x154   : > { %3503 = vmatpush.bf16.msrb.mxu0 %v7101_v61  ;;  %v1995_v26 = vpop.f32.mrf.mxu0  ;;  %v6769_v61 = vor.u32 %v8524_v48, %v6768_v47  ;;  %v7341_v16 = vor.u32 %v8668_v10, %v7340_v9  ;;  %v8636_v9 = vld [vmem:[#allocation8 + $0x4b4] sm:$0xf]  ;;  %v7222_v10 = vld [vmem:[#allocation8 + $0x4c4] sm:$0xf0] }
 0x155   : > { %v1996_v27 = vadd.f32 %v1995_v26, %v1983_v23  ;;  %v2008_v13 = vpop.f32.mrf.mxu1  ;;  %v8663_v23 = vld [vmem:[#allocation8 + $0x588] sm:$0xf0] }
 0x156   : > { %3529 = vmatpush.bf16.msrb.mxu2 %v6625_v7  ;;  %3511 = vmatpush.bf16.msrb.mxu1 %v7361_v4  ;;  %v7321_v26 = vor.u32 %v8663_v23, %v7320_v22  ;;  %v8644_v4 = vld [vmem:[#allocation8 + $0x4f0] sm:$0xf0] }
 0x157   : > { %3542 = vmatpush.bf16.msrb.mxu3 %v6785_v19  ;;  %v2009_v14 = vadd.f32 %v2008_v13, %v1996_v27  ;;  %v7322_v27 = vld [vmem:[#allocation8 + $0x58c] sm:$0xf0] }
 0x158   : > { %3548 = vmatpush.bf16.msra.mxu0 %v7085_v3  ;;  %v8519_v3 = vld [vmem:[#allocation8 + $0x108] sm:$0xf0] }
 0x159   : > { %3530 = vmatmul.bf16.vlgmr.msrb.gmra.mxu2 %v9641_v54  ;;  %v6749_v33 = vor.u32 %v8519_v3, %v6748_v2  ;;  %v7245_v2 = vor.u32 %v8641_v62, %v7242_v63  ;;  %v7248_v3 = vld [vmem:[#allocation8 + $0x4e0] sm:$0xf]  ;;  %v8624_v62 = vld [vmem:[#allocation8 + $0x450] sm:$0xf0] }
 0x15a   : > { %3574 = vmatpush.bf16.msra.mxu2 %v7405_v39  ;;  %3512 = vmatpush.bf16.msrb.mxu1 %v7341_v16  ;;  %v7305_v39 = vor.u32 %v8656_v35, %v7302_v38  ;;  %v8684_v16 = vld [vmem:[#allocation8 + $0x630] sm:$0xf0]  ;;  %v8679_v35 = vld [vmem:[#allocation8 + $0x608] sm:$0xf0] }
 0x15c   : > { %3549 = vmatpush.bf16.msra.mxu0 %v7065_v11  ;;  %v2021_v42 = vpop.f32.mrf.mxu2  ;;  %v1997_v49 = vpop.f32.mrf.mxu0  ;;  %v8666_v11 = vld [vmem:[#allocation8 + $0x5a4] sm:$0xf] }
 0x15d   : > { %v2022_v46 = vadd.f32 %v2021_v42, %v2009_v14  ;;  %v2034_v53 = vpop.f32.mrf.mxu3  ;;  %v2010_v55 = vpop.f32.mrf.mxu1  ;;  %v7345_v19 = vor.u32 %v8666_v11, %v7342_v18  ;;  %v8504_v14 = vld [vmem:[#allocation8 + $0x90] sm:$0xf0]  ;;  %v8653_v42 = vld [vmem:[#allocation8 + $0x538] sm:$0xf0]  ;;  %v7228_v11 = vld [vmem:[#allocation8 + $0x4b8] sm:$0xf] }
 0x15e   : > { %3575 = vmatpush.bf16.msra.mxu2 %v7385_v52  ;;  %3513 = vmatpush.bf16.msrb.mxu1 %v7321_v26  ;;  %v6689_v30 = vor.u32 %v8504_v14, %v6688_v36  ;;  %v7281_v31 = vor.u32 %v8653_v42, %v7280_v41  ;;  %v7260_v52 = vld [vmem:[#allocation8 + $0x500] sm:$0xf]  ;;  %v6648_v55 = vld [vmem:[#allocation8 + $0x30] sm:$0xf]  ;;  %v8564_v26 = vld [vmem:[#allocation8 + $0x270] sm:$0xf0] }
 0x15f   : > { %v2157_v21 = vmax.f32 %v2022_v46, 0.0  ;;  %v7282_v46 = vld [vmem:[#allocation8 + $0x53c] sm:$0xf0]  ;;  %v8634_v14 = vld [vmem:[#allocation8 + $0x4a0] sm:$0xf0] }
 0x160   : > { %3550 = vmatpush.bf16.msra.mxu0 %v7045_v59  ;;  %v7285_v48 = vor.u32 %v8651_v43, %v7282_v46  ;;  %v7209_v38 = vor.u32 %v8634_v14, %v7208_v32  ;;  %v8626_v43 = vld [vmem:[#allocation8 + $0x464] sm:$0xf]  ;;  %v7288_v14 = vld [vmem:[#allocation8 + $0x530] sm:$0xf] }
 0x161   : > { %v9652_v1 = vpack.c.bf16 %v2157_v21, %v2157_v21  ;;  %v8648_v21 = vld [vmem:[#allocation8 + $0x510] sm:$0xf0]  ;;  %v8674_v46 = vld [vmem:[#allocation8 + $0x5e0] sm:$0xf0] }
 0x162   : > { %3576 = vmatpush.bf16.msra.mxu2 %v7365_v0  ;;  %3514 = vmatpush.bf16.msrb.mxu1 %v7301_v37  ;;  %v7261_v57 = vor.u32 %v8648_v21, %v7260_v52  ;;  %v6628_v0 = vld [vmem:[#allocation8 + $0x8] sm:$0xf]  ;;  %v6929_v37 = vor.u32 %v8564_v26, %v6928_v17  ;;  %v6888_v52 = vld [vmem:[#allocation8 + $0x210] sm:$0xf]  ;;  %v8554_v21 = vld [vmem:[#allocation8 + $0x220] sm:$0xf0] }
 0x163   : > { %3491 = vmatmul.bf16.vlgmr.msra.gmra.mxu3 %v9652_v1  ;;  %v6889_v63 = vor.u32 %v8554_v21, %v6888_v52  ;;  %v8614_v17 = vld [vmem:[#allocation8 + $0x400] sm:$0xf0]  ;;  %v8529_v52 = vld [vmem:[#allocation8 + $0x158] sm:$0xf0] }
 0x164   : > { %3551 = vmatpush.bf16.msra.mxu0 %v7025_v24  ;;  %3587 = vmatpush.bf16.msra.mxu3 %v6769_v61  ;;  %v2023_v7 = vpop.f32.mrf.mxu2  ;;  %v8661_v24 = vld [vmem:[#allocation8 + $0x57c] sm:$0xf] }
 0x165   : > { %v2036_v59 = vpop.f32.mrf.mxu3  ;;  %v7325_v13 = vor.u32 %v8661_v24, %v7322_v27  ;;  %v7388_v27 = vld [vmem:[#allocation8 + $0x5f8] sm:$0xf] }
 0x166   : > { %3577 = vmatpush.bf16.msra.mxu2 %v7345_v19  ;;  %3515 = vmatpush.bf16.msrb.mxu1 %v7281_v31  ;;  %v7225_v19 = vor.u32 %v8636_v9, %v7222_v10  ;;  %v8639_v59 = vld [vmem:[#allocation8 + $0x4c8] sm:$0xf0]  ;;  %v7389_v41 = vor.u32 %v8679_v35, %v7388_v27  ;;  %v7368_v31 = vld [vmem:[#allocation8 + $0x5d0] sm:$0xf]  ;;  %v8664_v9 = vld [vmem:[#allocation8 + $0x590] sm:$0xf0] }
 0x167   : > { %v7229_v23 = vor.u32 %v8639_v59, %v7228_v11  ;;  %v8619_v11 = vld [vmem:[#allocation8 + $0x428] sm:$0xf0]  ;;  %v7308_v59 = vld [vmem:[#allocation8 + $0x558] sm:$0xf] }
 0x168   : > { %3552 = vmatpush.bf16.msra.mxu0 %v7005_v28  ;;  %3588 = vmatpush.bf16.msra.mxu3 %v6749_v33  ;;  %v765_v28 = vperm.slane %v9620_v60, 3  ;;  %v6668_v60 = vld [vmem:[#allocation8 + $0x58] sm:$0xf]  ;;  %v7249_v33 = vor.u32 %v8644_v4, %v7248_v3  ;;  %v6868_v3 = vld [vmem:[#allocation8 + $0x1e8] sm:$0xf] }
 0x169   : > { %v6669_v51 = vor.u32 %v8499_v44, %v6668_v60  ;;  %v7182_v60 = vld [vmem:[#allocation8 + $0x474] sm:$0xf0]  ;;  %v7188_v44 = vld [vmem:[#allocation8 + $0x468] sm:$0xf]  ;;  %v8549_v4 = vld [vmem:[#allocation8 + $0x1f8] sm:$0xf0] }
 0x16a   : > { %3578 = vmatpush.bf16.msra.mxu2 %v7325_v13  ;;  %3516 = vmatpush.bf16.msrb.mxu1 %v7261_v57  ;;  %v7409_v13 = vor.u32 %v8684_v16, %v7408_v12  ;;  %v7168_v57 = vld [vmem:[#allocation8 + $0x440] sm:$0xf]  ;;  %v7102_v35 = vld [vmem:[#allocation8 + $0x3d4] sm:$0xf0] }
 0x16b   : > { %v6848_v16 = vld [vmem:[#allocation8 + $0x1c0] sm:$0xf] }
 0x16c   : > { %3553 = vmatpush.bf16.msra.mxu0 %v6985_v40  ;;  %3589 = vmatpush.bf16.msra.mxu3 %v6729_v20  ;;  %v2035_v40 = vadd.f32 %v2034_v53, %v765_v28  ;;  %v8646_v53 = vld [vmem:[#allocation8 + $0x504] sm:$0xf]  ;;  %v8631_v28 = vld [vmem:[#allocation8 + $0x48c] sm:$0xf] }
 0x16d   : > { %v7265_v45 = vor.u32 %v8646_v53, %v7262_v58  ;;  %v7369_v53 = vor.u32 %v8674_v46, %v7368_v31  ;;  %v7348_v58 = vld [vmem:[#allocation8 + $0x5a8] sm:$0xf]  ;;  %v8649_v46 = vld [vmem:[#allocation8 + $0x518] sm:$0xf0] }
 0x16e   : > { %3579 = vmatpush.bf16.msra.mxu2 %v7305_v39  ;;  %3561 = vmatpush.bf16.msra.mxu1 %v7245_v2  ;;  %v7169_v2 = vor.u32 %v8624_v62, %v7168_v57  ;;  %v7268_v31 = vld [vmem:[#allocation8 + $0x508] sm:$0xf]  ;;  %v8637_v62 = vld [vmem:[#allocation8 + $0x4bc] sm:$0xf] }
 0x16f   : > { %v7269_v21 = vor.u32 %v8649_v46, %v7268_v31  ;;  %v7090_v31 = vld [vmem:[#allocation8 + $0x3b4] sm:$0xf0] }
 0x170   : > { %3554 = vmatpush.bf16.msra.mxu0 %v6965_v56  ;;  %3590 = vmatpush.bf16.msra.mxu3 %v6709_v29  ;;  %v8494_v56 = vld [vmem:[#allocation8 + $0x40] sm:$0xf0]  ;;  %v7202_v29 = vld [vmem:[#allocation8 + $0x49c] sm:$0xf0] }
 0x171   : > { %v6649_v5 = vor.u32 %v8494_v56, %v6648_v55  ;;  %v7205_v36 = vor.u32 %v8631_v28, %v7202_v29  ;;  %v8621_v55 = vld [vmem:[#allocation8 + $0x43c] sm:$0xf]  ;;  %v7162_v56 = vld [vmem:[#allocation8 + $0x44c] sm:$0xf0]  ;;  %v6828_v28 = vld [vmem:[#allocation8 + $0x198] sm:$0xf] }
 0x172   : > { %3580 = vmatpush.bf16.msra.mxu2 %v7285_v48  ;;  %3562 = vmatpush.bf16.msra.mxu1 %v7225_v19  ;;  %v8629_v48 = vld [vmem:[#allocation8 + $0x478] sm:$0xf0]  ;;  %v8539_v29 = vld [vmem:[#allocation8 + $0x1a8] sm:$0xf0] }
 0x173   : > { %3543 = vmatmul.bf16.vlgmr.msrb.gmra.mxu3 %v9647_v15 }
 0x174   : > { %3555 = vmatpush.bf16.msra.mxu0 %v6945_v6  ;;  %v2047_v47 = vpop.f32.mrf.mxu0  ;;  %3591 = vmatpush.bf16.msra.mxu3 %v6689_v30  ;;  %v8489_v6 = vld [vmem:[#allocation8 + $0x18] sm:$0xf0]  ;;  %v8559_v30 = vld [vmem:[#allocation8 + $0x248] sm:$0xf0] }
 0x175   : > { %v2048_v49 = vadd.f32 %v2047_v47, %v2035_v40  ;;  %v2060_v50 = vpop.f32.mrf.mxu1  ;;  %v6629_v25 = vor.u32 %v8489_v6, %v6628_v0  ;;  %v6908_v40 = vld [vmem:[#allocation8 + $0x238] sm:$0xf]  ;;  %v7185_v47 = vor.u32 %v8626_v43, %v7182_v60  ;;  %v8616_v0 = vld [vmem:[#allocation8 + $0x414] sm:$0xf]  ;;  %v7142_v6 = vld [vmem:[#allocation8 + $0x424] sm:$0xf0] }
 0x176   : > { %3581 = vmatpush.bf16.msra.mxu2 %v7265_v45  ;;  %3563 = vmatpush.bf16.msra.mxu1 %v7205_v36  ;;  %v7165_v45 = vor.u32 %v8621_v55, %v7162_v56  ;;  %v7145_v10 = vor.u32 %v8616_v0, %v7142_v6  ;;  %v7108_v36 = vld [vmem:[#allocation8 + $0x3c8] sm:$0xf]  ;;  %v6808_v43 = vld [vmem:[#allocation8 + $0x170] sm:$0xf]  ;;  %v8534_v60 = vld [vmem:[#allocation8 + $0x180] sm:$0xf0] }
 0x177   : > { %v2061_v61 = vadd.f32 %v2060_v50, %v2048_v49  ;;  %v6909_v49 = vor.u32 %v8559_v30, %v6908_v40  ;;  %v8609_v30 = vld [vmem:[#allocation8 + $0x3d8] sm:$0xf0]  ;;  %v6770_v55 = vld [vmem:[#allocation8 + $0x134] sm:$0xf0]  ;;  %v6750_v0 = vld [vmem:[#allocation8 + $0x10c] sm:$0xf0] }
 0x178   : > { %3592 = vmatpush.bf16.msra.mxu3 %v6669_v51  ;;  %v7189_v51 = vor.u32 %v8629_v48, %v7188_v44  ;;  %v8642_v48 = vld [vmem:[#allocation8 + $0x4e4] sm:$0xf] }
 0x17a   : > { %3626 = vmatpush.bf16.msrb.mxu2 %v7249_v33  ;;  %3564 = vmatpush.bf16.msra.mxu1 %v7185_v47  ;;  %v7148_v33 = vld [vmem:[#allocation8 + $0x418] sm:$0xf]  ;;  %v6809_v47 = vor.u32 %v8534_v60, %v6808_v43  ;;  %v7088_v43 = vld [vmem:[#allocation8 + $0x3a0] sm:$0xf]  ;;  %v8604_v60 = vld [vmem:[#allocation8 + $0x3b0] sm:$0xf0] }
 0x17b   : > { %v7149_v12 = vor.u32 %v8619_v11, %v7148_v33  ;;  %v8632_v33 = vld [vmem:[#allocation8 + $0x494] sm:$0xf] }
 0x17c   : > { %v2073_v7 = vpop.f32.mrf.mxu2  ;;  %v2049_v18 = vpop.f32.mrf.mxu0  ;;  %3593 = vmatpush.bf16.msra.mxu3 %v6649_v5  ;;  %v8512_v11 = vld [vmem:[#allocation8 + $0xd4] sm:$0xf] }
 0x17d   : > { %v2074_v8 = vadd.f32 %v2073_v7, %v2061_v61  ;;  %v2086_v20 = vpop.f32.mrf.mxu3  ;;  %v2062_v22 = vpop.f32.mrf.mxu1  ;;  %v8669_v61 = vld [vmem:[#allocation8 + $0x5b8] sm:$0xf0]  ;;  %v7328_v7 = vld [vmem:[#allocation8 + $0x580] sm:$0xf]  ;;  %v8544_v18 = vld [vmem:[#allocation8 + $0x1d0] sm:$0xf0] }
 0x17e   : > { %3627 = vmatpush.bf16.msrb.mxu2 %v7229_v23  ;;  %v7349_v5 = vor.u32 %v8669_v61, %v7348_v58  ;;  %3565 = vmatpush.bf16.msra.mxu1 %v7165_v45  ;;  %v7329_v19 = vor.u32 %v8664_v9, %v7328_v7  ;;  %v7122_v22 = vld [vmem:[#allocation8 + $0x3fc] sm:$0xf0]  ;;  %v8659_v23 = vld [vmem:[#allocation8 + $0x568] sm:$0xf0]  ;;  %v6849_v26 = vor.u32 %v8544_v18, %v6848_v16  ;;  %v7210_v7 = vld [vmem:[#allocation8 + $0x4a4] sm:$0xf0] }
 0x17f   : > { %v2087_v24 = vadd.f32 %v2086_v20, %v2074_v8  ;;  %v6869_v8 = vor.u32 %v8549_v4, %v6868_v3  ;;  %v8611_v20 = vld [vmem:[#allocation8 + $0x3ec] sm:$0xf]  ;;  %v7309_v32 = vor.u32 %v8659_v23, %v7308_v59  ;;  %v7213_v16 = vor.u32 %v8632_v33, %v7210_v7  ;;  %v7190_v59 = vld [vmem:[#allocation8 + $0x47c] sm:$0xf0]  ;;  %v7048_v33 = vld [vmem:[#allocation8 + $0x350] sm:$0xf] }
 0x180   : > { %3594 = vmatpush.bf16.msra.mxu3 %v6629_v25  ;;  %v7128_v25 = vld [vmem:[#allocation8 + $0x3f0] sm:$0xf]  ;;  %v8507_v23 = vld [vmem:[#allocation8 + $0xac] sm:$0xf] }
 0x181   : > { %v2158_v34 = vmax.f32 %v2087_v24, 0.0  ;;  %v7125_v24 = vor.u32 %v8611_v20, %v7122_v22  ;;  %v7129_v27 = vor.u32 %v8614_v17, %v7128_v25  ;;  %v8622_v17 = vld [vmem:[#allocation8 + $0x444] sm:$0xf] }
 0x182   : > { %3628 = vmatpush.bf16.msrb.mxu2 %v7209_v38  ;;  %3566 = vmatpush.bf16.msra.mxu1 %v7145_v10 }
 0x183   : > { %v9657_v39 = vpack.c.bf16 %v2158_v34, %v2158_v34  ;;  %3595 = vmatmul.bf16.vlgmr.msra.gmra.mxu3 %v9641_v54  ;;  %v8606_v34 = vld [vmem:[#allocation8 + $0x3c4] sm:$0xf] }
 0x184   : > { %3639 = vmatpush.bf16.msrb.mxu3 %v7409_v13  ;;  %v2075_v42 = vpop.f32.mrf.mxu2  ;;  %v7105_v40 = vor.u32 %v8606_v34, %v7102_v35  ;;  %v8617_v34 = vld [vmem:[#allocation8 + $0x41c] sm:$0xf]  ;;  %v7150_v35 = vld [vmem:[#allocation8 + $0x42c] sm:$0xf0] }
 0x185   : > { %3504 = vmatmul.bf16.vlgmr.msrb.gmra.mxu0 %v9657_v39  ;;  %v2088_v50 = vpop.f32.mrf.mxu3  ;;  %v7109_v42 = vor.u32 %v8609_v30, %v7108_v36 }
 0x186   : > { %3600 = vmatpush.bf16.msrb.mxu0 %v6929_v37  ;;  %3629 = vmatpush.bf16.msrb.mxu2 %v7189_v51  ;;  %v8654_v37 = vld [vmem:[#allocation8 + $0x540] sm:$0xf0]  ;;  %v6788_v51 = vld [vmem:[#allocation8 + $0x148] sm:$0xf] }
 0x187   : > { %3567 = vmatpush.bf16.msra.mxu1 %v7125_v24  ;;  %v7289_v44 = vor.u32 %v8654_v37, %v7288_v14  ;;  %v6789_v45 = vor.u32 %v8529_v52, %v6788_v51  ;;  %v6710_v24 = vld [vmem:[#allocation8 + $0xbc] sm:$0xf0]  ;;  %v8492_v51 = vld [vmem:[#allocation8 + $0x34] sm:$0xf]  ;;  %v6650_v52 = vld [vmem:[#allocation8 + $0x44] sm:$0xf0] }
 0x188   : > { %3640 = vmatpush.bf16.msrb.mxu3 %v7389_v41  ;;  %v6829_v41 = vor.u32 %v8539_v29, %v6828_v28  ;;  %v8502_v28 = vld [vmem:[#allocation8 + $0x84] sm:$0xf]  ;;  %v6690_v29 = vld [vmem:[#allocation8 + $0x94] sm:$0xf0] }
 0x189   : > { %v6693_v14 = vor.u32 %v8502_v28, %v6690_v29  ;;  %v8587_v28 = vld [vmem:[#allocation8 + $0x32c] sm:$0xf]  ;;  %v7030_v29 = vld [vmem:[#allocation8 + $0x33c] sm:$0xf0] }
 0x18a   : > { %3601 = vmatpush.bf16.msrb.mxu0 %v6909_v49  ;;  %3630 = vmatpush.bf16.msrb.mxu2 %v7169_v2  ;;  %v7250_v49 = vld [vmem:[#allocation8 + $0x4f4] sm:$0xf0] }
 0x18b   : > { %3568 = vmatpush.bf16.msra.mxu1 %v7105_v40  ;;  %v7253_v57 = vor.u32 %v8642_v48, %v7250_v49  ;;  %v9029_v2 = vld [vmem:[#allocation7] sm:$0x1f]  ;;  %v6670_v40 = vld [vmem:[#allocation8 + $0x6c] sm:$0xf0]  ;;  %v8612_v48 = vld [vmem:[#allocation8 + $0x3f4] sm:$0xf] }
 0x18c   : > { %3641 = vmatpush.bf16.msrb.mxu3 %v7369_v53  ;;  %v8522_v53 = vld [vmem:[#allocation8 + $0x124] sm:$0xf]  ;;  %v766_v3 = vperm.slane %v9029_v2, 4  ;;  %v7130_v49 = vld [vmem:[#allocation8 + $0x404] sm:$0xf0] }
 0x18d   : > { %v6773_v4 = vor.u32 %v8522_v53, %v6770_v55  ;;  %v7068_v55 = vld [vmem:[#allocation8 + $0x378] sm:$0xf]  ;;  %v7096_v2 = vld [vmem:[#allocation8 + $0x3a8] sm:$0xf] }
 0x18e   : > { %3602 = vmatpush.bf16.msrb.mxu0 %v6889_v63  ;;  %3631 = vmatpush.bf16.msrb.mxu2 %v7149_v12  ;;  %v7230_v63 = vld [vmem:[#allocation8 + $0x4cc] sm:$0xf0] }
 0x18f   : > { %v7233_v6 = vor.u32 %v8637_v62, %v7230_v63  ;;  %v6653_v62 = vor.u32 %v8492_v51, %v6650_v52  ;;  %v7110_v63 = vld [vmem:[#allocation8 + $0x3dc] sm:$0xf0]  ;;  %v6988_v51 = vld [vmem:[#allocation8 + $0x2d8] sm:$0xf]  ;;  %v8579_v52 = vld [vmem:[#allocation8 + $0x2e8] sm:$0xf0] }
 0x190   : > { %3642 = vmatpush.bf16.msrb.mxu3 %v7349_v5  ;;  %v8517_v5 = vld [vmem:[#allocation8 + $0xfc] sm:$0xf] }
 0x191   : > { %v6753_v10 = vor.u32 %v8517_v5, %v6750_v0  ;;  %v8487_v0 = vld [vmem:[#allocation8 + $0xc] sm:$0xf] }
 0x192   : > { %3603 = vmatpush.bf16.msrb.mxu0 %v6869_v8  ;;  %3632 = vmatpush.bf16.msrb.mxu2 %v7129_v27  ;;  %v6730_v8 = vld [vmem:[#allocation8 + $0xe4] sm:$0xf0] }
 0x193   : > { %v6733_v22 = vor.u32 %v8512_v11, %v6730_v8  ;;  %v8682_v11 = vld [vmem:[#allocation8 + $0x624] sm:$0xf]  ;;  %v7410_v8 = vld [vmem:[#allocation8 + $0x634] sm:$0xf0] }
 0x194   : > { %v2099_v13 = vpop.f32.mrf.mxu0  ;;  %3643 = vmatpush.bf16.msrb.mxu3 %v7329_v19  ;;  %v8627_v19 = vld [vmem:[#allocation8 + $0x46c] sm:$0xf] }
 0x195   : > { %3556 = vmatmul.bf16.vlgmr.msra.gmra.mxu0 %v9652_v1  ;;  %v2112_v38 = vpop.f32.mrf.mxu1  ;;  %v2100_v9 = vadd.f32 %v2099_v13, %v766_v3  ;;  %v7193_v25 = vor.u32 %v8627_v19, %v7190_v59  ;;  %v6713_v13 = vor.u32 %v8507_v23, %v6710_v24  ;;  %v8605_v3 = vld [vmem:[#allocation8 + $0x3b8] sm:$0xf0]  ;;  %v7076_v23 = vld [vmem:[#allocation8 + $0x380] sm:$0xf]  ;;  %v8600_v24 = vld [vmem:[#allocation8 + $0x390] sm:$0xf0] }
 0x196   : > { %3604 = vmatpush.bf16.msrb.mxu0 %v6849_v26  ;;  %3633 = vmatpush.bf16.msrb.mxu2 %v7109_v42  ;;  %v7170_v26 = vld [vmem:[#allocation8 + $0x454] sm:$0xf0]  ;;  %v7153_v42 = vor.u32 %v8617_v34, %v7150_v35  ;;  %v7097_v19 = vor.u32 %v8605_v3, %v7096_v2  ;;  %v7077_v34 = vor.u32 %v8600_v24, %v7076_v23  ;;  %v7016_v3 = vld [vmem:[#allocation8 + $0x308] sm:$0xf]  ;;  %v8657_v24 = vld [vmem:[#allocation8 + $0x55c] sm:$0xf] }
 0x197   : > { %v2113_v20 = vadd.f32 %v2112_v38, %v2100_v9  ;;  %v8497_v38 = vld [vmem:[#allocation8 + $0x5c] sm:$0xf]  ;;  %v6989_v2 = vor.u32 %v8579_v52, %v6988_v51  ;;  %v8647_v52 = vld [vmem:[#allocation8 + $0x50c] sm:$0xf] }
 0x198   : > { %3644 = vmatpush.bf16.msrb.mxu3 %v7309_v32  ;;  %v7173_v32 = vor.u32 %v8622_v17, %v7170_v26  ;;  %v8589_v26 = vld [vmem:[#allocation8 + $0x338] sm:$0xf0] }
 0x19a   : > { %3605 = vmatpush.bf16.msrb.mxu0 %v6829_v41 }
 0x19c   : > { %v2101_v50 = vpop.f32.mrf.mxu0  ;;  %3645 = vmatpush.bf16.msrb.mxu3 %v7289_v44  ;;  %v2125_v56 = vpop.f32.mrf.mxu2  ;;  %v8602_v44 = vld [vmem:[#allocation8 + $0x3a4] sm:$0xf] }
 0x19d   : > { %v2138_v58 = vpop.f32.mrf.mxu3  ;;  %v2114_v61 = vpop.f32.mrf.mxu1  ;;  %v2126_v27 = vadd.f32 %v2125_v56, %v2113_v20  ;;  %v7089_v50 = vor.u32 %v8604_v60, %v7088_v43  ;;  %v7093_v53 = vor.u32 %v8602_v44, %v7090_v31  ;;  %v8599_v56 = vld [vmem:[#allocation8 + $0x388] sm:$0xf0]  ;;  %v8582_v43 = vld [vmem:[#allocation8 + $0x304] sm:$0xf]  ;;  %v7010_v60 = vld [vmem:[#allocation8 + $0x314] sm:$0xf0] }
 0x19e   : > { %3606 = vmatpush.bf16.msrb.mxu0 %v6809_v47  ;;  %v6673_v47 = vor.u32 %v8497_v38, %v6670_v40  ;;  %v7070_v61 = vld [vmem:[#allocation8 + $0x38c] sm:$0xf0]  ;;  %v7069_v5 = vor.u32 %v8599_v56, %v7068_v55  ;;  %v7033_v38 = vor.u32 %v8587_v28, %v7030_v29  ;;  %v7008_v40 = vld [vmem:[#allocation8 + $0x300] sm:$0xf]  ;;  %v8672_v31 = vld [vmem:[#allocation8 + $0x5d4] sm:$0xf] }
 0x19f   : > { %v2139_v36 = vadd.f32 %v2138_v58, %v2126_v27  ;;  %v8597_v58 = vld [vmem:[#allocation8 + $0x37c] sm:$0xf]  ;;  %v6936_v28 = vld [vmem:[#allocation8 + $0x268] sm:$0xf] }
 0x1a0   : > { %3646 = vmatpush.bf16.msrb.mxu3 %v7269_v21  ;;  %v7073_v9 = vor.u32 %v8597_v58, %v7070_v61  ;;  %v8677_v27 = vld [vmem:[#allocation8 + $0x5fc] sm:$0xf] }
 0x1a1   : > { %v8577_v56 = vld [vmem:[#allocation8 + $0x2dc] sm:$0xf] }
 0x1a2   : > { %3607 = vmatpush.bf16.msrb.mxu0 %v6789_v45  ;;  %v8607_v45 = vld [vmem:[#allocation8 + $0x3cc] sm:$0xf]  ;;  %v8565_v29 = vld [vmem:[#allocation8 + $0x278] sm:$0xf0] }
 0x1a4   : > { %3691 = vmatpush.bf16.msra.mxu3 %v7253_v57  ;;  %v2127_v12 = vpop.f32.mrf.mxu2  ;;  %v7133_v57 = vor.u32 %v8612_v48, %v7130_v49  ;;  %v7036_v48 = vld [vmem:[#allocation8 + $0x330] sm:$0xf]  ;;  %v8590_v49 = vld [vmem:[#allocation8 + $0x340] sm:$0xf0] }
 0x1a5   : > { %3608 = vmatmul.bf16.vlgmr.msrb.gmra.mxu0 %v9647_v15  ;;  %v2140_v18 = vpop.f32.mrf.mxu3  ;;  %v7113_v12 = vor.u32 %v8607_v45, %v7110_v63  ;;  %v7037_v61 = vor.u32 %v8590_v49, %v7036_v48  ;;  %v8667_v45 = vld [vmem:[#allocation8 + $0x5ac] sm:$0xf]  ;;  %v8570_v48 = vld [vmem:[#allocation8 + $0x2a0] sm:$0xf0] }
 0x1a6   : > { %3652 = vmatpush.bf16.msra.mxu0 %v6773_v4  ;;  %v7050_v18 = vld [vmem:[#allocation8 + $0x364] sm:$0xf0] }
 0x1a8   : > { %3692 = vmatpush.bf16.msra.mxu3 %v7233_v6  ;;  %v6630_v6 = vld [vmem:[#allocation8 + $0x1c] sm:$0xf0] }
 0x1a9   : > { %v6633_v59 = vor.u32 %v8487_v0, %v6630_v6  ;;  %v8574_v0 = vld [vmem:[#allocation8 + $0x2c0] sm:$0xf0] }
 0x1aa   : > { %3653 = vmatpush.bf16.msra.mxu0 %v6753_v10  ;;  %v8594_v10 = vld [vmem:[#allocation8 + $0x360] sm:$0xf0] }
 0x1ab   : > { %v7049_v20 = vor.u32 %v8594_v10, %v7048_v33  ;;  %v8572_v33 = vld [vmem:[#allocation8 + $0x2b4] sm:$0xf]  ;;  %v8662_v10 = vld [vmem:[#allocation8 + $0x584] sm:$0xf] }
 0x1ac   : > { %3693 = vmatpush.bf16.msra.mxu3 %v7213_v16  ;;  %v8592_v16 = vld [vmem:[#allocation8 + $0x354] sm:$0xf] }
 0x1ad   : > { %v7053_v17 = vor.u32 %v8592_v16, %v7050_v18  ;;  %v8580_v16 = vld [vmem:[#allocation8 + $0x2f0] sm:$0xf0]  ;;  %v6948_v18 = vld [vmem:[#allocation8 + $0x288] sm:$0xf] }
 0x1ae   : > { %3654 = vmatpush.bf16.msra.mxu0 %v6733_v22  ;;  %v7413_v22 = vor.u32 %v8682_v11, %v7410_v8  ;;  %v7330_v11 = vld [vmem:[#allocation8 + $0x594] sm:$0xf0] }
 0x1af   : > { %v7333_v23 = vor.u32 %v8662_v10, %v7330_v11  ;;  %v8640_v10 = vld [vmem:[#allocation8 + $0x4d0] sm:$0xf0] }
 0x1b0   : > { %3694 = vmatpush.bf16.msra.mxu3 %v7193_v25  ;;  %v7028_v25 = vld [vmem:[#allocation8 + $0x328] sm:$0xf] }
 0x1b1   : > { %v7029_v35 = vor.u32 %v8589_v26, %v7028_v25  ;;  %v8562_v25 = vld [vmem:[#allocation8 + $0x264] sm:$0xf] }
 0x1b2   : > { %3655 = vmatpush.bf16.msra.mxu0 %v6713_v13  ;;  %v7390_v13 = vld [vmem:[#allocation8 + $0x60c] sm:$0xf0] }
 0x1b4   : > { %v2151_v37 = vpop.f32.mrf.mxu0  ;;  %3695 = vmatpush.bf16.msra.mxu3 %v7173_v32  ;;  %v9670_v32 = vld [vmem:[#allocation10] sm:$0x1f] }
 0x1b5   : > { %v2152_v30 = vadd.f32 %v2151_v37, %v2139_v36  ;;  %v9663_v41 = vpop.f32.mrf.mxu1  ;;  %v7393_v36 = vor.u32 %v8677_v27, %v7390_v13  ;;  %v8595_v37 = vld [vmem:[#allocation8 + $0x368] sm:$0xf0]  ;;  %v7310_v13 = vld [vmem:[#allocation8 + $0x56c] sm:$0xf0] }
 0x1b6   : > { %3656 = vmatpush.bf16.msra.mxu0 %v6693_v14  ;;  %v7056_v14 = vld [vmem:[#allocation8 + $0x358] sm:$0xf] }
 0x1b7   : > { %v2159_v46 = vmax.f32 %v2152_v30, 0.0  ;;  %v8584_v30 = vld [vmem:[#allocation8 + $0x310] sm:$0xf0]  ;;  %v7057_v44 = vor.u32 %v8595_v37, %v7056_v14 }
 0x1b8   : > { %3696 = vmatpush.bf16.msra.mxu3 %v7153_v42  ;;  %v2407_v42 = vperm.slane %v9670_v32, 0 }
 0x1b9   : > { %v9665_v21 = vpack.c.bf16 %v2159_v46, %v2159_v46  ;;  %v7370_v46 = vld [vmem:[#allocation8 + $0x5e4] sm:$0xf0] }
 0x1ba   : > { %3657 = vmatpush.bf16.msra.mxu0 %v6673_v47  ;;  %v7009_v47 = vor.u32 %v8584_v30, %v7008_v40  ;;  %v7373_v55 = vor.u32 %v8672_v31, %v7370_v46  ;;  %v6937_v40 = vor.u32 %v8565_v29, %v6936_v28  ;;  %v8652_v30 = vld [vmem:[#allocation8 + $0x534] sm:$0xf]  ;;  %v6916_v31 = vld [vmem:[#allocation8 + $0x240] sm:$0xf]  ;;  %v8630_v29 = vld [vmem:[#allocation8 + $0x480] sm:$0xf0] }
 0x1bb   : > { %3517 = vmatmul.bf16.vlgmr.msrb.gmra.mxu1 %v9665_v21  ;;  %3582 = vmatmul.bf16.vlgmr.msra.gmra.mxu2 %v9665_v21  ;;  %v8560_v46 = vld [vmem:[#allocation8 + $0x250] sm:$0xf0] }
 0x1bc   : > { %3613 = vmatpush.bf16.msrb.mxu1 %v7089_v50  ;;  %v2153_v4 = vpop.f32.mrf.mxu0  ;;  %3647 = vmatmul.bf16.vlgmr.msrb.gmra.mxu3 %v9665_v21  ;;  %v7013_v50 = vor.u32 %v8582_v43, %v7010_v60  ;;  %v6910_v43 = vld [vmem:[#allocation8 + $0x24c] sm:$0xf0]  ;;  %v6917_v51 = vor.u32 %v8560_v46, %v6916_v31  ;;  %v8540_v28 = vld [vmem:[#allocation8 + $0x1b0] sm:$0xf0]  ;;  %v8527_v46 = vld [vmem:[#allocation8 + $0x14c] sm:$0xf] }
 0x1bd   : > { %3678 = vmatpush.bf16.msra.mxu2 %v7093_v53  ;;  %v3468_v7 = vpop.f32.mrf.mxu1  ;;  %3697 = vmatpush.bf16.msra.mxu3 %v7133_v57  ;;  %v3467_v53 = vadd.f32 %v9663_v41, %v2407_v42  ;;  %v6990_v57 = vld [vmem:[#allocation8 + $0x2ec] sm:$0xf0]  ;;  %v8585_v4 = vld [vmem:[#allocation8 + $0x318] sm:$0xf0] }
 0x1be   : > { %3658 = vmatpush.bf16.msra.mxu0 %v6653_v62  ;;  %v7350_v62 = vld [vmem:[#allocation8 + $0x5bc] sm:$0xf0]  ;;  %v6993_v41 = vor.u32 %v8577_v56, %v6990_v57  ;;  %v6970_v7 = vld [vmem:[#allocation8 + $0x2c4] sm:$0xf0]  ;;  %v8557_v42 = vld [vmem:[#allocation8 + $0x23c] sm:$0xf] }
 0x1bf   : > { %v7353_v6 = vor.u32 %v8667_v45, %v7350_v62  ;;  %v6913_v49 = vor.u32 %v8557_v42, %v6910_v43  ;;  %v8555_v45 = vld [vmem:[#allocation8 + $0x228] sm:$0xf0]  ;;  %v7256_v62 = vld [vmem:[#allocation8 + $0x4e8] sm:$0xf]  ;;  %v8625_v42 = vld [vmem:[#allocation8 + $0x458] sm:$0xf0] }
 0x1c0   : > { %3614 = vmatpush.bf16.msrb.mxu1 %v7069_v5  ;;  %v3479_v58 = vpop.f32.mrf.mxu2  ;;  %v6968_v5 = vld [vmem:[#allocation8 + $0x2b0] sm:$0xf] }
 0x1c1   : > { %3679 = vmatpush.bf16.msra.mxu2 %v7073_v9  ;;  %3698 = vmatpush.bf16.msra.mxu3 %v7113_v12  ;;  %v9677_v63 = vadd.f32 %v3479_v58, %v3467_v53  ;;  %v7017_v9 = vor.u32 %v8585_v4, %v7016_v3  ;;  %v6969_v8 = vor.u32 %v8574_v0, %v6968_v5  ;;  %v6996_v12 = vld [vmem:[#allocation8 + $0x2e0] sm:$0xf]  ;;  %v8552_v53 = vld [vmem:[#allocation8 + $0x214] sm:$0xf]  ;;  %v8547_v5 = vld [vmem:[#allocation8 + $0x1ec] sm:$0xf] }
 0x1c2   : > { %3659 = vmatpush.bf16.msra.mxu0 %v6633_v59  ;;  %v8569_v59 = vld [vmem:[#allocation8 + $0x298] sm:$0xf0]  ;;  %v6997_v27 = vor.u32 %v8580_v16, %v6996_v12  ;;  %v7270_v58 = vld [vmem:[#allocation8 + $0x51c] sm:$0xf0]  ;;  %v8542_v12 = vld [vmem:[#allocation8 + $0x1c4] sm:$0xf] }
 0x1c3   : > { %v7273_v4 = vor.u32 %v8647_v52, %v7270_v58  ;;  %v6870_v0 = vld [vmem:[#allocation8 + $0x1fc] sm:$0xf0]  ;;  %v6850_v16 = vld [vmem:[#allocation8 + $0x1d4] sm:$0xf0]  ;;  %v8525_v52 = vld [vmem:[#allocation8 + $0x138] sm:$0xf0] }
 0x1c4   : > { %3615 = vmatpush.bf16.msrb.mxu1 %v7049_v20  ;;  %v8567_v20 = vld [vmem:[#allocation8 + $0x28c] sm:$0xf]  ;;  %v6873_v11 = vor.u32 %v8547_v5, %v6870_v0  ;;  %v6736_v0 = vld [vmem:[#allocation8 + $0xd8] sm:$0xf] }
 0x1c5   : > { %3743 = vmatpush.bf16.msrb.mxu3 %v7097_v19  ;;  %3680 = vmatpush.bf16.msra.mxu2 %v7053_v17  ;;  %v6973_v19 = vor.u32 %v8572_v33, %v6970_v7  ;;  %v6930_v17 = vld [vmem:[#allocation8 + $0x274] sm:$0xf0]  ;;  %v6876_v33 = vld [vmem:[#allocation8 + $0x1f0] sm:$0xf]  ;;  %v8550_v7 = vld [vmem:[#allocation8 + $0x200] sm:$0xf0] }
 0x1c6   : > { %3704 = vmatpush.bf16.msrb.mxu0 %v7413_v22  ;;  %v6950_v22 = vld [vmem:[#allocation8 + $0x29c] sm:$0xf0]  ;;  %v6933_v37 = vor.u32 %v8562_v25, %v6930_v17  ;;  %v8537_v17 = vld [vmem:[#allocation8 + $0x19c] sm:$0xf] }
 0x1c7   : > { %3660 = vmatmul.bf16.vlgmr.msra.gmra.mxu0 %v9641_v54  ;;  %v6953_v14 = vor.u32 %v8567_v20, %v6950_v22  ;;  %v8545_v20 = vld [vmem:[#allocation8 + $0x1d8] sm:$0xf0]  ;;  %v7216_v22 = vld [vmem:[#allocation8 + $0x498] sm:$0xf] }
 0x1c8   : > { %3616 = vmatpush.bf16.msrb.mxu1 %v7029_v35  ;;  %v3481_v26 = vpop.f32.mrf.mxu2  ;;  %v6976_v35 = vld [vmem:[#allocation8 + $0x2b8] sm:$0xf] }
 0x1c9   : > { %3744 = vmatpush.bf16.msrb.mxu3 %v7077_v34  ;;  %3681 = vmatpush.bf16.msra.mxu2 %v7033_v38  ;;  %v6949_v34 = vor.u32 %v8569_v59, %v6948_v18  ;;  %v7313_v38 = vor.u32 %v8657_v24, %v7310_v13  ;;  %v6856_v59 = vld [vmem:[#allocation8 + $0x1c8] sm:$0xf]  ;;  %v6853_v24 = vor.u32 %v8542_v12, %v6850_v16  ;;  %v6830_v26 = vld [vmem:[#allocation8 + $0x1ac] sm:$0xf0]  ;;  %v6836_v13 = vld [vmem:[#allocation8 + $0x1a0] sm:$0xf] }
 0x1ca   : > { %3705 = vmatpush.bf16.msrb.mxu0 %v7393_v36  ;;  %v8575_v36 = vld [vmem:[#allocation8 + $0x2c8] sm:$0xf0]  ;;  %v6857_v25 = vor.u32 %v8545_v20, %v6856_v59  ;;  %v8510_v12 = vld [vmem:[#allocation8 + $0xc0] sm:$0xf0]  ;;  %v8505_v20 = vld [vmem:[#allocation8 + $0x98] sm:$0xf0] }
 0x1cb   : > { %3569 = vmatmul.bf16.vlgmr.msra.gmra.mxu1 %v9657_v39  ;;  %3634 = vmatmul.bf16.vlgmr.msrb.gmra.mxu2 %v9657_v39  ;;  %v6977_v60 = vor.u32 %v8575_v36, %v6976_v35  ;;  %v6837_v35 = vor.u32 %v8540_v28, %v6836_v13  ;;  %v8532_v36 = vld [vmem:[#allocation8 + $0x174] sm:$0xf]  ;;  %v8732_v28 = vld [vmem:[#allocation11 + $0x170] sm:$0xf0] }
 0x1cc   : > { %3617 = vmatpush.bf16.msrb.mxu1 %v7009_v47  ;;  %3699 = vmatmul.bf16.vlgmr.msra.gmra.mxu3 %v9657_v39  ;;  %v6956_v47 = vld [vmem:[#allocation8 + $0x290] sm:$0xf] }
 0x1cd   : > { %3745 = vmatpush.bf16.msrb.mxu3 %v7057_v44  ;;  %3682 = vmatpush.bf16.msra.mxu2 %v7013_v50  ;;  %v7290_v44 = vld [vmem:[#allocation8 + $0x544] sm:$0xf0]  ;;  %v6957_v57 = vor.u32 %v8570_v48, %v6956_v47  ;;  %v6790_v47 = vld [vmem:[#allocation8 + $0x15c] sm:$0xf0]  ;;  %v6796_v48 = vld [vmem:[#allocation8 + $0x150] sm:$0xf] }
 0x1ce   : > { %3706 = vmatpush.bf16.msrb.mxu0 %v7373_v55  ;;  %v7293_v50 = vor.u32 %v8652_v30, %v7290_v44  ;;  %v6890_v55 = vld [vmem:[#allocation8 + $0x224] sm:$0xf0] }
 0x1cf   : > { %v6893_v3 = vor.u32 %v8552_v53, %v6890_v55  ;;  %v7176_v30 = vld [vmem:[#allocation8 + $0x448] sm:$0xf]  ;;  %v7156_v53 = vld [vmem:[#allocation8 + $0x420] sm:$0xf]  ;;  %v8620_v55 = vld [vmem:[#allocation8 + $0x430] sm:$0xf0] }
 0x1d0   : > { %3618 = vmatpush.bf16.msrb.mxu1 %v6989_v2  ;;  %v8645_v2 = vld [vmem:[#allocation8 + $0x4f8] sm:$0xf0] }
 0x1d1   : > { %3746 = vmatpush.bf16.msrb.mxu3 %v7037_v61  ;;  %3683 = vmatpush.bf16.msra.mxu2 %v6993_v41  ;;  %v6896_v61 = vld [vmem:[#allocation8 + $0x218] sm:$0xf] }
 0x1d2   : > { %3707 = vmatpush.bf16.msrb.mxu0 %v7353_v6  ;;  %v6897_v41 = vor.u32 %v8555_v45, %v6896_v61  ;;  %v7257_v6 = vor.u32 %v8645_v2, %v7256_v62  ;;  %v7157_v45 = vor.u32 %v8620_v55, %v7156_v53  ;;  %v8520_v62 = vld [vmem:[#allocation8 + $0x110] sm:$0xf0]  ;;  %v7136_v2 = vld [vmem:[#allocation8 + $0x3f8] sm:$0xf]  ;;  %v8685_v53 = vld [vmem:[#allocation8 + $0x638] sm:$0xf0] }
 0x1d4   : > { %3619 = vmatpush.bf16.msrb.mxu1 %v6969_v8  ;;  %v6877_v8 = vor.u32 %v8550_v7, %v6876_v33  ;;  %v2408_v33 = vperm.slane %v9670_v32, 1  ;;  %v7116_v7 = vld [vmem:[#allocation8 + $0x3d0] sm:$0xf]  ;;  %v6696_v32 = vld [vmem:[#allocation8 + $0x88] sm:$0xf] }
 0x1d5   : > { %3747 = vmatpush.bf16.msrb.mxu3 %v7017_v9  ;;  %3684 = vmatpush.bf16.msra.mxu2 %v6973_v19  ;;  %v7236_v9 = vld [vmem:[#allocation8 + $0x4c0] sm:$0xf] }
 0x1d6   : > { %3708 = vmatpush.bf16.msrb.mxu0 %v7333_v23  ;;  %v7237_v19 = vor.u32 %v8640_v10, %v7236_v9  ;;  %v8635_v23 = vld [vmem:[#allocation8 + $0x4a8] sm:$0xf0]  ;;  %v8610_v9 = vld [vmem:[#allocation8 + $0x3e0] sm:$0xf0] }
 0x1d8   : > { %3620 = vmatpush.bf16.msrb.mxu1 %v6949_v34  ;;  %v6833_v34 = vor.u32 %v8537_v17, %v6830_v26  ;;  %v8500_v17 = vld [vmem:[#allocation8 + $0x70] sm:$0xf0] }
 0x1d9   : > { %3748 = vmatpush.bf16.msrb.mxu3 %v6997_v27  ;;  %3685 = vmatpush.bf16.msra.mxu2 %v6953_v14  ;;  %v7217_v27 = vor.u32 %v8635_v23, %v7216_v22  ;;  %v6810_v14 = vld [vmem:[#allocation8 + $0x184] sm:$0xf0]  ;;  %v7504_v22 = vld [vmem:[#allocation11 + $0xa8] sm:$0xf]  ;;  %v8708_v23 = vld [vmem:[#allocation11 + $0xb0] sm:$0xf0] }
 0x1da   : > { %3709 = vmatpush.bf16.msrb.mxu0 %v7313_v38  ;;  %v6816_v38 = vld [vmem:[#allocation8 + $0x178] sm:$0xf] }
 0x1db   : > { %3621 = vmatmul.bf16.vlgmr.msrb.gmra.mxu1 %v9652_v1  ;;  %v7492_v26 = vld [vmem:[#allocation11 + $0x90] sm:$0xf] }
 0x1dc   : > { %3665 = vmatpush.bf16.msra.mxu1 %v6933_v37  ;;  %v9681_v56 = vpop.f32.mrf.mxu2  ;;  %3686 = vmatmul.bf16.vlgmr.msra.gmra.mxu2 %v9652_v1 }
 0x1dd   : > { %3730 = vmatpush.bf16.msrb.mxu2 %v6937_v40  ;;  %3749 = vmatpush.bf16.msrb.mxu3 %v6977_v60  ;;  %v8535_v40 = vld [vmem:[#allocation8 + $0x188] sm:$0xf0]  ;;  %v6813_v60 = vor.u32 %v8532_v36, %v6810_v14  ;;  %v3532_v16 = vadd.f32 %v9681_v56, %v2408_v33  ;;  %v8705_v56 = vld [vmem:[#allocation11 + $0x98] sm:$0xf0]  ;;  %v6656_v36 = vld [vmem:[#allocation8 + $0x38] sm:$0xf] }
 0x1de   : > { %3710 = vmatpush.bf16.msrb.mxu0 %v7293_v50  ;;  %v6817_v31 = vor.u32 %v8535_v40, %v6816_v38  ;;  %v8530_v50 = vld [vmem:[#allocation8 + $0x160] sm:$0xf0]  ;;  %v7493_v13 = vor.u32 %v8705_v56, %v7492_v26  ;;  %v8495_v14 = vld [vmem:[#allocation8 + $0x48] sm:$0xf0]  ;;  %v7588_v38 = vld [vmem:[#allocation11 + $0x150] sm:$0xf] }
 0x1df   : > { %v6797_v58 = vor.u32 %v8530_v50, %v6796_v48  ;;  %v8699_v50 = vld [vmem:[#allocation11 + $0x68] sm:$0xf0] }
 0x1e0   : > { %3666 = vmatpush.bf16.msra.mxu1 %v6913_v49  ;;  %v7177_v49 = vor.u32 %v8625_v42, %v7176_v30  ;;  %v8729_v30 = vld [vmem:[#allocation11 + $0x158] sm:$0xf0]  ;;  %v6636_v42 = vld [vmem:[#allocation8 + $0x10] sm:$0xf] }
 0x1e1   : > { %3731 = vmatpush.bf16.msrb.mxu2 %v6917_v51  ;;  %3750 = vmatpush.bf16.msrb.mxu3 %v6957_v57  ;;  %v6776_v51 = vld [vmem:[#allocation8 + $0x128] sm:$0xf]  ;;  %v6793_v57 = vor.u32 %v8527_v46, %v6790_v47  ;;  %v7696_v46 = vld [vmem:[#allocation11 + $0x228] sm:$0xf]  ;;  %v8756_v47 = vld [vmem:[#allocation11 + $0x230] sm:$0xf0] }
 0x1e2   : > { %3711 = vmatpush.bf16.msrb.mxu0 %v7273_v4  ;;  %v6777_v61 = vor.u32 %v8525_v52, %v6776_v51  ;;  %v7697_v48 = vor.u32 %v8756_v47, %v7696_v46  ;;  %v7576_v51 = vld [vmem:[#allocation11 + $0x138] sm:$0xf]  ;;  %v7416_v52 = vld [vmem:[#allocation8 + $0x628] sm:$0xf] }
 0x1e3   : > { %v7528_v47 = vld [vmem:[#allocation11 + $0xd8] sm:$0xf] }
 0x1e4   : > { %3667 = vmatpush.bf16.msra.mxu1 %v6893_v3  ;;  %3751 = vmatmul.bf16.vlgmr.msrb.gmra.mxu3 %v9652_v1  ;;  %v3533_v18 = vpop.f32.mrf.mxu2  ;;  %v7196_v1 = vld [vmem:[#allocation8 + $0x470] sm:$0xf]  ;;  %v8615_v3 = vld [vmem:[#allocation8 + $0x408] sm:$0xf0] }
 0x1e5   : > { %3732 = vmatpush.bf16.msrb.mxu2 %v6897_v41  ;;  %3712 = vmatmul.bf16.vlgmr.msrb.gmra.mxu0 %v9665_v21  ;;  %v7197_v37 = vor.u32 %v8630_v29, %v7196_v1  ;;  %v7137_v5 = vor.u32 %v8615_v3, %v7136_v2  ;;  %v7417_v2 = vor.u32 %v8685_v53, %v7416_v52  ;;  %v8753_v3 = vld [vmem:[#allocation11 + $0x218] sm:$0xf0] }
 0x1e6   : > { %3756 = vmatpush.bf16.msra.mxu0 %v7257_v6  ;;  %v3492_v43 = vpop.f32.mrf.mxu3  ;;  %v8515_v6 = vld [vmem:[#allocation8 + $0xe8] sm:$0xf0]  ;;  %v8741_v52 = vld [vmem:[#allocation11 + $0x1b8] sm:$0xf0] }
 0x1e7   : > { %v9687_v44 = vadd.f32 %v3492_v43, %v9677_v63  ;;  %v6756_v63 = vld [vmem:[#allocation8 + $0x100] sm:$0xf]  ;;  %v6737_v10 = vor.u32 %v8515_v6, %v6736_v0  ;;  %v7589_v43 = vor.u32 %v8729_v30, %v7588_v38  ;;  %v8680_v0 = vld [vmem:[#allocation8 + $0x610] sm:$0xf0]  ;;  %v7648_v38 = vld [vmem:[#allocation11 + $0x1c8] sm:$0xf] }
 0x1e8   : > { %3668 = vmatpush.bf16.msra.mxu1 %v6873_v11  ;;  %v6757_v41 = vor.u32 %v8520_v62, %v6756_v63  ;;  %v7117_v11 = vor.u32 %v8610_v9, %v7116_v7  ;;  %v7684_v62 = vld [vmem:[#allocation11 + $0x210] sm:$0xf]  ;;  %v7564_v7 = vld [vmem:[#allocation11 + $0x120] sm:$0xf]  ;;  %v8723_v9 = vld [vmem:[#allocation11 + $0x128] sm:$0xf0] }
 0x1e9   : > { %3733 = vmatpush.bf16.msrb.mxu2 %v6877_v8  ;;  %v6716_v8 = vld [vmem:[#allocation8 + $0xb0] sm:$0xf]  ;;  %v7685_v6 = vor.u32 %v8753_v3, %v7684_v62  ;;  %v7336_v30 = vld [vmem:[#allocation8 + $0x588] sm:$0xf] }
 0x1ea   : > { %3757 = vmatpush.bf16.msra.mxu0 %v7237_v19  ;;  %v6717_v59 = vor.u32 %v8510_v12, %v6716_v8  ;;  %v7672_v8 = vld [vmem:[#allocation11 + $0x1f8] sm:$0xf]  ;;  %v8750_v12 = vld [vmem:[#allocation11 + $0x200] sm:$0xf0] }
 0x1eb   : > { %v8738_v3 = vld [vmem:[#allocation11 + $0x1a0] sm:$0xf0] }
 0x1ec   : > { %3669 = vmatpush.bf16.msra.mxu1 %v6853_v24  ;;  %v7505_v24 = vor.u32 %v8708_v23, %v7504_v22  ;;  %v8720_v22 = vld [vmem:[#allocation11 + $0x110] sm:$0xf0]  ;;  %v8675_v23 = vld [vmem:[#allocation8 + $0x5e8] sm:$0xf0] }
 0x1ed   : > { %3734 = vmatpush.bf16.msrb.mxu2 %v6857_v25  ;;  %v6676_v25 = vld [vmem:[#allocation8 + $0x60] sm:$0xf] }
 0x1ee   : > { %3758 = vmatpush.bf16.msra.mxu0 %v7217_v27  ;;  %v3494_v4 = vpop.f32.mrf.mxu3  ;;  %v7600_v27 = vld [vmem:[#allocation11 + $0x168] sm:$0xf] }
 0x1ef   : > { %v7601_v29 = vor.u32 %v8732_v28, %v7600_v27  ;;  %v7456_v4 = vld [vmem:[#allocation11 + $0x48] sm:$0xf] }
 0x1f0   : > { %3670 = vmatpush.bf16.msra.mxu1 %v6833_v34  ;;  %v7356_v28 = vld [vmem:[#allocation8 + $0x5b0] sm:$0xf] }
 0x1f1   : > { %3735 = vmatpush.bf16.msrb.mxu2 %v6837_v35  ;;  %v6677_v35 = vor.u32 %v8500_v17, %v6676_v25  ;;  %4613 = vmatpush.bf16.msra.mxu3 %v7601_v29  ;;  %v7660_v25 = vld [vmem:[#allocation11 + $0x1e0] sm:$0xf]  ;;  %v8747_v17 = vld [vmem:[#allocation11 + $0x1e8] sm:$0xf0]  ;;  %v7432_v29 = vld [vmem:[#allocation11 + $0x18] sm:$0xf] }
 0x1f2   : > { %3759 = vmatpush.bf16.msra.mxu0 %v7197_v37  ;;  %v8702_v37 = vld [vmem:[#allocation11 + $0x80] sm:$0xf0]  ;;  %v7661_v27 = vor.u32 %v8747_v17, %v7660_v25  ;;  %v8780_v25 = vld [vmem:[#allocation11 + $0x2f0] sm:$0xf0]  ;;  %v8701_v17 = vld [vmem:[#allocation11 + $0x7c] sm:$0xf] }
 0x1f4   : > { %3671 = vmatpush.bf16.msra.mxu1 %v6813_v60  ;;  %v6657_v60 = vor.u32 %v8495_v14, %v6656_v36  ;;  %v7540_v14 = vld [vmem:[#allocation11 + $0xf0] sm:$0xf] }
 0x1f5   : > { %3736 = vmatpush.bf16.msrb.mxu2 %v6817_v31  ;;  %v8490_v31 = vld [vmem:[#allocation8 + $0x20] sm:$0xf0]  ;;  %4614 = vmatpush.bf16.msra.mxu3 %v7589_v43  ;;  %v8665_v43 = vld [vmem:[#allocation8 + $0x598] sm:$0xf0] }
 0x1f6   : > { %3760 = vmatpush.bf16.msra.mxu0 %v7177_v49  ;;  %v3544_v18 = vpop.f32.mrf.mxu3  ;;  %v7468_v49 = vld [vmem:[#allocation11 + $0x60] sm:$0xf]  ;;  %v6637_v63 = vor.u32 %v8490_v31, %v6636_v42  ;;  %v8687_v31 = vld [vmem:[#allocation11 + $0x8] sm:$0xf0]  ;;  %v7337_v53 = vor.u32 %v8665_v43, %v7336_v30  ;;  %v7578_v30 = vld [vmem:[#allocation11 + $0x144] sm:$0xf0] }
 0x1f7   : > { %v9693_v19 = vadd.f32 %v3544_v18, %v3532_v16  ;;  %v7469_v55 = vor.u32 %v8699_v50, %v7468_v49  ;;  %v7444_v16 = vld [vmem:[#allocation11 + $0x30] sm:$0xf] }
 0x1f8   : > { %3672 = vmatpush.bf16.msra.mxu1 %v6793_v57  ;;  %v8726_v57 = vld [vmem:[#allocation11 + $0x140] sm:$0xf0] }
 0x1f9   : > { %3737 = vmatpush.bf16.msrb.mxu2 %v6797_v58 }
 0x1fa   : > { %3761 = vmatpush.bf16.msra.mxu0 %v7157_v45 }
 0x1fb   : > { %3673 = vmatmul.bf16.vlgmr.msra.gmra.mxu1 %v9647_v15 }
 0x1fc   : > { %3717 = vmatpush.bf16.msrb.mxu1 %v6777_v61  ;;  %3738 = vmatmul.bf16.vlgmr.msrb.gmra.mxu2 %v9647_v15  ;;  %v6697_v15 = vor.u32 %v8505_v20, %v6696_v32  ;;  %v7577_v61 = vor.u32 %v8726_v57, %v7576_v51  ;;  %v8693_v32 = vld [vmem:[#allocation11 + $0x38] sm:$0xf0]  ;;  %v7552_v20 = vld [vmem:[#allocation11 + $0x108] sm:$0xf]  ;;  %v7636_v51 = vld [vmem:[#allocation11 + $0x1b0] sm:$0xf] }
 0x1fd   : > { %4600 = vmatpush.bf16.msra.mxu2 %v7505_v24  ;;  %v7445_v24 = vor.u32 %v8693_v32, %v7444_v16  ;;  %v7637_v57 = vor.u32 %v8741_v52, %v7636_v51  ;;  %v7602_v32 = vld [vmem:[#allocation11 + $0x174] sm:$0xf0] }
 0x1fe   : > { %3762 = vmatpush.bf16.msra.mxu0 %v7137_v5  ;;  %v3546_v1 = vpop.f32.mrf.mxu3  ;;  %4615 = vmatpush.bf16.msra.mxu3 %v7577_v61  ;;  %v7396_v5 = vld [vmem:[#allocation8 + $0x600] sm:$0xf]  ;;  %v8660_v61 = vld [vmem:[#allocation8 + $0x570] sm:$0xf0] }
 0x1ff   : > { %v7397_v18 = vor.u32 %v8680_v0, %v7396_v5  ;;  %v8670_v1 = vld [vmem:[#allocation8 + $0x5c0] sm:$0xf0]  ;;  %v7506_v0 = vld [vmem:[#allocation11 + $0xb4] sm:$0xf0] }
 0x200   : > { %3718 = vmatpush.bf16.msrb.mxu1 %v6757_v41  ;;  %v8696_v41 = vld [vmem:[#allocation11 + $0x50] sm:$0xf0] }
 0x201   : > { %4601 = vmatpush.bf16.msra.mxu2 %v7493_v13  ;;  %v7457_v33 = vor.u32 %v8696_v41, %v7456_v4  ;;  %v8707_v4 = vld [vmem:[#allocation11 + $0xac] sm:$0xf] }
 0x202   : > { %3763 = vmatpush.bf16.msra.mxu0 %v7117_v11  ;;  %v9696_v34 = vpop.f32.mrf.mxu0  ;;  %v7565_v11 = vor.u32 %v8723_v9, %v7564_v7  ;;  %v7509_v7 = vor.u32 %v8707_v4, %v7506_v0  ;;  %v8768_v0 = vld [vmem:[#allocation11 + $0x290] sm:$0xf0] }
 0x204   : > { %3719 = vmatpush.bf16.msrb.mxu1 %v6737_v10  ;;  %v7376_v10 = vld [vmem:[#allocation8 + $0x5d8] sm:$0xf]  ;;  %4616 = vmatpush.bf16.msra.mxu3 %v7565_v11  ;;  %v8735_v11 = vld [vmem:[#allocation11 + $0x188] sm:$0xf0] }
 0x205   : > { %3764 = vmatmul.bf16.vlgmr.msra.gmra.mxu0 %v9657_v39  ;;  %v7480_v39 = vld [vmem:[#allocation11 + $0x78] sm:$0xf]  ;;  %v7377_v13 = vor.u32 %v8675_v23, %v7376_v10  ;;  %v7612_v10 = vld [vmem:[#allocation11 + $0x180] sm:$0xf] }
 0x206   : > { %v7481_v40 = vor.u32 %v8702_v37, %v7480_v39  ;;  %v9698_v58 = vpop.f32.mrf.mxu3  ;;  %4626 = vmatpush.bf16.msrb.mxu0 %v7697_v48  ;;  %v8717_v39 = vld [vmem:[#allocation11 + $0xf8] sm:$0xf0]  ;;  %v8714_v48 = vld [vmem:[#allocation11 + $0xe0] sm:$0xf0]  ;;  %v7613_v16 = vor.u32 %v8735_v11, %v7612_v10  ;;  %v8716_v11 = vld [vmem:[#allocation11 + $0xf4] sm:$0xf] }
 0x207   : > { %v7541_v37 = vor.u32 %v8717_v39, %v7540_v14  ;;  %v7529_v50 = vor.u32 %v8714_v48, %v7528_v47  ;;  %v8777_v14 = vld [vmem:[#allocation11 + $0x2d8] sm:$0xf0]  ;;  %v7458_v47 = vld [vmem:[#allocation11 + $0x54] sm:$0xf0]  ;;  %v8722_v48 = vld [vmem:[#allocation11 + $0x124] sm:$0xf] }
 0x208   : > { %3720 = vmatpush.bf16.msrb.mxu1 %v6717_v59  ;;  %4602 = vmatpush.bf16.msra.mxu2 %v7481_v40  ;;  %v7673_v59 = vor.u32 %v8750_v12, %v7672_v8  ;;  %v7357_v40 = vor.u32 %v8670_v1, %v7356_v28  ;;  %v8704_v8 = vld [vmem:[#allocation11 + $0x94] sm:$0xf]  ;;  %v7590_v1 = vld [vmem:[#allocation11 + $0x15c] sm:$0xf0] }
 0x209   : > { %v8728_v28 = vld [vmem:[#allocation11 + $0x154] sm:$0xf] }
 0x20a   : > { %v3507_v45 = vpop.f32.mrf.mxu0  ;;  %4627 = vmatpush.bf16.msrb.mxu0 %v7685_v6  ;;  %v7296_v6 = vld [vmem:[#allocation8 + $0x538] sm:$0xf] }
 0x20b   : > { %v7516_v45 = vld [vmem:[#allocation11 + $0xc0] sm:$0xf] }
 0x20c   : > { %3721 = vmatpush.bf16.msrb.mxu1 %v6697_v15  ;;  %4603 = vmatpush.bf16.msra.mxu2 %v7469_v55  ;;  %v7553_v15 = vor.u32 %v8720_v22, %v7552_v20  ;;  %v7316_v55 = vld [vmem:[#allocation8 + $0x560] sm:$0xf]  ;;  %v7276_v20 = vld [vmem:[#allocation8 + $0x510] sm:$0xf]  ;;  %v8650_v22 = vld [vmem:[#allocation8 + $0x520] sm:$0xf0] }
 0x20d   : > { %v7317_v41 = vor.u32 %v8660_v61, %v7316_v55  ;;  %v8771_v55 = vld [vmem:[#allocation11 + $0x2a8] sm:$0xf0]  ;;  %v7446_v61 = vld [vmem:[#allocation11 + $0x3c] sm:$0xf0] }
 0x20e   : > { %v3598_v26 = vpop.f32.mrf.mxu3  ;;  %4628 = vmatpush.bf16.msrb.mxu0 %v7673_v59  ;;  %4617 = vmatpush.bf16.msra.mxu3 %v7553_v15  ;;  %v8731_v59 = vld [vmem:[#allocation11 + $0x16c] sm:$0xf]  ;;  %v7792_v15 = vld [vmem:[#allocation11 + $0x2e8] sm:$0xf] }
 0x20f   : > { %v7482_v26 = vld [vmem:[#allocation11 + $0x84] sm:$0xf0] }
 0x210   : > { %3722 = vmatpush.bf16.msrb.mxu1 %v6677_v35  ;;  %4604 = vmatpush.bf16.msra.mxu2 %v7457_v33  ;;  %v8690_v35 = vld [vmem:[#allocation11 + $0x20] sm:$0xf0] }
 0x211   : > { %v7433_v36 = vor.u32 %v8690_v35, %v7432_v29  ;;  %v8655_v33 = vld [vmem:[#allocation8 + $0x548] sm:$0xf0]  ;;  %v7793_v29 = vor.u32 %v8780_v25, %v7792_v15  ;;  %v7593_v35 = vor.u32 %v8728_v28, %v7590_v1 }
 0x212   : > { %v9701_v56 = vpop.f32.mrf.mxu0  ;;  %4629 = vmatpush.bf16.msrb.mxu0 %v7661_v27  ;;  %4618 = vmatpush.bf16.msra.mxu3 %v7541_v37  ;;  %v7297_v12 = vor.u32 %v8655_v33, %v7296_v6  ;;  %v7277_v27 = vor.u32 %v8650_v22, %v7276_v20  ;;  %v8698_v37 = vld [vmem:[#allocation11 + $0x64] sm:$0xf]  ;;  %v8689_v6 = vld [vmem:[#allocation11 + $0x1c] sm:$0xf]  ;;  %v7434_v33 = vld [vmem:[#allocation11 + $0x24] sm:$0xf0] }
 0x213   : > { %v7437_v10 = vor.u32 %v8689_v6, %v7434_v33  ;;  %v8710_v1 = vld [vmem:[#allocation11 + $0xc4] sm:$0xf] }
 0x214   : > { %3723 = vmatpush.bf16.msrb.mxu1 %v6657_v60  ;;  %4605 = vmatpush.bf16.msra.mxu2 %v7445_v24  ;;  %v7420_v60 = vld [vmem:[#allocation11] sm:$0xf]  ;;  %v7605_v24 = vor.u32 %v8731_v59, %v7602_v32  ;;  %v8686_v59 = vld [vmem:[#allocation11 + $0x4] sm:$0xf]  ;;  %v7422_v32 = vld [vmem:[#allocation11 + $0xc] sm:$0xf0] }
 0x215   : > { %v7421_v46 = vor.u32 %v8687_v31, %v7420_v60  ;;  %v7768_v60 = vld [vmem:[#allocation11 + $0x2b8] sm:$0xf]  ;;  %v8774_v31 = vld [vmem:[#allocation11 + $0x2c0] sm:$0xf0]  ;;  %v7425_v22 = vor.u32 %v8686_v59, %v7422_v32  ;;  %v8709_v59 = vld [vmem:[#allocation11 + $0xb8] sm:$0xf0] }
 0x216   : > { %4619 = vmatpush.bf16.msra.mxu3 %v7529_v50  ;;  %v7566_v50 = vld [vmem:[#allocation11 + $0x12c] sm:$0xf0]  ;;  %v7769_v52 = vor.u32 %v8774_v31, %v7768_v60 }
 0x217   : > { %v7569_v51 = vor.u32 %v8722_v48, %v7566_v50 }
 0x218   : > { %3724 = vmatpush.bf16.msrb.mxu1 %v6637_v63  ;;  %4606 = vmatpush.bf16.msra.mxu2 %v7433_v36  ;;  %v8711_v63 = vld [vmem:[#allocation11 + $0xc8] sm:$0xf0]  ;;  %v7780_v36 = vld [vmem:[#allocation11 + $0x2d0] sm:$0xf] }
 0x219   : > { %v7517_v62 = vor.u32 %v8711_v63, %v7516_v45  ;;  %v3506_v45 = vadd.f32 %v9696_v34, %v9687_v44 }
 0x21a   : > { %v3559_v49 = vpop.f32.mrf.mxu0 }
 0x21b   : > { %3725 = vmatmul.bf16.vlgmr.msrb.gmra.mxu1 %v9641_v54  ;;  %v8744_v54 = vld [vmem:[#allocation11 + $0x1d0] sm:$0xf0]  ;;  %4620 = vmatpush.bf16.msra.mxu3 %v7517_v62  ;;  %v8719_v62 = vld [vmem:[#allocation11 + $0x10c] sm:$0xf] }
 0x21c   : > { %3769 = vmatpush.bf16.msra.mxu1 %v7417_v2  ;;  %v7649_v42 = vor.u32 %v8744_v54, %v7648_v38  ;;  %4607 = vmatpush.bf16.msra.mxu2 %v7421_v46  ;;  %v7624_v2 = vld [vmem:[#allocation11 + $0x198] sm:$0xf]  ;;  %v7470_v38 = vld [vmem:[#allocation11 + $0x6c] sm:$0xf0]  ;;  %v8695_v46 = vld [vmem:[#allocation11 + $0x4c] sm:$0xf] }
 0x21d   : > { %v7625_v5 = vor.u32 %v8738_v3, %v7624_v2  ;;  %v7473_v54 = vor.u32 %v8698_v37, %v7470_v38  ;;  %v7461_v49 = vor.u32 %v8695_v46, %v7458_v47  ;;  %v7554_v2 = vld [vmem:[#allocation11 + $0x114] sm:$0xf0]  ;;  %v8755_v37 = vld [vmem:[#allocation11 + $0x22c] sm:$0xf]  ;;  %v8752_v46 = vld [vmem:[#allocation11 + $0x214] sm:$0xf] }
 0x21e   : > { %4630 = vmatpush.bf16.msrb.mxu0 %v7649_v42  ;;  %v7781_v42 = vor.u32 %v8777_v14, %v7780_v36  ;;  %v7557_v4 = vor.u32 %v8719_v62, %v7554_v2  ;;  %v7708_v14 = vld [vmem:[#allocation11 + $0x240] sm:$0xf]  ;;  %v7698_v38 = vld [vmem:[#allocation11 + $0x234] sm:$0xf0]  ;;  %v8746_v62 = vld [vmem:[#allocation11 + $0x1e4] sm:$0xf] }
 0x21f   : > { %4665 = vmatpush.bf16.msrb.mxu3 %v7509_v7  ;;  %v7701_v31 = vor.u32 %v8755_v37, %v7698_v38  ;;  %v7686_v47 = vld [vmem:[#allocation11 + $0x21c] sm:$0xf0]  ;;  %v7662_v2 = vld [vmem:[#allocation11 + $0x1ec] sm:$0xf0]  ;;  %v7864_v38 = vld [vmem:[#allocation11 + $0x378] sm:$0xf] }
 0x220   : > { %3770 = vmatpush.bf16.msra.mxu1 %v7397_v18  ;;  %v7494_v18 = vld [vmem:[#allocation11 + $0x9c] sm:$0xf0] }
 0x221   : > { %v7497_v23 = vor.u32 %v8704_v8, %v7494_v18  ;;  %v7542_v8 = vld [vmem:[#allocation11 + $0xfc] sm:$0xf0]  ;;  %v8765_v18 = vld [vmem:[#allocation11 + $0x278] sm:$0xf0] }
 0x222   : > { %4631 = vmatpush.bf16.msrb.mxu0 %v7637_v57  ;;  %v9703_v9 = vpop.f32.mrf.mxu0  ;;  %v8692_v57 = vld [vmem:[#allocation11 + $0x34] sm:$0xf]  ;;  %v7545_v34 = vor.u32 %v8716_v11, %v7542_v8  ;;  %v7638_v8 = vld [vmem:[#allocation11 + $0x1bc] sm:$0xf0] }
 0x223   : > { %4666 = vmatpush.bf16.msrb.mxu3 %v7497_v23  ;;  %v7449_v63 = vor.u32 %v8692_v57, %v7446_v61  ;;  %v8713_v23 = vld [vmem:[#allocation11 + $0xdc] sm:$0xf]  ;;  %v8740_v11 = vld [vmem:[#allocation11 + $0x1b4] sm:$0xf] }
 0x224   : > { %3771 = vmatpush.bf16.msra.mxu1 %v7377_v13  ;;  %v7485_v13 = vor.u32 %v8701_v17, %v7482_v26  ;;  %v9721_v61 = vld [vmem:[#allocation10] sm:$0x1f]  ;;  %v7641_v32 = vor.u32 %v8740_v11, %v7638_v8 }
 0x225   : > { %v7452_v11 = vld [vmem:[#allocation11 + $0x38] sm:$0xf] }
 0x226   : > { %4632 = vmatpush.bf16.msrb.mxu0 %v7625_v5  ;;  %v7744_v5 = vld [vmem:[#allocation11 + $0x288] sm:$0xf] }
 0x227   : > { %4667 = vmatpush.bf16.msrb.mxu3 %v7485_v13  ;;  %v7745_v44 = vor.u32 %v8768_v0, %v7744_v5  ;;  %v8762_v13 = vld [vmem:[#allocation11 + $0x260] sm:$0xf0] }
 0x228   : > { %3772 = vmatpush.bf16.msra.mxu1 %v7357_v40  ;;  %v8725_v40 = vld [vmem:[#allocation11 + $0x13c] sm:$0xf] }
 0x229   : > { %v7581_v43 = vor.u32 %v8725_v40, %v7578_v30 }
 0x22a   : > { %4633 = vmatpush.bf16.msrb.mxu0 %v7613_v16  ;;  %v3611_v39 = vpop.f32.mrf.mxu0  ;;  %v7732_v16 = vld [vmem:[#allocation11 + $0x270] sm:$0xf] }
 0x22b   : > { %4668 = vmatpush.bf16.msrb.mxu3 %v7473_v54  ;;  %v7733_v17 = vor.u32 %v8765_v18, %v7732_v16  ;;  %v8759_v39 = vld [vmem:[#allocation11 + $0x248] sm:$0xf0]  ;;  %v3558_v54 = vadd.f32 %v9701_v56, %v9693_v19  ;;  %v8804_v16 = vld [vmem:[#allocation11 + $0x3b0] sm:$0xf0] }
 0x22c   : > { %3773 = vmatpush.bf16.msra.mxu1 %v7337_v53  ;;  %v7756_v53 = vld [vmem:[#allocation11 + $0x2a0] sm:$0xf] }
 0x22d   : > { %v7757_v3 = vor.u32 %v8771_v55, %v7756_v53  ;;  %v7674_v53 = vld [vmem:[#allocation11 + $0x204] sm:$0xf0] }
 0x22e   : > { %4678 = vmatpush.bf16.msra.mxu0 %v7605_v24  ;;  %v7530_v24 = vld [vmem:[#allocation11 + $0xe4] sm:$0xf0] }
 0x22f   : > { %4669 = vmatpush.bf16.msrb.mxu3 %v7461_v49  ;;  %v7533_v26 = vor.u32 %v8713_v23, %v7530_v24 }
 0x230   : > { %3774 = vmatpush.bf16.msra.mxu1 %v7317_v41 }
 0x232   : > { %4679 = vmatpush.bf16.msra.mxu0 %v7593_v35 }
 0x233   : > { %4670 = vmatpush.bf16.msrb.mxu3 %v7449_v63 }
 0x234   : > { %3775 = vmatpush.bf16.msra.mxu1 %v7297_v12 }
 0x236   : > { %4680 = vmatpush.bf16.msra.mxu0 %v7581_v43  ;;  %v7709_v43 = vor.u32 %v8759_v39, %v7708_v14  ;;  %v8734_v14 = vld [vmem:[#allocation11 + $0x184] sm:$0xf]  ;;  %v7614_v39 = vld [vmem:[#allocation11 + $0x18c] sm:$0xf0] }
 0x237   : > { %4671 = vmatpush.bf16.msrb.mxu3 %v7437_v10 }
 0x238   : > { %3776 = vmatpush.bf16.msra.mxu1 %v7277_v27  ;;  %v7720_v27 = vld [vmem:[#allocation11 + $0x258] sm:$0xf] }
 0x239   : > { %v7721_v35 = vor.u32 %v8762_v13, %v7720_v27  ;;  %v8801_v27 = vld [vmem:[#allocation11 + $0x398] sm:$0xf0] }
 0x23a   : > { %4681 = vmatpush.bf16.msra.mxu0 %v7569_v51  ;;  %v7689_v51 = vor.u32 %v8752_v46, %v7686_v47  ;;  %v7852_v46 = vld [vmem:[#allocation11 + $0x360] sm:$0xf]  ;;  %v8795_v47 = vld [vmem:[#allocation11 + $0x368] sm:$0xf0] }
 0x23b   : > { %3777 = vmatmul.bf16.vlgmr.msra.gmra.mxu1 %v9665_v21  ;;  %v3518_v21 = vpop.f32.mrf.mxu1  ;;  %4672 = vmatpush.bf16.msrb.mxu3 %v7425_v22  ;;  %v8737_v22 = vld [vmem:[#allocation11 + $0x19c] sm:$0xf] }
 0x23c   : > { %4639 = vmatpush.bf16.msrb.mxu1 %v7793_v29  ;;  %v3519_v41 = vadd.f32 %v3518_v21, %v3506_v45  ;;  %v7518_v29 = vld [vmem:[#allocation11 + $0xcc] sm:$0xf0]  ;;  %v2409_v45 = vperm.slane %v9721_v61, 2 }
 0x23d   : > { %v7521_v36 = vor.u32 %v8710_v1, %v7518_v29  ;;  %v8706_v1 = vld [vmem:[#allocation11 + $0xa0] sm:$0xf0] }
 0x23e   : > { %v3782_v7 = vmax.f32 %v3519_v41, 0.0  ;;  %4682 = vmatpush.bf16.msra.mxu0 %v7557_v4  ;;  %v3583_v20 = vpop.f32.mrf.mxu2  ;;  %v3597_v21 = vadd.f32 %v9698_v58, %v2409_v45  ;;  %v8743_v4 = vld [vmem:[#allocation11 + $0x1cc] sm:$0xf]  ;;  %v7650_v41 = vld [vmem:[#allocation11 + $0x1d4] sm:$0xf0] }
 0x23f   : > { %v9711_v15 = vpop.f32.mrf.mxu3  ;;  %v7653_v10 = vor.u32 %v8743_v4, %v7650_v41  ;;  %v7512_v58 = vld [vmem:[#allocation11 + $0xb0] sm:$0xf]  ;;  %v7840_v45 = vld [vmem:[#allocation11 + $0x348] sm:$0xf]  ;;  %v8697_v41 = vld [vmem:[#allocation11 + $0x58] sm:$0xf0] }
 0x240   : > { %4640 = vmatpush.bf16.msrb.mxu1 %v7781_v42  ;;  %v9708_v12 = vpack.c.bf16 %v3782_v7, %v3782_v7  ;;  %v3610_v5 = vadd.f32 %v9703_v9, %v3597_v21  ;;  %v7626_v9 = vld [vmem:[#allocation11 + $0x1a4] sm:$0xf0]  ;;  %v7464_v4 = vld [vmem:[#allocation11 + $0x50] sm:$0xf] }
 0x241   : > { %v7629_v29 = vor.u32 %v8737_v22, %v7626_v9  ;;  %v8786_v22 = vld [vmem:[#allocation11 + $0x320] sm:$0xf0] }
 0x242   : > { %4608 = vmatmul.bf16.vlgmr.msra.gmra.mxu2 %v9708_v12  ;;  %4683 = vmatpush.bf16.msra.mxu0 %v7545_v34  ;;  %v7888_v34 = vld [vmem:[#allocation11 + $0x3a8] sm:$0xf] }
 0x243   : > { %v3520_v25 = vpop.f32.mrf.mxu1 }
 0x244   : > { %4641 = vmatpush.bf16.msrb.mxu1 %v7769_v52  ;;  %v9713_v28 = vpop.f32.mrf.mxu0  ;;  %v8749_v52 = vld [vmem:[#allocation11 + $0x1fc] sm:$0xf] }
 0x245   : > { %v7677_v63 = vor.u32 %v8749_v52, %v7674_v53  ;;  %v7476_v52 = vld [vmem:[#allocation11 + $0x68] sm:$0xf]  ;;  %v8700_v53 = vld [vmem:[#allocation11 + $0x70] sm:$0xf0] }
 0x246   : > { %4684 = vmatpush.bf16.msra.mxu0 %v7533_v26  ;;  %v3585_v40 = vpop.f32.mrf.mxu2  ;;  %v7876_v26 = vld [vmem:[#allocation11 + $0x390] sm:$0xf] }
 0x247   : > { %v3650_v30 = vpop.f32.mrf.mxu3  ;;  %v7488_v40 = vld [vmem:[#allocation11 + $0x80] sm:$0xf] }
 0x248   : > { %4642 = vmatpush.bf16.msrb.mxu1 %v7757_v3  ;;  %v7665_v3 = vor.u32 %v8746_v62, %v7662_v2  ;;  %v8703_v30 = vld [vmem:[#allocation11 + $0x88] sm:$0xf0]  ;;  %v8800_v62 = vld [vmem:[#allocation11 + $0x394] sm:$0xf]  ;;  %v7477_v2 = vor.u32 %v8700_v53, %v7476_v52  ;;  %v7782_v53 = vld [vmem:[#allocation11 + $0x2dc] sm:$0xf0] }
 0x24a   : > { %4685 = vmatpush.bf16.msra.mxu0 %v7521_v36 }
 0x24b   : > { %v3570_v42 = vpop.f32.mrf.mxu1 }
 0x24c   : > { %4643 = vmatpush.bf16.msrb.mxu1 %v7745_v44  ;;  %v3571_v60 = vadd.f32 %v3570_v42, %v3558_v54  ;;  %v3663_v49 = vpop.f32.mrf.mxu0  ;;  %v8798_v54 = vld [vmem:[#allocation11 + $0x380] sm:$0xf0]  ;;  %v7617_v42 = vor.u32 %v8734_v14, %v7614_v39  ;;  %v7428_v14 = vld [vmem:[#allocation11 + $0x8] sm:$0xf]  ;;  %v8688_v39 = vld [vmem:[#allocation11 + $0x10] sm:$0xf0] }
 0x24d   : > { %v7489_v49 = vor.u32 %v8703_v30, %v7488_v40  ;;  %v8791_v40 = vld [vmem:[#allocation11 + $0x34c] sm:$0xf]  ;;  %v7429_v52 = vor.u32 %v8688_v39, %v7428_v14 }
 0x24e   : > { %v3584_v48 = vadd.f32 %v3583_v20, %v3571_v60  ;;  %v3635_v19 = vpop.f32.mrf.mxu2  ;;  %v7889_v20 = vor.u32 %v8804_v16, %v7888_v34  ;;  %v8797_v34 = vld [vmem:[#allocation11 + $0x37c] sm:$0xf]  ;;  %v7866_v16 = vld [vmem:[#allocation11 + $0x384] sm:$0xf0] }
 0x24f   : > { %v9719_v56 = vpop.f32.mrf.mxu3 }
 0x250   : > { %4644 = vmatpush.bf16.msrb.mxu1 %v7733_v17  ;;  %v3783_v50 = vmax.f32 %v3584_v48, 0.0  ;;  %4652 = vmatpush.bf16.msrb.mxu2 %v7889_v20  ;;  %v7513_v17 = vor.u32 %v8709_v59, %v7512_v58  ;;  %v8803_v48 = vld [vmem:[#allocation11 + $0x3ac] sm:$0xf]  ;;  %v7816_v20 = vld [vmem:[#allocation11 + $0x318] sm:$0xf] }
 0x252   : > { %v9717_v55 = vpack.c.bf16 %v3783_v50, %v3783_v50  ;;  %v7853_v50 = vor.u32 %v8795_v47, %v7852_v46  ;;  %v7842_v46 = vld [vmem:[#allocation11 + $0x354] sm:$0xf0]  ;;  %v7608_v47 = vld [vmem:[#allocation11 + $0x170] sm:$0xf] }
 0x253   : > { %v3572_v57 = vpop.f32.mrf.mxu1 }
 0x254   : > { %4645 = vmatpush.bf16.msrb.mxu1 %v7721_v35  ;;  %4621 = vmatmul.bf16.vlgmr.msra.gmra.mxu3 %v9717_v55  ;;  %v7877_v35 = vor.u32 %v8801_v27, %v7876_v26  ;;  %v7854_v26 = vld [vmem:[#allocation11 + $0x36c] sm:$0xf0] }
 0x256   : > { %v3637_v0 = vpop.f32.mrf.mxu2  ;;  %4653 = vmatpush.bf16.msrb.mxu2 %v7877_v35 }
 0x257   : > { %v3702_v6 = vpop.f32.mrf.mxu3 }
 0x258   : > { %4646 = vmatpush.bf16.msrb.mxu1 %v7709_v43  ;;  %v7865_v43 = vor.u32 %v8798_v54, %v7864_v38  ;;  %v7828_v6 = vld [vmem:[#allocation11 + $0x330] sm:$0xf]  ;;  %v8779_v38 = vld [vmem:[#allocation11 + $0x2ec] sm:$0xf]  ;;  %v7794_v54 = vld [vmem:[#allocation11 + $0x2f4] sm:$0xf0] }
 0x25a   : > { %4654 = vmatpush.bf16.msrb.mxu2 %v7865_v43  ;;  %v8805_v43 = vld [vmem:[#allocation11 + $0x3b8] sm:$0xf0] }
 0x25b   : > { %v3622_v33 = vpop.f32.mrf.mxu1 }
 0x25c   : > { %4691 = vmatpush.bf16.msra.mxu1 %v7701_v31  ;;  %v3623_v7 = vadd.f32 %v3622_v33, %v3610_v5  ;;  %v8789_v33 = vld [vmem:[#allocation11 + $0x338] sm:$0xf0] }
 0x25d   : > { %v7829_v8 = vor.u32 %v8789_v33, %v7828_v6  ;;  %v7596_v33 = vld [vmem:[#allocation11 + $0x158] sm:$0xf] }
 0x25e   : > { %v3636_v44 = vadd.f32 %v3635_v19, %v3623_v7  ;;  %4655 = vmatpush.bf16.msrb.mxu2 %v7853_v50  ;;  %v2410_v7 = vperm.slane %v9721_v61, 3 }
 0x25f   : > { %v9728_v24 = vpop.f32.mrf.mxu2 }
 0x260   : > { %4692 = vmatpush.bf16.msra.mxu1 %v7689_v51  ;;  %v3649_v18 = vadd.f32 %v9711_v15, %v3636_v44  ;;  %v7500_v15 = vld [vmem:[#allocation11 + $0x98] sm:$0xf]  ;;  %v8694_v44 = vld [vmem:[#allocation11 + $0x40] sm:$0xf0]  ;;  %v3662_v58 = vadd.f32 %v9713_v28, %v2410_v7 }
 0x261   : > { %v7501_v37 = vor.u32 %v8706_v1, %v7500_v15  ;;  %v7890_v51 = vld [vmem:[#allocation11 + $0x3b4] sm:$0xf0]  ;;  %v7453_v59 = vor.u32 %v8694_v44, %v7452_v11  ;;  %v7804_v1 = vld [vmem:[#allocation11 + $0x300] sm:$0xf]  ;;  %v8730_v7 = vld [vmem:[#allocation11 + $0x160] sm:$0xf0] }
 0x262   : > { %v3784_v23 = vmax.f32 %v3649_v18, 0.0  ;;  %v9733_v36 = vpop.f32.mrf.mxu0  ;;  %v7893_v19 = vor.u32 %v8803_v48, %v7890_v51  ;;  %v7869_v18 = vor.u32 %v8797_v34, %v7866_v16  ;;  %v8733_v48 = vld [vmem:[#allocation11 + $0x178] sm:$0xf0]  ;;  %v7818_v11 = vld [vmem:[#allocation11 + $0x324] sm:$0xf0] }
 0x263   : > { %v3624_v25 = vpop.f32.mrf.mxu1  ;;  %v7584_v34 = vld [vmem:[#allocation11 + $0x140] sm:$0xf] }
 0x264   : > { %4693 = vmatpush.bf16.msra.mxu1 %v7677_v63  ;;  %v9730_v13 = vpack.c.bf16 %v3784_v23, %v3784_v23  ;;  %4673 = vmatmul.bf16.vlgmr.msrb.gmra.mxu3 %v9708_v12  ;;  %v8792_v63 = vld [vmem:[#allocation11 + $0x350] sm:$0xf0]  ;;  %v8691_v23 = vld [vmem:[#allocation11 + $0x28] sm:$0xf0]  ;;  %v7817_v25 = vor.u32 %v8786_v22, %v7816_v20  ;;  %v7872_v16 = vld [vmem:[#allocation11 + $0x380] sm:$0xf] }
 0x265   : > { %4717 = vmatpush.bf16.msra.mxu3 %v7893_v19  ;;  %v7841_v21 = vor.u32 %v8792_v63, %v7840_v45  ;;  %v8788_v19 = vld [vmem:[#allocation11 + $0x334] sm:$0xf]  ;;  %v8782_v20 = vld [vmem:[#allocation11 + $0x304] sm:$0xf]  ;;  %v7806_v22 = vld [vmem:[#allocation11 + $0x30c] sm:$0xf0] }
 0x266   : > { %4634 = vmatmul.bf16.vlgmr.msrb.gmra.mxu0 %v9730_v13 }
 0x267   : > { %4730 = vmatpush.bf16.msrb.mxu0 %v7513_v17  ;;  %v9736_v60 = vpop.f32.mrf.mxu3  ;;  %v3689_v31 = vpop.f32.mrf.mxu2  ;;  %4656 = vmatpush.bf16.msrb.mxu2 %v7841_v21  ;;  %v8794_v17 = vld [vmem:[#allocation11 + $0x364] sm:$0xf]  ;;  %v7884_v21 = vld [vmem:[#allocation11 + $0x398] sm:$0xf] }
 0x268   : > { %4694 = vmatpush.bf16.msra.mxu1 %v7665_v3  ;;  %v7878_v3 = vld [vmem:[#allocation11 + $0x39c] sm:$0xf0]  ;;  %v7857_v15 = vor.u32 %v8794_v17, %v7854_v26  ;;  %v7797_v31 = vor.u32 %v8779_v38, %v7794_v54  ;;  %v7800_v17 = vld [vmem:[#allocation11 + $0x2f0] sm:$0xf]  ;;  %v8781_v26 = vld [vmem:[#allocation11 + $0x2f8] sm:$0xf0] }
 0x269   : > { %v7881_v5 = vor.u32 %v8800_v62, %v7878_v3  ;;  %v8802_v3 = vld [vmem:[#allocation11 + $0x3a0] sm:$0xf0]  ;;  %v7801_v14 = vor.u32 %v8781_v26, %v7800_v17  ;;  %v7572_v54 = vld [vmem:[#allocation11 + $0x128] sm:$0xf]  ;;  %v8712_v26 = vld [vmem:[#allocation11 + $0xd0] sm:$0xf0] }
 0x26a   : > { %v3715_v57 = vpop.f32.mrf.mxu0  ;;  %v8778_v38 = vld [vmem:[#allocation11 + $0x2e0] sm:$0xf0]  ;;  %v7524_v17 = vld [vmem:[#allocation11 + $0xc8] sm:$0xf] }
 0x26b   : > { %4731 = vmatpush.bf16.msrb.mxu0 %v7501_v37  ;;  %4718 = vmatpush.bf16.msra.mxu3 %v7881_v5  ;;  %v7830_v57 = vld [vmem:[#allocation11 + $0x33c] sm:$0xf0]  ;;  %v7770_v5 = vld [vmem:[#allocation11 + $0x2c4] sm:$0xf0] }
 0x26c   : > { %4695 = vmatpush.bf16.msra.mxu1 %v7653_v10  ;;  %v7465_v10 = vor.u32 %v8697_v41, %v7464_v4  ;;  %4657 = vmatpush.bf16.msrb.mxu2 %v7829_v8  ;;  %v7833_v62 = vor.u32 %v8788_v19, %v7830_v57  ;;  %v7609_v41 = vor.u32 %v8733_v48, %v7608_v47  ;;  %v8793_v47 = vld [vmem:[#allocation11 + $0x358] sm:$0xf0]  ;;  %v7836_v19 = vld [vmem:[#allocation11 + $0x338] sm:$0xf]  ;;  %v8790_v57 = vld [vmem:[#allocation11 + $0x340] sm:$0xf0] }
 0x26d   : > { %v7885_v8 = vor.u32 %v8802_v3, %v7884_v21  ;;  %v8718_v21 = vld [vmem:[#allocation11 + $0x100] sm:$0xf0]  ;;  %v7837_v3 = vor.u32 %v8790_v57, %v7836_v19  ;;  %v7680_v57 = vld [vmem:[#allocation11 + $0x200] sm:$0xf] }
 0x26f   : > { %4732 = vmatpush.bf16.msrb.mxu0 %v7489_v49  ;;  %v3754_v0 = vpop.f32.mrf.mxu3  ;;  %4719 = vmatpush.bf16.msra.mxu3 %v7869_v18  ;;  %v7845_v49 = vor.u32 %v8791_v40, %v7842_v46  ;;  %v8799_v18 = vld [vmem:[#allocation11 + $0x388] sm:$0xf0]  ;;  %v8724_v40 = vld [vmem:[#allocation11 + $0x130] sm:$0xf0]  ;;  %v7848_v46 = vld [vmem:[#allocation11 + $0x350] sm:$0xf] }
 0x270   : > { %4696 = vmatpush.bf16.msra.mxu1 %v7641_v32  ;;  %v7440_v32 = vld [vmem:[#allocation11 + $0x20] sm:$0xf]  ;;  %4658 = vmatpush.bf16.msrb.mxu2 %v7817_v25  ;;  %v8785_v0 = vld [vmem:[#allocation11 + $0x31c] sm:$0xf] }
 0x271   : > { %v7441_v28 = vor.u32 %v8691_v23, %v7440_v32  ;;  %v7821_v44 = vor.u32 %v8785_v0, %v7818_v11  ;;  %v7758_v32 = vld [vmem:[#allocation11 + $0x2ac] sm:$0xf0]  ;;  %v8727_v23 = vld [vmem:[#allocation11 + $0x148] sm:$0xf0]  ;;  %v8772_v11 = vld [vmem:[#allocation11 + $0x2b0] sm:$0xf0] }
 0x272   : > { %v7585_v39 = vor.u32 %v8727_v23, %v7584_v34  ;;  %v7536_v34 = vld [vmem:[#allocation11 + $0xe0] sm:$0xf] }
 0x273   : > { %4733 = vmatpush.bf16.msrb.mxu0 %v7477_v2  ;;  %4720 = vmatpush.bf16.msra.mxu3 %v7857_v15  ;;  %v7809_v15 = vor.u32 %v8782_v20, %v7806_v22  ;;  %v8784_v20 = vld [vmem:[#allocation11 + $0x310] sm:$0xf0] }
 0x274   : > { %4697 = vmatpush.bf16.msra.mxu1 %v7629_v29  ;;  %v8783_v29 = vld [vmem:[#allocation11 + $0x308] sm:$0xf0] }
 0x275   : > { %v7805_v37 = vor.u32 %v8783_v29, %v7804_v1  ;;  %v8767_v1 = vld [vmem:[#allocation11 + $0x28c] sm:$0xf]  ;;  %v7746_v29 = vld [vmem:[#allocation11 + $0x294] sm:$0xf0] }
 0x276   : > { %4686 = vmatmul.bf16.vlgmr.msra.gmra.mxu0 %v9717_v55 }
 0x277   : > { %4734 = vmatpush.bf16.msrb.mxu0 %v7465_v10  ;;  %4659 = vmatpush.bf16.msrb.mxu2 %v7805_v37  ;;  %v7788_v37 = vld [vmem:[#allocation11 + $0x2d8] sm:$0xf] }
 0x278   : > { %4698 = vmatpush.bf16.msra.mxu1 %v7617_v42  ;;  %v3674_v9 = vpop.f32.mrf.mxu1  ;;  %v7896_v42 = vld [vmem:[#allocation11 + $0x3b0] sm:$0xf]  ;;  %4721 = vmatpush.bf16.msra.mxu3 %v7845_v49  ;;  %v7789_v48 = vor.u32 %v8778_v38, %v7788_v37  ;;  %v7573_v49 = vor.u32 %v8724_v40, %v7572_v54  ;;  %v8763_v37 = vld [vmem:[#allocation11 + $0x268] sm:$0xf0]  ;;  %v7716_v40 = vld [vmem:[#allocation11 + $0x248] sm:$0xf] }
 0x279   : > { %v3675_v27 = vadd.f32 %v3674_v9, %v3662_v58  ;;  %v7897_v45 = vor.u32 %v8805_v43, %v7896_v42  ;;  %v8770_v58 = vld [vmem:[#allocation11 + $0x2a4] sm:$0xf]  ;;  %v8764_v43 = vld [vmem:[#allocation11 + $0x274] sm:$0xf] }
 0x27a   : > { %v7761_v25 = vor.u32 %v8770_v58, %v7758_v32  ;;  %v8758_v58 = vld [vmem:[#allocation11 + $0x244] sm:$0xf]  ;;  %v7812_v32 = vld [vmem:[#allocation11 + $0x308] sm:$0xf] }
 0x27b   : > { %v3688_v35 = vadd.f32 %v9728_v24, %v3675_v27  ;;  %4735 = vmatpush.bf16.msrb.mxu0 %v7453_v59  ;;  %v8776_v24 = vld [vmem:[#allocation11 + $0x2d4] sm:$0xf]  ;;  %4704 = vmatpush.bf16.msra.mxu2 %v7797_v31  ;;  %v7597_v59 = vor.u32 %v8730_v7, %v7596_v33  ;;  %v7873_v27 = vor.u32 %v8799_v18, %v7872_v16  ;;  %v7734_v31 = vld [vmem:[#allocation11 + $0x27c] sm:$0xf0]  ;;  %v8787_v33 = vld [vmem:[#allocation11 + $0x328] sm:$0xf0] }
 0x27c   : > { %v7785_v63 = vor.u32 %v8776_v24, %v7782_v53  ;;  %4722 = vmatpush.bf16.msra.mxu3 %v7833_v62  ;;  %v7560_v24 = vld [vmem:[#allocation11 + $0x110] sm:$0xf]  ;;  %v7849_v53 = vor.u32 %v8793_v47, %v7848_v46  ;;  %v8715_v16 = vld [vmem:[#allocation11 + $0xe8] sm:$0xf0] }
 0x27d   : > { %v3701_v30 = vadd.f32 %v9719_v56, %v3688_v35  ;;  %v7860_v35 = vld [vmem:[#allocation11 + $0x368] sm:$0xf]  ;;  %v7537_v23 = vor.u32 %v8715_v16, %v7536_v34 }
 0x27f   : > { %v3714_v50 = vadd.f32 %v9733_v36, %v3701_v30  ;;  %v9744_v51 = vpop.f32.mrf.mxu2  ;;  %4736 = vmatpush.bf16.msrb.mxu0 %v7441_v28  ;;  %v8773_v36 = vld [vmem:[#allocation11 + $0x2bc] sm:$0xf]  ;;  %4705 = vmatpush.bf16.msra.mxu2 %v7785_v63  ;;  %v8796_v28 = vld [vmem:[#allocation11 + $0x370] sm:$0xf0]  ;;  %v7749_v30 = vor.u32 %v8767_v1, %v7746_v29  ;;  %v7740_v29 = vld [vmem:[#allocation11 + $0x278] sm:$0xf] }
 0x280   : > { %v3676_v56 = vpop.f32.mrf.mxu1  ;;  %v7773_v10 = vor.u32 %v8773_v36, %v7770_v5  ;;  %4723 = vmatpush.bf16.msra.mxu3 %v7821_v44  ;;  %v7861_v42 = vor.u32 %v8796_v28, %v7860_v35  ;;  %v8761_v36 = vld [vmem:[#allocation11 + $0x25c] sm:$0xf]  ;;  %v7722_v5 = vld [vmem:[#allocation11 + $0x264] sm:$0xf0]  ;;  %v8766_v35 = vld [vmem:[#allocation11 + $0x280] sm:$0xf0]  ;;  %v7525_v28 = vor.u32 %v8712_v26, %v7524_v17 }
 0x281   : > { %v3785_v2 = vmax.f32 %v3714_v50, 0.0  ;;  %v8721_v50 = vld [vmem:[#allocation11 + $0x118] sm:$0xf0]  ;;  %v7776_v56 = vld [vmem:[#allocation11 + $0x2c0] sm:$0xf]  ;;  %v7725_v7 = vor.u32 %v8761_v36, %v7722_v5 }
 0x282   : > { %v9746_v4 = vpop.f32.mrf.mxu0  ;;  %v7561_v63 = vor.u32 %v8721_v50, %v7560_v24  ;;  %v8742_v36 = vld [vmem:[#allocation11 + $0x1c0] sm:$0xf0] }
 0x283   : > { %v9748_v6 = vpack.c.bf16 %v3785_v2, %v3785_v2  ;;  %4737 = vmatpush.bf16.msrb.mxu0 %v7429_v52  ;;  %4706 = vmatpush.bf16.msra.mxu2 %v7773_v10  ;;  %v7737_v52 = vor.u32 %v8764_v43, %v7734_v31  ;;  %v7548_v2 = vld [vmem:[#allocation11 + $0xf8] sm:$0xf]  ;;  %v7764_v10 = vld [vmem:[#allocation11 + $0x2a8] sm:$0xf] }
 0x284   : > { %4724 = vmatpush.bf16.msra.mxu3 %v7809_v15  ;;  %v7765_v44 = vor.u32 %v8772_v11, %v7764_v10  ;;  %v7813_v15 = vor.u32 %v8784_v20, %v7812_v32  ;;  %v9763_v11 = vld [vmem:[%s9841_s6] sm:$0x7] }
 0x285   : > { %4647 = vmatmul.bf16.vlgmr.msrb.gmra.mxu1 %v9748_v6  ;;  %v3954_v34 = vperm.slane %v9763_v11, 0  ;;  %v3955_v26 = vperm.slane %v9763_v11, 1 }
 0x286   : > { %4743 = vmatpush.bf16.msrb.mxu1 %v7609_v41  ;;  %4738 = vmatmul.bf16.vlgmr.msrb.gmra.mxu0 %v9708_v12  ;;  %v7824_v41 = vld [vmem:[#allocation11 + $0x320] sm:$0xf] }
 0x287   : > { %4782 = vmatpush.bf16.msra.mxu0 %v7897_v45  ;;  %v3741_v9 = vpop.f32.mrf.mxu2  ;;  %4707 = vmatpush.bf16.msra.mxu2 %v7761_v25  ;;  %v8775_v45 = vld [vmem:[#allocation11 + $0x2c8] sm:$0xf0]  ;;  %v7825_v18 = vor.u32 %v8787_v33, %v7824_v41  ;;  %v8769_v25 = vld [vmem:[#allocation11 + $0x298] sm:$0xf0]  ;;  %v7644_v41 = vld [vmem:[#allocation11 + $0x1b8] sm:$0xf] }
 0x288   : > { %4769 = vmatpush.bf16.msrb.mxu3 %v7801_v14  ;;  %v7777_v62 = vor.u32 %v8775_v45, %v7776_v56  ;;  %v7752_v9 = vld [vmem:[#allocation11 + $0x290] sm:$0xf]  ;;  %v7741_v14 = vor.u32 %v8766_v35, %v7740_v29  ;;  %v8751_v56 = vld [vmem:[#allocation11 + $0x208] sm:$0xf0]  ;;  %v8748_v45 = vld [vmem:[#allocation11 + $0x1f0] sm:$0xf0]  ;;  %v7645_v5 = vor.u32 %v8742_v36, %v7644_v41 }
 0x289   : > { %v8739_v33 = vld [vmem:[#allocation11 + $0x1a8] sm:$0xf0]  ;;  %v7900_v41 = vld [vmem:[#allocation13] sm:$0xf] }
 0x28a   : > { %v3767_v12 = vpop.f32.mrf.mxu0  ;;  %4744 = vmatpush.bf16.msrb.mxu1 %v7597_v59  ;;  %v7710_v59 = vld [vmem:[#allocation11 + $0x24c] sm:$0xf0]  ;;  %v8807_v36 = vld [vmem:[#allocation13 + $0x8] sm:$0xf0] }
 0x28b   : > { %4783 = vmatpush.bf16.msra.mxu0 %v7885_v8  ;;  %4708 = vmatpush.bf16.msra.mxu2 %v7749_v30  ;;  %v7549_v8 = vor.u32 %v8718_v21, %v7548_v2  ;;  %v7713_v22 = vor.u32 %v8758_v58, %v7710_v59  ;;  %v2411_v12 = vperm.slane %v9721_v61, 4  ;;  %v8760_v30 = vld [vmem:[#allocation11 + $0x250] sm:$0xf0]  ;;  %v8745_v2 = vld [vmem:[#allocation11 + $0x1d8] sm:$0xf0] }
 0x28c   : > { %4770 = vmatpush.bf16.msrb.mxu3 %v7789_v48  ;;  %v7704_v48 = vld [vmem:[#allocation11 + $0x230] sm:$0xf] }
 0x28e   : > { %4745 = vmatpush.bf16.msrb.mxu1 %v7585_v39  ;;  %v7728_v39 = vld [vmem:[#allocation11 + $0x260] sm:$0xf] }
 0x28f   : > { %4784 = vmatpush.bf16.msra.mxu0 %v7873_v27  ;;  %4709 = vmatpush.bf16.msra.mxu2 %v7737_v52  ;;  %v7753_v27 = vor.u32 %v8769_v25, %v7752_v9  ;;  %v7729_v38 = vor.u32 %v8763_v37, %v7728_v39  ;;  %v8828_v25 = vld [vmem:[#allocation13 + $0xb0] sm:$0xf0] }
 0x290   : > { %4771 = vmatpush.bf16.msrb.mxu3 %v7777_v62  ;;  %v7656_v62 = vld [vmem:[#allocation11 + $0x1d0] sm:$0xf] }
 0x292   : > { %4746 = vmatpush.bf16.msrb.mxu1 %v7573_v49  ;;  %v8757_v49 = vld [vmem:[#allocation11 + $0x238] sm:$0xf0] }
 0x293   : > { %4785 = vmatpush.bf16.msra.mxu0 %v7861_v42  ;;  %4710 = vmatpush.bf16.msra.mxu2 %v7725_v7  ;;  %v7717_v42 = vor.u32 %v8760_v30, %v7716_v40  ;;  %v7705_v50 = vor.u32 %v8757_v49, %v7704_v48  ;;  %v7948_v40 = vld [vmem:[#allocation13 + $0x60] sm:$0xf]  ;;  %v8819_v30 = vld [vmem:[#allocation13 + $0x68] sm:$0xf0]  ;;  %v8816_v48 = vld [vmem:[#allocation13 + $0x50] sm:$0xf0] }
 0x294   : > { %4772 = vmatpush.bf16.msrb.mxu3 %v7765_v44  ;;  %v8736_v44 = vld [vmem:[#allocation11 + $0x190] sm:$0xf0]  ;;  %v8821_v49 = vld [vmem:[#allocation13 + $0x7c] sm:$0xf] }
 0x295   : > { %4699 = vmatmul.bf16.vlgmr.msra.gmra.mxu1 %v9730_v13 }
 0x296   : > { %4747 = vmatpush.bf16.msrb.mxu1 %v7561_v63 }
 0x297   : > { %4786 = vmatpush.bf16.msra.mxu0 %v7849_v53  ;;  %4711 = vmatpush.bf16.msra.mxu2 %v7713_v22  ;;  %v7692_v53 = vld [vmem:[#allocation11 + $0x218] sm:$0xf] }
 0x298   : > { %v3726_v0 = vpop.f32.mrf.mxu1  ;;  %4773 = vmatpush.bf16.msrb.mxu3 %v7753_v27 }
 0x299   : > { %v3727_v54 = vadd.f32 %v3726_v0, %v2411_v12  ;;  %v7632_v0 = vld [vmem:[#allocation11 + $0x1a0] sm:$0xf]  ;;  %v8827_v12 = vld [vmem:[#allocation13 + $0xac] sm:$0xf] }
 0x29a   : > { %4748 = vmatpush.bf16.msrb.mxu1 %v7549_v8  ;;  %v7633_v10 = vor.u32 %v8739_v33, %v7632_v0  ;;  %v7620_v8 = vld [vmem:[#allocation11 + $0x188] sm:$0xf]  ;;  %v7901_v0 = vor.u32 %v8807_v36, %v7900_v41  ;;  %v8837_v41 = vld [vmem:[#allocation13 + $0xf8] sm:$0xf0]  ;;  %v8164_v36 = vld [vmem:[#allocation13 + $0x210] sm:$0xf] }
 0x29b   : > { %4787 = vmatpush.bf16.msra.mxu0 %v7837_v3  ;;  %v3740_v43 = vadd.f32 %v9744_v51, %v3727_v54  ;;  %v7657_v3 = vor.u32 %v8745_v2, %v7656_v62  ;;  %v7621_v16 = vor.u32 %v8736_v44, %v7620_v8  ;;  %v8815_v62 = vld [vmem:[#allocation13 + $0x4c] sm:$0xf]  ;;  %v7938_v2 = vld [vmem:[#allocation13 + $0x54] sm:$0xf0]  ;;  %v8080_v33 = vld [vmem:[#allocation13 + $0x168] sm:$0xf] }
 0x29c   : > { %4774 = vmatpush.bf16.msrb.mxu3 %v7741_v14  ;;  %v7960_v14 = vld [vmem:[#allocation13 + $0x78] sm:$0xf] }
 0x29d   : > { %v3753_v31 = vadd.f32 %v9736_v60, %v3740_v43  ;;  %v7681_v60 = vor.u32 %v8751_v56, %v7680_v57  ;;  %v8824_v43 = vld [vmem:[#allocation13 + $0x94] sm:$0xf]  ;;  %v8818_v56 = vld [vmem:[#allocation13 + $0x64] sm:$0xf] }
 0x29e   : > { %4749 = vmatpush.bf16.msrb.mxu1 %v7537_v23  ;;  %v7984_v23 = vld [vmem:[#allocation13 + $0xa8] sm:$0xf] }
 0x29f   : > { %4788 = vmatpush.bf16.msra.mxu0 %v7825_v18  ;;  %v3766_v46 = vadd.f32 %v9746_v4, %v3753_v31  ;;  %v7668_v4 = vld [vmem:[#allocation11 + $0x1e8] sm:$0xf]  ;;  %v7985_v17 = vor.u32 %v8828_v25, %v7984_v23  ;;  %v7974_v31 = vld [vmem:[#allocation13 + $0x9c] sm:$0xf0]  ;;  %v8809_v25 = vld [vmem:[#allocation13 + $0x1c] sm:$0xf] }
 0x2a0   : > { %v3728_v1 = vpop.f32.mrf.mxu1  ;;  %4775 = vmatpush.bf16.msrb.mxu3 %v7729_v38  ;;  %v7669_v63 = vor.u32 %v8748_v45, %v7668_v4  ;;  %v7986_v38 = vld [vmem:[#allocation13 + $0xb4] sm:$0xf0]  ;;  %v8070_v23 = vld [vmem:[#allocation13 + $0x15c] sm:$0xf0] }
 0x2a1   : > { %v8825_v1 = vld [vmem:[#allocation13 + $0x98] sm:$0xf0]  ;;  %v7989_v54 = vor.u32 %v8827_v12, %v7986_v38  ;;  %v7912_v4 = vld [vmem:[#allocation13 + $0x18] sm:$0xf] }
 0x2a2   : > { %4750 = vmatpush.bf16.msrb.mxu1 %v7525_v28 }
 0x2a3   : > { %4789 = vmatpush.bf16.msra.mxu0 %v7813_v15  ;;  %v7972_v15 = vld [vmem:[#allocation13 + $0x90] sm:$0xf] }
 0x2a4   : > { %4776 = vmatpush.bf16.msrb.mxu3 %v7717_v42  ;;  %v7973_v35 = vor.u32 %v8825_v1, %v7972_v15  ;;  %v7949_v42 = vor.u32 %v8819_v30, %v7948_v40  ;;  %v8056_v15 = vld [vmem:[#allocation13 + $0x138] sm:$0xf]  ;;  %v8846_v1 = vld [vmem:[#allocation13 + $0x140] sm:$0xf0]  ;;  %v8853_v40 = vld [vmem:[#allocation13 + $0x178] sm:$0xf0] }
 0x2a5   : > { %4751 = vmatmul.bf16.vlgmr.msrb.gmra.mxu1 %v9717_v55  ;;  %v8754_v55 = vld [vmem:[#allocation11 + $0x220] sm:$0xf0] }
 0x2a6   : > { %v7693_v51 = vor.u32 %v8754_v55, %v7692_v53  ;;  %5289 = vmatpush.bf16.msra.mxu1 %v7985_v17  ;;  %v7924_v53 = vld [vmem:[#allocation13 + $0x30] sm:$0xf]  ;;  %v8813_v55 = vld [vmem:[#allocation13 + $0x38] sm:$0xf0]  ;;  %v7914_v17 = vld [vmem:[#allocation13 + $0x24] sm:$0xf0] }
 0x2a7   : > { %5328 = vmatpush.bf16.msrb.mxu0 %v7989_v54  ;;  %v8088_v54 = vld [vmem:[#allocation13 + $0x170] sm:$0xf] }
 0x2a8   : > { %v8089_v30 = vor.u32 %v8853_v40, %v8088_v54  ;;  %v8875_v54 = vld [vmem:[#allocation13 + $0x22c] sm:$0xf] }
 0x2aa   : > { %5290 = vmatpush.bf16.msra.mxu1 %v7973_v35  ;;  %v8058_v35 = vld [vmem:[#allocation13 + $0x144] sm:$0xf0] }
 0x2b8   : > { %v3778_v61 = vpop.f32.mrf.mxu1 }
 0x2b9   : > { %v3779_v47 = vadd.f32 %v3778_v61, %v3766_v46  ;;  %v7936_v46 = vld [vmem:[#allocation13 + $0x48] sm:$0xf] }
 0x2bb   : > { %v3786_v24 = vmax.f32 %v3779_v47, 0.0  ;;  %v7977_v47 = vor.u32 %v8824_v43, %v7974_v31  ;;  %v8843_v43 = vld [vmem:[#allocation13 + $0x128] sm:$0xf0]  ;;  %v8842_v31 = vld [vmem:[#allocation13 + $0x124] sm:$0xf] }
 0x2bd   : > { %v3791_v52 = vpack.c.bf16 %v3786_v24, %v3786_v24  ;;  %v7962_v24 = vld [vmem:[#allocation13 + $0x84] sm:$0xf0]  ;;  %5329 = vmatpush.bf16.msrb.mxu0 %v7977_v47  ;;  %v8076_v47 = vld [vmem:[#allocation13 + $0x158] sm:$0xf] }
 0x2bf   : > { %4660 = vmatmul.bf16.vlgmr.msrb.gmra.mxu2 %v3791_v52  ;;  %4725 = vmatmul.bf16.vlgmr.msra.gmra.mxu3 %v3791_v52 }
 0x2c0   : > { %4790 = vmatmul.bf16.vlgmr.msra.gmra.mxu0 %v3791_v52  ;;  %v3780_v19 = vpop.f32.mrf.mxu1  ;;  %4756 = vmatpush.bf16.msrb.mxu2 %v7705_v50  ;;  %v7937_v50 = vor.u32 %v8816_v48, %v7936_v46  ;;  %v7965_v52 = vor.u32 %v8821_v49, %v7962_v24  ;;  %v8850_v48 = vld [vmem:[#allocation13 + $0x160] sm:$0xf0] }
 0x2c1   : > { %v8077_v24 = vor.u32 %v8850_v48, %v8076_v47  ;;  %v8864_v47 = vld [vmem:[#allocation13 + $0x1d0] sm:$0xf0] }
 0x2c2   : > { %5330 = vmatpush.bf16.msrb.mxu0 %v7965_v52  ;;  %v8840_v52 = vld [vmem:[#allocation13 + $0x110] sm:$0xf0] }
 0x2c4   : > { %4757 = vmatpush.bf16.msrb.mxu2 %v7693_v51  ;;  %v7925_v51 = vor.u32 %v8813_v55, %v7924_v53  ;;  %v8176_v53 = vld [vmem:[#allocation13 + $0x228] sm:$0xf] }
 0x2c5   : > { %v4609_v21 = vpop.f32.mrf.mxu2 }
 0x2c6   : > { %v4610_v18 = vadd.f32 %v4609_v21, %v3954_v34  ;;  %v8082_v34 = vld [vmem:[#allocation13 + $0x174] sm:$0xf0] }
 0x2c8   : > { %4758 = vmatpush.bf16.msrb.mxu2 %v7681_v60  ;;  %v7950_v60 = vld [vmem:[#allocation13 + $0x6c] sm:$0xf0] }
 0x2c9   : > { %v7953_v45 = vor.u32 %v8818_v56, %v7950_v60  ;;  %v8839_v56 = vld [vmem:[#allocation13 + $0x10c] sm:$0xf]  ;;  %v8034_v60 = vld [vmem:[#allocation13 + $0x114] sm:$0xf0] }
 0x2cb   : > { %5331 = vmatpush.bf16.msrb.mxu0 %v7953_v45 }
 0x2cc   : > { %4759 = vmatpush.bf16.msrb.mxu2 %v7669_v63  ;;  %v8810_v63 = vld [vmem:[#allocation13 + $0x20] sm:$0xf0] }
 0x2cd   : > { %v4611_v7 = vpop.f32.mrf.mxu2  ;;  %v7913_v21 = vor.u32 %v8810_v63, %v7912_v4  ;;  %v8037_v63 = vor.u32 %v8839_v56, %v8034_v60  ;;  %v8116_v56 = vld [vmem:[#allocation13 + $0x1b0] sm:$0xf]  ;;  %v8861_v60 = vld [vmem:[#allocation13 + $0x1b8] sm:$0xf0] }
 0x2ce   : > { %v8852_v7 = vld [vmem:[#allocation13 + $0x170] sm:$0xf0] }
 0x2cf   : > { %4712 = vmatmul.bf16.vlgmr.msra.gmra.mxu2 %v9748_v6  ;;  %4777 = vmatmul.bf16.vlgmr.msrb.gmra.mxu3 %v9748_v6  ;;  %v8081_v44 = vor.u32 %v8852_v7, %v8080_v33  ;;  %v8836_v33 = vld [vmem:[#allocation13 + $0xf4] sm:$0xf]  ;;  %v8022_v7 = vld [vmem:[#allocation13 + $0xfc] sm:$0xf0] }
 0x2d0   : > { %4760 = vmatpush.bf16.msrb.mxu2 %v7657_v3  ;;  %v7941_v3 = vor.u32 %v8815_v62, %v7938_v2  ;;  %v8064_v62 = vld [vmem:[#allocation13 + $0x140] sm:$0xf]  ;;  %v8847_v2 = vld [vmem:[#allocation13 + $0x148] sm:$0xf0] }
 0x2d2   : > { %5332 = vmatpush.bf16.msrb.mxu0 %v7941_v3  ;;  %v8020_v3 = vld [vmem:[#allocation13 + $0xf0] sm:$0xf] }
 0x2d4   : > { %4761 = vmatpush.bf16.msrb.mxu2 %v7645_v5 }
 0x2d7   : > { %v4622_v6 = vpop.f32.mrf.mxu3 }
 0x2d8   : > { %4762 = vmatpush.bf16.msrb.mxu2 %v7633_v10  ;;  %v4623_v58 = vadd.f32 %v4622_v6, %v4610_v18  ;;  %v8851_v10 = vld [vmem:[#allocation13 + $0x16c] sm:$0xf]  ;;  %v7926_v18 = vld [vmem:[#allocation13 + $0x3c] sm:$0xf0] }
 0x2d9   : > { %v8085_v6 = vor.u32 %v8851_v10, %v8082_v34  ;;  %v8844_v34 = vld [vmem:[#allocation13 + $0x130] sm:$0xf0] }
 0x2dc   : > { %4763 = vmatpush.bf16.msrb.mxu2 %v7621_v16  ;;  %v8812_v16 = vld [vmem:[#allocation13 + $0x34] sm:$0xf] }
 0x2df   : > { %4764 = vmatmul.bf16.vlgmr.msrb.gmra.mxu2 %v9730_v13  ;;  %v4624_v59 = vpop.f32.mrf.mxu3  ;;  %v8822_v13 = vld [vmem:[#allocation13 + $0x80] sm:$0xf0] }
 0x2e0   : > { %v7961_v37 = vor.u32 %v8822_v13, %v7960_v14  ;;  %v8068_v59 = vld [vmem:[#allocation13 + $0x150] sm:$0xf]  ;;  %5302 = vmatpush.bf16.msra.mxu2 %v8081_v44  ;;  %v8057_v13 = vor.u32 %v8846_v1, %v8056_v15  ;;  %v8052_v44 = vld [vmem:[#allocation13 + $0x128] sm:$0xf]  ;;  %v7996_v15 = vld [vmem:[#allocation13 + $0xc0] sm:$0xf] }
 0x2e1   : > { %v7902_v14 = vld [vmem:[#allocation13 + $0xc] sm:$0xf0] }
 0x2e2   : > { %5291 = vmatpush.bf16.msra.mxu1 %v7961_v37 }
 0x2e3   : > { %v4635_v32 = vpop.f32.mrf.mxu0 }
 0x2e4   : > { %v9767_v20 = vadd.f32 %v4635_v32, %v4623_v58  ;;  %v7929_v58 = vor.u32 %v8812_v16, %v7926_v18  ;;  %v8849_v32 = vld [vmem:[#allocation13 + $0x158] sm:$0xf0]  ;;  %v8053_v18 = vor.u32 %v8844_v34, %v8052_v44  ;;  %v8863_v44 = vld [vmem:[#allocation13 + $0x1cc] sm:$0xf] }
 0x2e6   : > { %5292 = vmatpush.bf16.msra.mxu1 %v7949_v42  ;;  %5333 = vmatpush.bf16.msrb.mxu0 %v7929_v58  ;;  %v8044_v42 = vld [vmem:[#allocation13 + $0x120] sm:$0xf]  ;;  %v8834_v58 = vld [vmem:[#allocation13 + $0xe0] sm:$0xf0] }
 0x2e7   : > { %v4674_v22 = vpop.f32.mrf.mxu3  ;;  %v8045_v46 = vor.u32 %v8843_v43, %v8044_v42  ;;  %v8028_v43 = vld [vmem:[#allocation13 + $0xf8] sm:$0xf] }
 0x2e8   : > { %v4675_v29 = vadd.f32 %v4674_v22, %v3955_v26  ;;  %v8848_v22 = vld [vmem:[#allocation13 + $0x154] sm:$0xf] }
 0x2e9   : > { %v8073_v26 = vor.u32 %v8848_v22, %v8070_v23  ;;  %v8870_v22 = vld [vmem:[#allocation13 + $0x200] sm:$0xf0]  ;;  %v8010_v23 = vld [vmem:[#allocation13 + $0xe4] sm:$0xf0] }
 0x2ea   : > { %5293 = vmatpush.bf16.msra.mxu1 %v7937_v50  ;;  %v8032_v50 = vld [vmem:[#allocation13 + $0x108] sm:$0xf] }
 0x2eb   : > { %v4637_v9 = vpop.f32.mrf.mxu0  ;;  %v8033_v55 = vor.u32 %v8840_v52, %v8032_v50  ;;  %v8166_v50 = vld [vmem:[#allocation13 + $0x21c] sm:$0xf0] }
 0x2ec   : > { %v8069_v9 = vor.u32 %v8849_v32, %v8068_v59  ;;  %v8152_v59 = vld [vmem:[#allocation13 + $0x1f8] sm:$0xf] }
 0x2ee   : > { %5294 = vmatpush.bf16.msra.mxu1 %v7925_v51  ;;  %5303 = vmatpush.bf16.msra.mxu2 %v8069_v9  ;;  %v8876_v51 = vld [vmem:[#allocation13 + $0x230] sm:$0xf0]  ;;  %v8833_v9 = vld [vmem:[#allocation13 + $0xdc] sm:$0xf] }
 0x2ef   : > { %v4676_v27 = vpop.f32.mrf.mxu3  ;;  %v8177_v45 = vor.u32 %v8876_v51, %v8176_v53  ;;  %v8016_v53 = vld [vmem:[#allocation13 + $0xe0] sm:$0xf] }
 0x2f0   : > { %v7917_v27 = vor.u32 %v8809_v25, %v7914_v17  ;;  %v8153_v25 = vor.u32 %v8870_v22, %v8152_v59  ;;  %v8013_v17 = vor.u32 %v8833_v9, %v8010_v23  ;;  %v8829_v59 = vld [vmem:[#allocation13 + $0xb8] sm:$0xf0]  ;;  %v8860_v23 = vld [vmem:[#allocation13 + $0x1b4] sm:$0xf] }
 0x2f1   : > { %5315 = vmatpush.bf16.msra.mxu3 %v8177_v45  ;;  %v8869_v45 = vld [vmem:[#allocation13 + $0x1fc] sm:$0xf] }
 0x2f2   : > { %5295 = vmatpush.bf16.msra.mxu1 %v7913_v21  ;;  %5334 = vmatpush.bf16.msrb.mxu0 %v7917_v27  ;;  %v8065_v21 = vor.u32 %v8847_v2, %v8064_v62  ;;  %v8841_v27 = vld [vmem:[#allocation13 + $0x118] sm:$0xf0]  ;;  %v8004_v2 = vld [vmem:[#allocation13 + $0xc8] sm:$0xf] }
 0x2f3   : > { %v4687_v28 = vpop.f32.mrf.mxu0  ;;  %5304 = vmatpush.bf16.msra.mxu2 %v8057_v13 }
 0x2f4   : > { %v9770_v39 = vadd.f32 %v4687_v28, %v4675_v29  ;;  %v8845_v29 = vld [vmem:[#allocation13 + $0x13c] sm:$0xf]  ;;  %v8806_v28 = vld [vmem:[#allocation13 + $0x4] sm:$0xf] }
 0x2f5   : > { %v8061_v37 = vor.u32 %v8845_v29, %v8058_v35  ;;  %v7905_v38 = vor.u32 %v8806_v28, %v7902_v14  ;;  %v8831_v29 = vld [vmem:[#allocation13 + $0xc8] sm:$0xf0]  ;;  %v8140_v35 = vld [vmem:[#allocation13 + $0x1e0] sm:$0xf] }
 0x2f6   : > { %5296 = vmatpush.bf16.msra.mxu1 %v7901_v0  ;;  %v8873_v0 = vld [vmem:[#allocation13 + $0x218] sm:$0xf0]  ;;  %v8867_v28 = vld [vmem:[#allocation13 + $0x1e8] sm:$0xf0]  ;;  %v7997_v14 = vor.u32 %v8831_v29, %v7996_v15 }
 0x2f7   : > { %5335 = vmatpush.bf16.msrb.mxu0 %v7905_v38  ;;  %5305 = vmatpush.bf16.msra.mxu2 %v8045_v46  ;;  %v8165_v10 = vor.u32 %v8873_v0, %v8164_v36  ;;  %v8141_v13 = vor.u32 %v8867_v28, %v8140_v35  ;;  %v7998_v38 = vld [vmem:[#allocation13 + $0xcc] sm:$0xf0]  ;;  %v8128_v46 = vld [vmem:[#allocation13 + $0x1c8] sm:$0xf]  ;;  %v8858_v36 = vld [vmem:[#allocation13 + $0x1a0] sm:$0xf0] }
 0x2f8   : > { %v8866_v0 = vld [vmem:[#allocation13 + $0x1e4] sm:$0xf]  ;;  %v8184_v35 = vld [vmem:[#allocation13 + $0x230] sm:$0xf]  ;;  %v8877_v28 = vld [vmem:[#allocation13 + $0x238] sm:$0xf0] }
 0x2f9   : > { %5316 = vmatpush.bf16.msra.mxu3 %v8165_v10  ;;  %v8092_v10 = vld [vmem:[#allocation13 + $0x180] sm:$0xf] }
 0x2fa   : > { %5341 = vmatpush.bf16.msrb.mxu1 %v8085_v6  ;;  %v8008_v6 = vld [vmem:[#allocation13 + $0xd8] sm:$0xf] }
 0x2fb   : > { %v4689_v61 = vpop.f32.mrf.mxu0  ;;  %5380 = vmatpush.bf16.msra.mxu0 %v8089_v30  ;;  %5306 = vmatpush.bf16.msra.mxu2 %v8033_v55  ;;  %v8009_v32 = vor.u32 %v8834_v58, %v8008_v6  ;;  %v8178_v30 = vld [vmem:[#allocation13 + $0x234] sm:$0xf0]  ;;  %v8835_v55 = vld [vmem:[#allocation13 + $0xe8] sm:$0xf0]  ;;  %v7992_v58 = vld [vmem:[#allocation13 + $0xb0] sm:$0xf] }
 0x2fc   : > { %v8046_v61 = vld [vmem:[#allocation13 + $0x12c] sm:$0xf0]  ;;  %v8181_v42 = vor.u32 %v8875_v54, %v8178_v30  ;;  %v8017_v51 = vor.u32 %v8835_v55, %v8016_v53  ;;  %v8130_v6 = vld [vmem:[#allocation13 + $0x1d4] sm:$0xf0]  ;;  %v7993_v22 = vor.u32 %v8829_v59, %v7992_v58  ;;  %v8106_v54 = vld [vmem:[#allocation13 + $0x1a4] sm:$0xf0] }
 0x2fd   : > { %v8049_v49 = vor.u32 %v8842_v31, %v8046_v61  ;;  %5317 = vmatpush.bf16.msra.mxu3 %v8153_v25  ;;  %v8838_v31 = vld [vmem:[#allocation13 + $0x100] sm:$0xf0]  ;;  %v8118_v25 = vld [vmem:[#allocation13 + $0x1bc] sm:$0xf0]  ;;  %v8823_v30 = vld [vmem:[#allocation13 + $0x88] sm:$0xf0] }
 0x2fe   : > { %5342 = vmatpush.bf16.msrb.mxu1 %v8073_v26  ;;  %v8040_v26 = vld [vmem:[#allocation13 + $0x110] sm:$0xf]  ;;  %v8029_v61 = vor.u32 %v8838_v31, %v8028_v43  ;;  %v8121_v15 = vor.u32 %v8860_v23, %v8118_v25  ;;  %v8172_v43 = vld [vmem:[#allocation13 + $0x218] sm:$0xf]  ;;  %v8874_v31 = vld [vmem:[#allocation13 + $0x220] sm:$0xf0] }
 0x2ff   : > { %5381 = vmatpush.bf16.msra.mxu0 %v8077_v24  ;;  %v8041_v1 = vor.u32 %v8841_v27, %v8040_v26  ;;  %v8872_v24 = vld [vmem:[#allocation13 + $0x214] sm:$0xf]  ;;  %v8160_v55 = vld [vmem:[#allocation13 + $0x200] sm:$0xf] }
 0x300   : > { %v8169_v52 = vor.u32 %v8872_v24, %v8166_v50  ;;  %v8173_v50 = vor.u32 %v8874_v31, %v8172_v43  ;;  %v8820_v53 = vld [vmem:[#allocation13 + $0x70] sm:$0xf0]  ;;  %v8893_v31 = vld [vmem:[#allocation14 + $0x78] sm:$0xff] }
 0x301   : > { %5318 = vmatpush.bf16.msra.mxu3 %v8141_v13  ;;  %v8808_v23 = vld [vmem:[#allocation13 + $0x10] sm:$0xf0] }
 0x302   : > { %v9772_v19 = vpop.f32.mrf.mxu1  ;;  %5343 = vmatpush.bf16.msrb.mxu1 %v8061_v37  ;;  %v8830_v37 = vld [vmem:[#allocation13 + $0xc4] sm:$0xf] }
 0x303   : > { %v9774_v57 = vpop.f32.mrf.mxu0  ;;  %5382 = vmatpush.bf16.msra.mxu0 %v8065_v21  ;;  %v8001_v40 = vor.u32 %v8830_v37, %v7998_v38  ;;  %v8832_v21 = vld [vmem:[#allocation13 + $0xd0] sm:$0xf0]  ;;  %v4649_v9 = vadd.f32 %v9772_v19, %v9767_v20  ;;  %v8857_v38 = vld [vmem:[#allocation13 + $0x19c] sm:$0xf]  ;;  %v8185_v20 = vor.u32 %v8877_v28, %v8184_v35 }
 0x304   : > { %v8109_v19 = vor.u32 %v8857_v38, %v8106_v54 }
 0x306   : > { %5344 = vmatpush.bf16.msrb.mxu1 %v8049_v49  ;;  %v8129_v49 = vor.u32 %v8864_v47, %v8128_v46  ;;  %v8094_v47 = vld [vmem:[#allocation13 + $0x18c] sm:$0xf0] }
 0x307   : > { %5383 = vmatpush.bf16.msra.mxu0 %v8053_v18 }
 0x308   : > { %5319 = vmatpush.bf16.msra.mxu3 %v8129_v49 }
 0x30a   : > { %v4650_v5 = vpop.f32.mrf.mxu1  ;;  %5345 = vmatpush.bf16.msrb.mxu1 %v8037_v63  ;;  %v8154_v63 = vld [vmem:[#allocation13 + $0x204] sm:$0xf0] }
 0x30b   : > { %v4741_v8 = vpop.f32.mrf.mxu0  ;;  %v8021_v5 = vor.u32 %v8837_v41, %v8020_v3  ;;  %5384 = vmatpush.bf16.msra.mxu0 %v8041_v1  ;;  %v8157_v62 = vor.u32 %v8869_v45, %v8154_v63  ;;  %v8005_v3 = vor.u32 %v8832_v21, %v8004_v2  ;;  %v8104_v41 = vld [vmem:[#allocation13 + $0x198] sm:$0xf]  ;;  %v8826_v1 = vld [vmem:[#allocation13 + $0xa0] sm:$0xf0]  ;;  %v8148_v63 = vld [vmem:[#allocation13 + $0x1e8] sm:$0xf] }
 0x30c   : > { %v8025_v8 = vor.u32 %v8836_v33, %v8022_v7  ;;  %v8142_v33 = vld [vmem:[#allocation13 + $0x1ec] sm:$0xf0]  ;;  %v7932_v21 = vld [vmem:[#allocation13 + $0x38] sm:$0xf] }
 0x30d   : > { %5307 = vmatpush.bf16.msra.mxu2 %v8021_v5  ;;  %v8105_v5 = vor.u32 %v8858_v36, %v8104_v41  ;;  %v8145_v7 = vor.u32 %v8866_v0, %v8142_v33 }
 0x30e   : > { %5346 = vmatpush.bf16.msrb.mxu1 %v8025_v8  ;;  %v8855_v8 = vld [vmem:[#allocation13 + $0x188] sm:$0xf0] }
 0x30f   : > { %5385 = vmatpush.bf16.msra.mxu0 %v8029_v61  ;;  %v8093_v18 = vor.u32 %v8855_v8, %v8092_v10  ;;  %v8854_v61 = vld [vmem:[#allocation13 + $0x184] sm:$0xf]  ;;  %v8865_v10 = vld [vmem:[#allocation13 + $0x1d8] sm:$0xf0] }
 0x311   : > { %5308 = vmatpush.bf16.msra.mxu2 %v8009_v32  ;;  %v8133_v32 = vor.u32 %v8863_v44, %v8130_v6  ;;  %v8811_v6 = vld [vmem:[#allocation13 + $0x28] sm:$0xf0] }
 0x312   : > { %v9776_v12 = vpop.f32.mrf.mxu1  ;;  %5347 = vmatpush.bf16.msrb.mxu1 %v8013_v17  ;;  %v7980_v17 = vld [vmem:[#allocation13 + $0x98] sm:$0xf] }
 0x313   : > { %5386 = vmatpush.bf16.msra.mxu0 %v8017_v51  ;;  %v8871_v51 = vld [vmem:[#allocation13 + $0x208] sm:$0xf0]  ;;  %v4701_v41 = vadd.f32 %v9776_v12, %v9770_v39  ;;  %v7908_v12 = vld [vmem:[#allocation13 + $0x8] sm:$0xf] }
 0x314   : > { %v8161_v45 = vor.u32 %v8871_v51, %v8160_v55  ;;  %v8901_v55 = vld [vmem:[#allocation14 + $0xb8] sm:$0xff]  ;;  %v8879_v51 = vld [vmem:[#allocation14 + $0x8] sm:$0xff] }
 0x315   : > { %5309 = vmatpush.bf16.msra.mxu2 %v7997_v14  ;;  %v7981_v14 = vor.u32 %v8826_v1, %v7980_v17  ;;  %v8859_v1 = vld [vmem:[#allocation13 + $0x1a8] sm:$0xf0] }
 0x316   : > { %5348 = vmatpush.bf16.msrb.mxu1 %v8001_v40  ;;  %v7968_v40 = vld [vmem:[#allocation13 + $0x80] sm:$0xf] }
 0x317   : > { %5387 = vmatpush.bf16.msra.mxu0 %v8005_v3  ;;  %v7969_v46 = vor.u32 %v8823_v30, %v7968_v40  ;;  %v8814_v3 = vld [vmem:[#allocation13 + $0x40] sm:$0xf0] }
 0x318   : > { %v7933_v8 = vor.u32 %v8814_v3, %v7932_v21  ;;  %v8898_v21 = vld [vmem:[#allocation14 + $0xa0] sm:$0xff] }
 0x319   : > { %5354 = vmatpush.bf16.msrb.mxu2 %v8181_v42 }
 0x31a   : > { %v4702_v4 = vpop.f32.mrf.mxu1 }
 0x31b   : > { %v8117_v4 = vor.u32 %v8861_v60, %v8116_v56  ;;  %v7944_v60 = vld [vmem:[#allocation13 + $0x50] sm:$0xf] }
 0x31d   : > { %5355 = vmatpush.bf16.msrb.mxu2 %v8169_v52  ;;  %5320 = vmatpush.bf16.msra.mxu3 %v8117_v4  ;;  %v8097_v52 = vor.u32 %v8854_v61, %v8094_v47  ;;  %v8817_v4 = vld [vmem:[#allocation13 + $0x58] sm:$0xf0]  ;;  %v8883_v61 = vld [vmem:[#allocation14 + $0x28] sm:$0xff] }
 0x31e   : > { %v7945_v2 = vor.u32 %v8817_v4, %v7944_v60  ;;  %v8891_v47 = vld [vmem:[#allocation14 + $0x68] sm:$0xff]  ;;  %v8900_v60 = vld [vmem:[#allocation14 + $0xb0] sm:$0xff] }
 0x321   : > { %5356 = vmatpush.bf16.msrb.mxu2 %v8157_v62  ;;  %5321 = vmatpush.bf16.msra.mxu3 %v8105_v5  ;;  %v8868_v62 = vld [vmem:[#allocation13 + $0x1f0] sm:$0xf0] }
 0x322   : > { %v9778_v16 = vpop.f32.mrf.mxu1  ;;  %v8149_v0 = vor.u32 %v8868_v62, %v8148_v63  ;;  %v8878_v63 = vld [vmem:[#allocation14] sm:$0xff] }
 0x323   : > { %v8886_v62 = vld [vmem:[#allocation14 + $0x40] sm:$0xff] }
 0x325   : > { %5357 = vmatpush.bf16.msrb.mxu2 %v8145_v7  ;;  %5322 = vmatpush.bf16.msra.mxu3 %v8093_v18  ;;  %v8136_v7 = vld [vmem:[#allocation13 + $0x1d0] sm:$0xf]  ;;  %v7920_v18 = vld [vmem:[#allocation13 + $0x20] sm:$0xf] }
 0x326   : > { %v8137_v58 = vor.u32 %v8865_v10, %v8136_v7  ;;  %v8895_v10 = vld [vmem:[#allocation14 + $0x88] sm:$0xff] }
 0x329   : > { %5358 = vmatpush.bf16.msrb.mxu2 %v8133_v32  ;;  %5367 = vmatpush.bf16.msrb.mxu3 %v7993_v22  ;;  %v8124_v32 = vld [vmem:[#allocation13 + $0x1b8] sm:$0xf]  ;;  %v8862_v22 = vld [vmem:[#allocation13 + $0x1c0] sm:$0xf0] }
 0x32a   : > { %v4754_v48 = vpop.f32.mrf.mxu1 }
 0x32b   : > { %v7956_v48 = vld [vmem:[#allocation13 + $0x68] sm:$0xf] }
 0x32c   : > { %v7957_v56 = vor.u32 %v8820_v53, %v7956_v48  ;;  %v8890_v48 = vld [vmem:[#allocation14 + $0x60] sm:$0xff]  ;;  %v8888_v53 = vld [vmem:[#allocation14 + $0x50] sm:$0xff] }
 0x32d   : > { %5359 = vmatpush.bf16.msrb.mxu2 %v8121_v15  ;;  %5368 = vmatpush.bf16.msrb.mxu3 %v7981_v14  ;;  %v3956_v15 = vperm.slane %v9763_v11, 2  ;;  %v8100_v14 = vld [vmem:[#allocation13 + $0x188] sm:$0xf] }
 0x32f   : > { %v4740_v28 = vadd.f32 %v9774_v57, %v3956_v15  ;;  %v8885_v57 = vld [vmem:[#allocation14 + $0x38] sm:$0xff] }
 0x331   : > { %5360 = vmatpush.bf16.msrb.mxu2 %v8109_v19  ;;  %5369 = vmatpush.bf16.msrb.mxu3 %v7969_v46  ;;  %v8892_v46 = vld [vmem:[#allocation14 + $0x70] sm:$0xff] }
 0x335   : > { %5361 = vmatpush.bf16.msrb.mxu2 %v8097_v52  ;;  %5370 = vmatpush.bf16.msrb.mxu3 %v7957_v56  ;;  %v8880_v52 = vld [vmem:[#allocation14 + $0x10] sm:$0xff]  ;;  %v8887_v56 = vld [vmem:[#allocation14 + $0x48] sm:$0xff] }
 0x339   : > { %5371 = vmatpush.bf16.msrb.mxu3 %v7945_v2  ;;  %v8899_v2 = vld [vmem:[#allocation14 + $0xa8] sm:$0xff] }
 0x33d   : > { %v9780_v34 = vpop.f32.mrf.mxu0  ;;  %5372 = vmatpush.bf16.msrb.mxu3 %v7933_v8  ;;  %v4897_v8 = vld [vmem:[%s9843_s8] sm:$0x7] }
 0x342   : > { %v4661_v26 = vpop.f32.mrf.mxu2  ;;  %v4726_v27 = vpop.f32.mrf.mxu3 }
 0x343   : > { %v4662_v29 = vadd.f32 %v4661_v26, %v4649_v9  ;;  %v7921_v9 = vor.u32 %v8811_v6, %v7920_v18  ;;  %v8125_v26 = vor.u32 %v8862_v22, %v8124_v32  ;;  %v8894_v18 = vld [vmem:[#allocation14 + $0x80] sm:$0xff]  ;;  %v4899_v6 = vperm.slane %v4897_v8, 0 }
 0x345   : > { %v4795_v13 = vmax.f32 %v4662_v29, 0.0  ;;  %v4793_v37 = vpop.f32.mrf.mxu0  ;;  %5373 = vmatpush.bf16.msrb.mxu3 %v7921_v9  ;;  %v7909_v29 = vor.u32 %v8808_v23, %v7908_v12 }
 0x346   : > { %v4753_v37 = vadd.f32 %v9778_v16, %v4740_v28  ;;  %v8884_v16 = vld [vmem:[#allocation14 + $0x30] sm:$0xff] }
 0x347   : > { %v9784_v42 = vpack.c.bf16 %v4795_v13, %v4795_v13  ;;  %v8856_v13 = vld [vmem:[#allocation13 + $0x190] sm:$0xf0] }
 0x348   : > { %v8101_v54 = vor.u32 %v8856_v13, %v8100_v14 }
 0x349   : > { %5297 = vmatmul.bf16.vlgmr.msra.gmra.mxu1 %v9784_v42  ;;  %5336 = vmatmul.bf16.vlgmr.msrb.gmra.mxu0 %v9784_v42 }
 0x34a   : > { %v4663_v49 = vpop.f32.mrf.mxu2  ;;  %v4728_v24 = vpop.f32.mrf.mxu3  ;;  %5393 = vmatpush.bf16.msra.mxu1 %v8185_v20  ;;  %5374 = vmatpush.bf16.msrb.mxu3 %v7909_v29 }
 0x34b   : > { %5631 = vmatpush.bf16.msrb.mxu0 %v8901_v55 }
 0x34e   : > { %5394 = vmatpush.bf16.msra.mxu1 %v8173_v50  ;;  %v8881_v50 = vld [vmem:[#allocation14 + $0x18] sm:$0xff] }
 0x34f   : > { %5632 = vmatpush.bf16.msrb.mxu0 %v8900_v60 }
 0x352   : > { %v4713_v36 = vpop.f32.mrf.mxu2  ;;  %v4778_v5 = vpop.f32.mrf.mxu3  ;;  %5395 = vmatpush.bf16.msra.mxu1 %v8161_v45 }
 0x353   : > { %v4714_v33 = vadd.f32 %v4713_v36, %v4701_v41  ;;  %5633 = vmatpush.bf16.msrb.mxu0 %v8899_v2  ;;  %v8897_v36 = vld [vmem:[#allocation14 + $0x98] sm:$0xff] }
 0x355   : > { %v4727_v44 = vadd.f32 %v4726_v27, %v4714_v33  ;;  %v8112_v27 = vld [vmem:[#allocation13 + $0x1a0] sm:$0xf] }
 0x356   : > { %5396 = vmatpush.bf16.msra.mxu1 %v8149_v0  ;;  %v8113_v35 = vor.u32 %v8859_v1, %v8112_v27 }
 0x357   : > { %v4796_v59 = vmax.f32 %v4727_v44, 0.0  ;;  %5634 = vmatpush.bf16.msrb.mxu0 %v8898_v21 }
 0x359   : > { %v4799_v39 = vpack.c.bf16 %v4796_v59, %v4796_v59 }
 0x35a   : > { %v4715_v25 = vpop.f32.mrf.mxu2  ;;  %v4780_v17 = vpop.f32.mrf.mxu3  ;;  %5397 = vmatpush.bf16.msra.mxu1 %v8137_v58  ;;  %v4900_v58 = vperm.slane %v4897_v8, 1 }
 0x35b   : > { %5310 = vmatmul.bf16.vlgmr.msra.gmra.mxu2 %v4799_v39  ;;  %5349 = vmatmul.bf16.vlgmr.msrb.gmra.mxu1 %v4799_v39 }
 0x35c   : > { %5388 = vmatmul.bf16.vlgmr.msra.gmra.mxu0 %v4799_v39  ;;  %5605 = vmatpush.bf16.msra.mxu2 %v8885_v57 }
 0x35d   : > { %5635 = vmatpush.bf16.msrb.mxu0 %v8897_v36 }
 0x35e   : > { %5398 = vmatpush.bf16.msra.mxu1 %v8125_v26 }
 0x360   : > { %5606 = vmatpush.bf16.msra.mxu2 %v8884_v16 }
 0x362   : > { %v4765_v38 = vpop.f32.mrf.mxu2  ;;  %5399 = vmatpush.bf16.msra.mxu1 %v8113_v35  ;;  %v4901_v35 = vperm.slane %v4897_v8, 2 }
 0x363   : > { %v4766_v11 = vadd.f32 %v4765_v38, %v4753_v37 }
 0x364   : > { %5607 = vmatpush.bf16.msra.mxu2 %v8883_v61 }
 0x365   : > { %v4779_v20 = vadd.f32 %v4778_v5, %v4766_v11  ;;  %v8896_v5 = vld [vmem:[#allocation14 + $0x90] sm:$0xff] }
 0x366   : > { %5400 = vmatpush.bf16.msra.mxu1 %v8101_v54  ;;  %5636 = vmatpush.bf16.msrb.mxu0 %v8896_v5 }
 0x367   : > { %v4792_v19 = vadd.f32 %v9780_v34, %v4779_v20  ;;  %v8882_v34 = vld [vmem:[#allocation14 + $0x20] sm:$0xff] }
 0x368   : > { %5608 = vmatpush.bf16.msra.mxu2 %v8882_v34 }
 0x369   : > { %v4797_v40 = vmax.f32 %v4792_v19, 0.0  ;;  %v9028_v19 = vld [vmem:[%s9845_s10] ss:$0 sm:$0xff] }
 0x36a   : > { %v4767_v30 = vpop.f32.mrf.mxu2  ;;  %5637 = vmatpush.bf16.msrb.mxu0 %v8895_v10 }
 0x36b   : > { %v4800_v43 = vpack.c.bf16 %v4797_v40, %v4797_v40 }
 0x36c   : > { %5609 = vmatpush.bf16.msra.mxu2 %v8881_v50 }
 0x36d   : > { %5323 = vmatmul.bf16.vlgmr.msra.gmra.mxu3 %v4800_v43  ;;  %5362 = vmatmul.bf16.vlgmr.msrb.gmra.mxu2 %v4800_v43 }
 0x36e   : > { %5401 = vmatmul.bf16.vlgmr.msra.gmra.mxu1 %v4800_v43  ;;  %5618 = vmatpush.bf16.msra.mxu3 %v8893_v31 }
 0x36f   : > { %5638 = vmatpush.bf16.msrb.mxu0 %v8894_v18 }
 0x370   : > { %5610 = vmatpush.bf16.msra.mxu2 %v8880_v52 }
 0x372   : > { %5619 = vmatpush.bf16.msra.mxu3 %v8892_v46 }
 0x374   : > { %5611 = vmatpush.bf16.msra.mxu2 %v8879_v51 }
 0x376   : > { %5620 = vmatpush.bf16.msra.mxu3 %v8891_v47 }
 0x378   : > { %5612 = vmatpush.bf16.msra.mxu2 %v8878_v63 }
 0x37a   : > { %5621 = vmatpush.bf16.msra.mxu3 %v8890_v48 }
 0x37d   : > { %5375 = vmatmul.bf16.vlgmr.msrb.gmra.mxu3 %v9784_v42  ;;  %v8889_v42 = vld [vmem:[#allocation14 + $0x58] sm:$0xff] }
 0x37e   : > { %5622 = vmatpush.bf16.msra.mxu3 %v8889_v42 }
 0x382   : > { %5623 = vmatpush.bf16.msra.mxu3 %v8888_v53 }
 0x386   : > { %5624 = vmatpush.bf16.msra.mxu3 %v8887_v56 }
 0x38a   : > { %5625 = vmatpush.bf16.msra.mxu3 %v8886_v62 }
 0x3c6   : > { %v5298_v49 = vpop.f32.mrf.mxu1  ;;  %v5337_v24 = vpop.f32.mrf.mxu0 }
 0x3c7   : > { %v5299_v32 = vadd.f32 %v5298_v49, %v4899_v6  ;;  %v5338_v22 = vadd.f32 %v5337_v24, %v4900_v58 }
 0x3ce   : > { %v5300_v4 = vpop.f32.mrf.mxu1  ;;  %v5339_v45 = vpop.f32.mrf.mxu0 }
 0x3d8   : > { %v5350_v3 = vpop.f32.mrf.mxu1 }
 0x3d9   : > { %v5389_v41 = vpop.f32.mrf.mxu0  ;;  %v5351_v9 = vadd.f32 %v5350_v3, %v5338_v22 }
 0x3de   : > { %v5311_v0 = vpop.f32.mrf.mxu2 }
 0x3df   : > { %v5312_v39 = vadd.f32 %v5311_v0, %v5299_v32 }
 0x3e0   : > { %v5352_v33 = vpop.f32.mrf.mxu1 }
 0x3e1   : > { %v5391_v7 = vpop.f32.mrf.mxu0 }
 0x3e6   : > { %v5313_v44 = vpop.f32.mrf.mxu2 }
 0x3eb   : > { %v5402_v59 = vpop.f32.mrf.mxu1 }
 0x3f0   : > { %v5324_v12 = vpop.f32.mrf.mxu3  ;;  %v5363_v23 = vpop.f32.mrf.mxu2 }
 0x3f1   : > { %v5325_v25 = vadd.f32 %v5324_v12, %v5312_v39  ;;  %v5364_v17 = vadd.f32 %v5363_v23, %v5351_v9 }
 0x3f3   : > { %v5406_v26 = vpack.c.bf16 %v5325_v25, %v5325_v25  ;;  %v5407_v15 = vpack.c.bf16 %v5364_v17, %v5364_v17  ;;  %v5404_v27 = vpop.f32.mrf.mxu1 }
 0x3f5   : > { %5613 = vmatmul.bf16.vlgmr.msra.gmra.mxu2 %v5406_v26  ;;  %5626 = vmatmul.bf16.vlgmr.msra.gmra.mxu3 %v5407_v15 }
 0x3f8   : > { %v5326_v1 = vpop.f32.mrf.mxu3  ;;  %v5365_v29 = vpop.f32.mrf.mxu2 }
 0x400   : > { %v5376_v28 = vpop.f32.mrf.mxu3 }
 0x401   : > { %v5377_v14 = vadd.f32 %v5376_v28, %v4901_v35 }
 0x403   : > { %v5390_v13 = vadd.f32 %v5389_v41, %v5377_v14 }
 0x405   : > { %v5403_v37 = vadd.f32 %v5402_v59, %v5390_v13 }
 0x407   : > { %v5408_v38 = vpack.c.bf16 %v5403_v37, %v5403_v37 }
 0x408   : > { %v5378_v54 = vpop.f32.mrf.mxu3 }
 0x409   : > { %5639 = vmatmul.bf16.vlgmr.msrb.gmra.mxu0 %v5408_v38 }
 0x478   : > { %v5614_v11 = vpop.f32.mrf.mxu2  ;;  %v5627_v20 = vpop.f32.mrf.mxu3 }
 0x479   : > { %v5615_v43 = vadd.f32 %v9028_v19, %v5614_v11 }
 0x47b   : > { %v5628_v57 = vadd.f32 %v5627_v20, %v5615_v43 }
 0x480   : > { %v5616_v40 = vpop.f32.mrf.mxu2  ;;  %v5629_v30 = vpop.f32.mrf.mxu3 }
 0x486   : > { %v5640_v31 = vpop.f32.mrf.mxu0 }
 0x487   : > { %v5641_v16 = vadd.f32 %v5640_v31, %v5628_v57 }
 0x489   : > { %5644 = vst [vmem:[%s516_s13] sm:$0xff] %v5641_v16 }
 0x48a   : > { %9298 = shalt.err (!%p9295_p9)
}
 0x48b   : > { %8935 = dma.vmem_to_hbm [thread:$0]  (%p9524_p0), %s5659_s29, 128, %s5661_s4, %s5646_s7  }
 0x48e   : > { %v5642_v46 = vpop.f32.mrf.mxu0 }
 0x48f PF: > { %s5672_s3 = sand.u32 1, %s9341_s17   ;;  %p9870_p10 = scmp.ge.s32.totalorder %s9353_s20, 2 }
 0x490   : > { %s5673_s16 = scalar_lea.sflag [#allocation4], %s5672_s3 }
 0x491   : > { %p8964_p11 = pnand %p9870_p10, %p9530_p6 }
 0x493   : > { %p8965_p12 = pneg %p8964_p11 }
 0x495   : > { %9336 = dma.done.wait (%p8965_p12), %s5673_s16, 128  }
 0x496   : > { %9338 = vsyncadd (%p8965_p12), %s5673_s16, 4294967168  ;;  %p28_p2 = scmp.ge.s32.totalorder %s9504_s1, 4   ;;  %s9871_s17 = smov %s9345_s18 }
 0x497   : > { %s9872_s18 = smov %s9349_s19  ;;  %s9873_s19 = smov %s9516_s5 }
 0x498   : > { %s9874_s20 = smov %s9504_s1  ;;  %30 = sbr.rel (!%p28_p2) target bundleno = 18 (0x12), region = 137 }
 0x49d   :  { %5679 = vsyncpa [#allocation3], 1 }
 0x49e   :  { %5681 = vsyncpa [#allocation3 + $0x1], 1 }
 0x49f   :  { %5682 = vsyncpa [#allocation6], 1 }
 0x4a0   :  { %5683 = vsyncpa [#allocation9], 1 }
 0x4a1   :  { %5684 = vsyncpa [#allocation12], 1 }
 0x4a2   :  { %5685 = vsyncpa [#allocation15], 1 }
 0x4a3   :  { %5686 = vsyncpa [#allocation4], 1 }
 0x4a4   :  { %5688 = vsyncpa [#allocation4 + $0x1], 1 }

</bundles_post_ra>
